<compile_context>
chip_gen: v6e
topology: v6e:2x2x1
jax: 0.10.0
libtpu: 0.0.40
codegen_flags: <defaults>
</compile_context>

<pallas_src>
import functools

import jax
import jax.numpy as jnp
import numpy as np
from jax.experimental import pallas as pl
from jax.experimental.pallas import tpu as pltpu


# ------------------------------- Fused kernel ------------------------------- #

def _qrdqn_kernel(p1_ref, w1_ref, b1_ref, w2_ref, b2_ref, w3_ref, b3_ref,
                  wa0_ref, ba0_ref, wa1_ref, ba1_ref,
                  u0_ref, u1_ref, sel_ref, bf1_ref,
                  wf2_ref, bf2_ref, wm_ref, bm_ref,
                  val_ref, act_ref,
                  pad_ref, col_ref,
                  *, B, H, W):
    f32 = jnp.float32
    bf16 = jnp.bfloat16
    BHW = B * H * W
    OFF = 8  # sublane-aligned column offset of the activation in the padded scratch

    def conv3x3(act, w_ref, b_ref):
        """act: (BHW, 128) f32 activation (real channels in the low lanes, rest 0).

        Scatters it into the zero-bordered padded scratch, stages the nine
        shifted windows side by side (one full 128-lane tile per tap) in the
        im2col buffer and performs ONE bf16 MXU matmul (K = 9*128)."""
        pad_ref[:, 1:H + 1, OFF:OFF + W, :] = act.reshape(B, H, W, 128)
        for t in range(9):
            dy, dx = t // 3, t % 3
            win = pad_ref[:, dy:dy + H, OFF - 1 + dx:OFF - 1 + dx + W, :]
            col_ref[:, t * 128:(t + 1) * 128] = win.reshape(BHW, 128).astype(bf16)
        out = jnp.dot(col_ref[...], w_ref[...], preferred_element_type=f32)
        return jnp.maximum(out + b_ref[...], 0.0)               # (BHW, 128)

    # Zero once: only the spatial border of the padded scratch must stay zero;
    # the interior (all 128 lanes) is fully rewritten before every use.
    pad_ref[...] = jnp.zeros_like(pad_ref)

    # conv1 (5 -> 32, output lanes zero-padded to 128): wrapper-built im2col.
    a1 = jnp.dot(p1_ref[...], w1_ref[...], preferred_element_type=f32)
    a1 = jnp.maximum(a1 + b1_ref[...], 0.0)                     # (BHW, 128)

    a2 = conv3x3(a1, w2_ref, b2_ref)                            # conv2 (32 -> 64)
    a3 = conv3x3(a2, w3_ref, b3_ref)                            # conv3 (64 -> 128)
    a3b = a3.astype(bf16)

    # act_conv1 (1x1, 128 -> 2), kept entirely in VMEM.  The NCHW-order flatten
    # + act_fc1 are folded into per-channel batch-tiled weights (u0/u1) and a
    # batch segment-sum matmul (sel): no transposes / minor-dim reshapes needed.
    r0 = jnp.maximum(
        jnp.dot(a3b, wa0_ref[...], preferred_element_type=f32)[:, 0:1]
        + ba0_ref[...], 0.0)                                    # (BHW, 1)
    r1 = jnp.maximum(
        jnp.dot(a3b, wa1_ref[...], preferred_element_type=f32)[:, 0:1]
        + ba1_ref[...], 0.0)                                    # (BHW, 1)
    t_feat = r0 * u0_ref[...].astype(f32) + r1 * u1_ref[...].astype(f32)  # (BHW, 64)
    h = jnp.dot(sel_ref[...], t_feat.astype(bf16), preferred_element_type=f32)
    h = jnp.maximum(h + bf1_ref[...], 0.0).astype(bf16)         # (B, 64)

    # act_fc2 -> quantile values; folded quantile-mean weight -> log_softmax.
    val = jnp.dot(h, wf2_ref[...], preferred_element_type=f32) + bf2_ref[...]
    val_ref[...] = val                                          # (B, N*A)
    mean = jnp.dot(h, wm_ref[...], preferred_element_type=f32) + bm_ref[...]
    z = mean - jnp.max(mean, axis=1, keepdims=True)
    lse = jnp.log(jnp.sum(jnp.exp(z), axis=1, keepdims=True))
    act_ref[...] = z - lse                                      # (B, A)


# ----------------------- Parameter prep (trace-time) ------------------------ #

def prepare_params(params, *, board_w, board_h, quantiles, batch):
    """Precompute kernel-ready (bf16, padded, reshaped, folded) parameters."""
    H, W = board_h, board_w
    HW = H * W
    A = HW
    N = quantiles
    bf16, f32 = jnp.bfloat16, jnp.float32

    def pad_cout(w, cout_to=128):              # (K, Cout) -> (K, 128)
        k, cout = w.shape
        return jnp.zeros((k, cout_to), w.dtype).at[:, :cout].set(w)

    def pad_bias(b, cout_to=128):
        return jnp.zeros((1, cout_to), f32).at[0, :b.shape[0]].set(b.astype(f32))

    def conv_taps(w_hwio):                     # (3,3,Cin,Cout) -> (9*128, 128)
        cin, cout = w_hwio.shape[2], w_hwio.shape[3]
        w9 = w_hwio.reshape(9, cin, cout)
        wp = jnp.zeros((9, 128, 128), w_hwio.dtype).at[:, :cin, :cout].set(w9)
        return wp.reshape(9 * 128, 128).astype(bf16)

    # conv1: im2col weight (9*5, 32) zero-padded to 128 output lanes.
    w1 = pad_cout(params["w_c1"].reshape(9 * 5, 32)).astype(bf16)
    b1 = pad_bias(params["b_c1"])
    w2 = conv_taps(params["w_c2"])
    b2 = pad_bias(params["b_c2"])
    w3 = conv_taps(params["w_c3"])
    b3 = pad_bias(params["b_c3"])

    # 1x1 conv: one (128, 8) weight per output channel (only column 0 is real).
    wa = params["w_a1"]                                          # (128, 2)
    wa0 = jnp.zeros((128, 8), f32).at[:, 0].set(wa[:, 0]).astype(bf16)
    wa1 = jnp.zeros((128, 8), f32).at[:, 0].set(wa[:, 1]).astype(bf16)
    ba0 = params["b_a1"][0].reshape(1, 1).astype(f32)
    ba1 = params["b_a1"][1].reshape(1, 1).astype(f32)

    # act_fc1 with the NCHW flatten folded in: per-channel weight blocks tiled
    # over the batch, plus a batch segment-sum selection matrix.
    wf1 = params["w_f1"]                                         # (2*HW, 64)
    u0 = jnp.tile(wf1[:HW, :], (batch, 1)).astype(bf16)          # (B*HW, 64)
    u1 = jnp.tile(wf1[HW:, :], (batch, 1)).astype(bf16)          # (B*HW, 64)
    sel = jnp.repeat(jnp.eye(batch, dtype=f32), HW, axis=1).astype(bf16)  # (B, B*HW)
    bf1 = params["b_f1"].reshape(1, 64).astype(f32)

    # act_fc2, plus the quantile mean folded into a (64, A) weight.
    wf2 = params["w_f2"]                                         # (64, N*A)
    bf2 = params["b_f2"].reshape(1, N * A).astype(f32)
    wm = wf2.reshape(64, N, A).mean(axis=1).astype(bf16)         # (64, A)
    bm = params["b_f2"].reshape(N, A).mean(axis=0).reshape(1, A).astype(f32)

    return dict(w1=w1, b1=b1, w2=w2, b2=b2, w3=w3, b3=b3,
                wa0=wa0, ba0=ba0, wa1=wa1, ba1=ba1,
                u0=u0, u1=u1, sel=sel, bf1=bf1,
                wf2=wf2.astype(bf16), bf2=bf2, wm=wm, bm=bm)


# ------------------------------ Forward (glue) ------------------------------ #

def qrdqn_forward(x_nchw, kp, *, board_w, board_h, quantiles):
    H, W = board_h, board_w
    A = H * W
    N = quantiles
    B = x_nchw.shape[0]
    Cin = x_nchw.shape[1]
    BHW = B * H * W

    # NCHW -> NHWC and layer-1 im2col, done once in XLA on the tiny input.
    x = jnp.transpose(x_nchw, (0, 2, 3, 1))
    xp = jnp.pad(x, ((0, 0), (1, 1), (1, 1), (0, 0)))
    cols = [xp[:, dy:dy + H, dx:dx + W, :] for dy in range(3) for dx in range(3)]
    p1 = jnp.concatenate(cols, axis=-1).reshape(BHW, 9 * Cin).astype(jnp.bfloat16)

    args = (p1, kp["w1"], kp["b1"], kp["w2"], kp["b2"], kp["w3"], kp["b3"],
            kp["wa0"], kp["ba0"], kp["wa1"], kp["ba1"],
            kp["u0"], kp["u1"], kp["sel"], kp["bf1"],
            kp["wf2"], kp["bf2"], kp["wm"], kp["bm"])

    def full_spec(a):
        n = a.ndim
        return pl.BlockSpec(a.shape, lambda i, n=n: (0,) * n)

    kern = functools.partial(_qrdqn_kernel, B=B, H=H, W=W)

    # TODO(synk): for large batches add a leading "parallel" grid axis over batch
    # tiles so both v7x TensorCores are used; at toy batch sizes one step is best.
    val, act = pl.pallas_call(
        kern,
        out_shape=(jax.ShapeDtypeStruct((B, N * A), jnp.float32),
                   jax.ShapeDtypeStruct((B, A), jnp.float32)),
        grid=(1,),
        in_specs=[full_spec(a) for a in args],
        out_specs=(pl.BlockSpec((B, N * A), lambda i: (0, 0)),
                   pl.BlockSpec((B, A), lambda i: (0, 0))),
        scratch_shapes=[
            pltpu.VMEM((B, H + 2, 8 + W + 1, 128), jnp.float32),   # padded activation
            pltpu.VMEM((BHW, 9 * 128), jnp.bfloat16),              # im2col staging
        ],
        compiler_params=pltpu.CompilerParams(
            dimension_semantics=("arbitrary",)),
    )(*args)

    return act, val.reshape(B, N, A)


# ----------------------------- Reference (JAX) ------------------------------ #

def ref_forward(x_nchw, p, *, board_w, board_h, quantiles):
    A = board_w * board_h
    N = quantiles
    dn = ("NHWC", "HWIO", "NHWC")

    def conv(x, w, b):
        y = jax.lax.conv_general_dilated(x, w, (1, 1), "SAME", dimension_numbers=dn)
        return jax.nn.relu(y + b)

    x = jnp.transpose(x_nchw, (0, 2, 3, 1))
    x = conv(x, p["w_c1"], p["b_c1"])
    x = conv(x, p["w_c2"], p["b_c2"])
    x = conv(x, p["w_c3"], p["b_c3"])
    xv = jax.nn.relu(
        jax.lax.conv_general_dilated(x, p["w_a1"].reshape(1, 1, 128, 2), (1, 1),
                                     "VALID", dimension_numbers=dn) + p["b_a1"])
    xv = jnp.transpose(xv, (0, 3, 1, 2)).reshape(xv.shape[0], 2 * board_h * board_w)
    h = jax.nn.relu(xv @ p["w_f1"] + p["b_f1"])
    val = h @ p["w_f2"] + p["b_f2"]
    x_val = val.reshape(-1, N, A)
    x_act = jax.nn.log_softmax(x_val.mean(axis=1), axis=1)
    return x_act, x_val


# --------------------------------- Params ----------------------------------- #

def init_params(key, board_w, board_h, quantiles):
    A = board_w * board_h
    N = quantiles
    ks = jax.random.split(key, 12)
    s = 0.05
    return {
        "w_c1": s * jax.random.normal(ks[0], (3, 3, 5, 32), jnp.float32),
        "b_c1": s * jax.random.normal(ks[1], (32,), jnp.float32),
        "w_c2": s * jax.random.normal(ks[2], (3, 3, 32, 64), jnp.float32),
        "b_c2": s * jax.random.normal(ks[3], (64,), jnp.float32),
        "w_c3": s * jax.random.normal(ks[4], (3, 3, 64, 128), jnp.float32),
        "b_c3": s * jax.random.normal(ks[5], (128,), jnp.float32),
        "w_a1": s * jax.random.normal(ks[6], (128, 2), jnp.float32),
        "b_a1": s * jax.random.normal(ks[7], (2,), jnp.float32),
        "w_f1": s * jax.random.normal(ks[8], (2 * board_w * board_h, 64), jnp.float32),
        "b_f1": s * jax.random.normal(ks[9], (64,), jnp.float32),
        "w_f2": s * jax.random.normal(ks[10], (64, A * N), jnp.float32),
        "b_f2": s * jax.random.normal(ks[11], (A * N,), jnp.float32),
    }


# ---------------------------------- Main ------------------------------------ #

if __name__ == "__main__":
    board_w = board_h = 8
    quantiles = 8
    batch = 2

    key = jax.random.PRNGKey(0)
    k_x, k_p = jax.random.split(key)
    x = jax.random.normal(k_x, (batch, 5, board_h, board_w), jnp.float32)  # NCHW
    params = init_params(k_p, board_w, board_h, quantiles)

    # One-time weight preparation (reshape / pad / fold / bf16-cast).
    kparams = prepare_params(params, board_w=board_w, board_h=board_h,
                             quantiles=quantiles, batch=batch)

    fwd = jax.jit(functools.partial(qrdqn_forward, board_w=board_w,
                                    board_h=board_h, quantiles=quantiles))
    x_act, x_val = fwd(x, kparams)
    jax.block_until_ready((x_act, x_val))

    # Sanity check against a pure-JAX f32 reference.
    r_act, r_val = ref_forward(x, params, board_w=board_w, board_h=board_h,
                               quantiles=quantiles)
    assert x_act.shape == (batch, board_w * board_h)
    assert x_val.shape == (batch, quantiles, board_w * board_h)
    np.testing.assert_allclose(np.asarray(x_val), np.asarray(r_val), rtol=1e-2, atol=1e-2)
    np.testing.assert_allclose(np.asarray(x_act), np.asarray(r_act), rtol=1e-2, atol=1e-2)

    print("KERNEL_OK")
</pallas_src>

<mosaic_0001>
module attributes {stable_mosaic.version = 11 : i64} {
  func.func @_qrdqn_kernel(%arg0: i32, %arg1: memref<128x45xbf16, #tpu.memory_space<vmem>>, %arg2: memref<45x128xbf16, #tpu.memory_space<vmem>>, %arg3: memref<1x128xf32, #tpu.memory_space<vmem>>, %arg4: memref<1152x128xbf16, #tpu.memory_space<vmem>>, %arg5: memref<1x128xf32, #tpu.memory_space<vmem>>, %arg6: memref<1152x128xbf16, #tpu.memory_space<vmem>>, %arg7: memref<1x128xf32, #tpu.memory_space<vmem>>, %arg8: memref<128x8xbf16, #tpu.memory_space<vmem>>, %arg9: memref<1x1xf32, #tpu.memory_space<vmem>>, %arg10: memref<128x8xbf16, #tpu.memory_space<vmem>>, %arg11: memref<1x1xf32, #tpu.memory_space<vmem>>, %arg12: memref<128x64xbf16, #tpu.memory_space<vmem>>, %arg13: memref<128x64xbf16, #tpu.memory_space<vmem>>, %arg14: memref<2x128xbf16, #tpu.memory_space<vmem>>, %arg15: memref<1x64xf32, #tpu.memory_space<vmem>>, %arg16: memref<64x512xbf16, #tpu.memory_space<vmem>>, %arg17: memref<1x512xf32, #tpu.memory_space<vmem>>, %arg18: memref<64x64xbf16, #tpu.memory_space<vmem>>, %arg19: memref<1x64xf32, #tpu.memory_space<vmem>>, %arg20: memref<2x512xf32, #tpu.memory_space<vmem>>, %arg21: memref<2x64xf32, #tpu.memory_space<vmem>>, %arg22: memref<2x10x17x128xf32, #tpu.memory_space<vmem>>, %arg23: memref<128x1152xbf16, #tpu.memory_space<vmem>>) attributes {dimension_semantics = [#tpu.dimension_semantics<arbitrary>], iteration_bounds = array<i64: 1>, scalar_prefetch = 0 : i64, scratch_operands = 2 : i64, tpu.core_type = #tpu.core_type<tc>, window_params = [{pipeline_mode = #tpu.pipeline_mode<synchronous>, transform_indices = @transform_0, window_bounds = array<i64: 128, 45>}, {pipeline_mode = #tpu.pipeline_mode<synchronous>, transform_indices = @transform_1, window_bounds = array<i64: 45, 128>}, {pipeline_mode = #tpu.pipeline_mode<synchronous>, transform_indices = @transform_2, window_bounds = array<i64: 1, 128>}, {pipeline_mode = #tpu.pipeline_mode<synchronous>, transform_indices = @transform_3, window_bounds = array<i64: 1152, 128>}, {pipeline_mode = #tpu.pipeline_mode<synchronous>, transform_indices = @transform_4, window_bounds = array<i64: 1, 128>}, {pipeline_mode = #tpu.pipeline_mode<synchronous>, transform_indices = @transform_5, window_bounds = array<i64: 1152, 128>}, {pipeline_mode = #tpu.pipeline_mode<synchronous>, transform_indices = @transform_6, window_bounds = array<i64: 1, 128>}, {pipeline_mode = #tpu.pipeline_mode<synchronous>, transform_indices = @transform_7, window_bounds = array<i64: 128, 8>}, {pipeline_mode = #tpu.pipeline_mode<synchronous>, transform_indices = @transform_8, window_bounds = array<i64: 1, 1>}, {pipeline_mode = #tpu.pipeline_mode<synchronous>, transform_indices = @transform_9, window_bounds = array<i64: 128, 8>}, {pipeline_mode = #tpu.pipeline_mode<synchronous>, transform_indices = @transform_10, window_bounds = array<i64: 1, 1>}, {pipeline_mode = #tpu.pipeline_mode<synchronous>, transform_indices = @transform_11, window_bounds = array<i64: 128, 64>}, {pipeline_mode = #tpu.pipeline_mode<synchronous>, transform_indices = @transform_12, window_bounds = array<i64: 128, 64>}, {pipeline_mode = #tpu.pipeline_mode<synchronous>, transform_indices = @transform_13, window_bounds = array<i64: 2, 128>}, {pipeline_mode = #tpu.pipeline_mode<synchronous>, transform_indices = @transform_14, window_bounds = array<i64: 1, 64>}, {pipeline_mode = #tpu.pipeline_mode<synchronous>, transform_indices = @transform_15, window_bounds = array<i64: 64, 512>}, {pipeline_mode = #tpu.pipeline_mode<synchronous>, transform_indices = @transform_16, window_bounds = array<i64: 1, 512>}, {pipeline_mode = #tpu.pipeline_mode<synchronous>, transform_indices = @transform_17, window_bounds = array<i64: 64, 64>}, {pipeline_mode = #tpu.pipeline_mode<synchronous>, transform_indices = @transform_18, window_bounds = array<i64: 1, 64>}, {pipeline_mode = #tpu.pipeline_mode<synchronous>, transform_indices = @transform_19, window_bounds = array<i64: 2, 512>}, {pipeline_mode = #tpu.pipeline_mode<synchronous>, transform_indices = @transform_20, window_bounds = array<i64: 2, 64>}]} {
    %cst = arith.constant 0.000000e+00 : f32
    %0 = vector.broadcast %cst : f32 to vector<2x10x17x128xf32>
    %c0 = arith.constant 0 : index
    %c0_0 = arith.constant 0 : index
    %c0_1 = arith.constant 0 : index
    %c0_2 = arith.constant 0 : index
    %1 = vector.load %arg22[%c0, %c0_0, %c0_1, %c0_2] : memref<2x10x17x128xf32, #tpu.memory_space<vmem>>, vector<2x10x17x128xf32>
    tpu.vector_store %arg22[%c0, %c0_0, %c0_1, %c0_2], %0 {strides = array<i32>} : memref<2x10x17x128xf32, #tpu.memory_space<vmem>>, vector<2x10x17x128xf32>,
    %c0_3 = arith.constant 0 : index
    %c0_4 = arith.constant 0 : index
    %2 = vector.load %arg1[%c0_3, %c0_4] : memref<128x45xbf16, #tpu.memory_space<vmem>>, vector<128x45xbf16>
    %c0_5 = arith.constant 0 : index
    %c0_6 = arith.constant 0 : index
    %3 = vector.load %arg2[%c0_5, %c0_6] : memref<45x128xbf16, #tpu.memory_space<vmem>>, vector<45x128xbf16>
    %cst_7 = arith.constant dense<0.000000e+00> : vector<128x128xf32>
    %4 = tpu.matmul %2, %3, %cst_7 {dimension_numbers = #tpu.dot_dimension_numbers<[1], [0], [0], [1], [0, 0, 1, 1], [], []>} : vector<128x45xbf16>, vector<45x128xbf16>, vector<128x128xf32> -> vector<128x128xf32>
    %c0_8 = arith.constant 0 : index
    %c0_9 = arith.constant 0 : index
    %5 = vector.load %arg3[%c0_8, %c0_9] : memref<1x128xf32, #tpu.memory_space<vmem>>, vector<1x128xf32>
    %6 = vector.broadcast %5 : vector<1x128xf32> to vector<128x128xf32>
    %7 = arith.addf %4, %6 : vector<128x128xf32>
    %cst_10 = arith.constant 0.000000e+00 : f32
    %8 = vector.broadcast %cst_10 : f32 to vector<128x128xf32>
    %9 = arith.maximumf %7, %8 : vector<128x128xf32>
    %10 = vector.shape_cast %9 : vector<128x128xf32> to vector<2x8x8x128xf32>
    %c0_11 = arith.constant 0 : index
    %c1 = arith.constant 1 : index
    %c8 = arith.constant 8 : index
    %c0_12 = arith.constant 0 : index
    %11 = vector.load %arg22[%c0_11, %c1, %c8, %c0_12] : memref<2x10x17x128xf32, #tpu.memory_space<vmem>>, vector<2x8x8x128xf32>
    tpu.vector_store %arg22[%c0_11, %c1, %c8, %c0_12], %10 {strides = array<i32>} : memref<2x10x17x128xf32, #tpu.memory_space<vmem>>, vector<2x8x8x128xf32>,
    %c0_13 = arith.constant 0 : index
    %c0_14 = arith.constant 0 : index
    %c7 = arith.constant 7 : index
    %c0_15 = arith.constant 0 : index
    %12 = vector.load %arg22[%c0_13, %c0_14, %c7, %c0_15] : memref<2x10x17x128xf32, #tpu.memory_space<vmem>>, vector<2x8x8x128xf32>
    %13 = vector.shape_cast %12 : vector<2x8x8x128xf32> to vector<128x128xf32>
    %14 = arith.truncf %13 : vector<128x128xf32> to vector<128x128xbf16>
    %c0_16 = arith.constant 0 : index
    %c0_17 = arith.constant 0 : index
    %15 = vector.load %arg23[%c0_16, %c0_17] : memref<128x1152xbf16, #tpu.memory_space<vmem>>, vector<128x128xbf16>
    tpu.vector_store %arg23[%c0_16, %c0_17], %14 {strides = array<i32>} : memref<128x1152xbf16, #tpu.memory_space<vmem>>, vector<128x128xbf16>,
    %c0_18 = arith.constant 0 : index
    %c0_19 = arith.constant 0 : index
    %c8_20 = arith.constant 8 : index
    %c0_21 = arith.constant 0 : index
    %16 = vector.load %arg22[%c0_18, %c0_19, %c8_20, %c0_21] : memref<2x10x17x128xf32, #tpu.memory_space<vmem>>, vector<2x8x8x128xf32>
    %17 = vector.shape_cast %16 : vector<2x8x8x128xf32> to vector<128x128xf32>
    %18 = arith.truncf %17 : vector<128x128xf32> to vector<128x128xbf16>
    %c0_22 = arith.constant 0 : index
    %c128 = arith.constant 128 : index
    %19 = vector.load %arg23[%c0_22, %c128] : memref<128x1152xbf16, #tpu.memory_space<vmem>>, vector<128x128xbf16>
    tpu.vector_store %arg23[%c0_22, %c128], %18 {strides = array<i32>} : memref<128x1152xbf16, #tpu.memory_space<vmem>>, vector<128x128xbf16>,
    %c0_23 = arith.constant 0 : index
    %c0_24 = arith.constant 0 : index
    %c9 = arith.constant 9 : index
    %c0_25 = arith.constant 0 : index
    %20 = vector.load %arg22[%c0_23, %c0_24, %c9, %c0_25] : memref<2x10x17x128xf32, #tpu.memory_space<vmem>>, vector<2x8x8x128xf32>
    %21 = vector.shape_cast %20 : vector<2x8x8x128xf32> to vector<128x128xf32>
    %22 = arith.truncf %21 : vector<128x128xf32> to vector<128x128xbf16>
    %c0_26 = arith.constant 0 : index
    %c256 = arith.constant 256 : index
    %23 = vector.load %arg23[%c0_26, %c256] : memref<128x1152xbf16, #tpu.memory_space<vmem>>, vector<128x128xbf16>
    tpu.vector_store %arg23[%c0_26, %c256], %22 {strides = array<i32>} : memref<128x1152xbf16, #tpu.memory_space<vmem>>, vector<128x128xbf16>,
    %c0_27 = arith.constant 0 : index
    %c1_28 = arith.constant 1 : index
    %c7_29 = arith.constant 7 : index
    %c0_30 = arith.constant 0 : index
    %24 = vector.load %arg22[%c0_27, %c1_28, %c7_29, %c0_30] : memref<2x10x17x128xf32, #tpu.memory_space<vmem>>, vector<2x8x8x128xf32>
    %25 = vector.shape_cast %24 : vector<2x8x8x128xf32> to vector<128x128xf32>
    %26 = arith.truncf %25 : vector<128x128xf32> to vector<128x128xbf16>
    %c0_31 = arith.constant 0 : index
    %c384 = arith.constant 384 : index
    %27 = vector.load %arg23[%c0_31, %c384] : memref<128x1152xbf16, #tpu.memory_space<vmem>>, vector<128x128xbf16>
    tpu.vector_store %arg23[%c0_31, %c384], %26 {strides = array<i32>} : memref<128x1152xbf16, #tpu.memory_space<vmem>>, vector<128x128xbf16>,
    %c0_32 = arith.constant 0 : index
    %c1_33 = arith.constant 1 : index
    %c8_34 = arith.constant 8 : index
    %c0_35 = arith.constant 0 : index
    %28 = vector.load %arg22[%c0_32, %c1_33, %c8_34, %c0_35] : memref<2x10x17x128xf32, #tpu.memory_space<vmem>>, vector<2x8x8x128xf32>
    %29 = vector.shape_cast %28 : vector<2x8x8x128xf32> to vector<128x128xf32>
    %30 = arith.truncf %29 : vector<128x128xf32> to vector<128x128xbf16>
    %c0_36 = arith.constant 0 : index
    %c512 = arith.constant 512 : index
    %31 = vector.load %arg23[%c0_36, %c512] : memref<128x1152xbf16, #tpu.memory_space<vmem>>, vector<128x128xbf16>
    tpu.vector_store %arg23[%c0_36, %c512], %30 {strides = array<i32>} : memref<128x1152xbf16, #tpu.memory_space<vmem>>, vector<128x128xbf16>,
    %c0_37 = arith.constant 0 : index
    %c1_38 = arith.constant 1 : index
    %c9_39 = arith.constant 9 : index
    %c0_40 = arith.constant 0 : index
    %32 = vector.load %arg22[%c0_37, %c1_38, %c9_39, %c0_40] : memref<2x10x17x128xf32, #tpu.memory_space<vmem>>, vector<2x8x8x128xf32>
    %33 = vector.shape_cast %32 : vector<2x8x8x128xf32> to vector<128x128xf32>
    %34 = arith.truncf %33 : vector<128x128xf32> to vector<128x128xbf16>
    %c0_41 = arith.constant 0 : index
    %c640 = arith.constant 640 : index
    %35 = vector.load %arg23[%c0_41, %c640] : memref<128x1152xbf16, #tpu.memory_space<vmem>>, vector<128x128xbf16>
    tpu.vector_store %arg23[%c0_41, %c640], %34 {strides = array<i32>} : memref<128x1152xbf16, #tpu.memory_space<vmem>>, vector<128x128xbf16>,
    %c0_42 = arith.constant 0 : index
    %c2 = arith.constant 2 : index
    %c7_43 = arith.constant 7 : index
    %c0_44 = arith.constant 0 : index
    %36 = vector.load %arg22[%c0_42, %c2, %c7_43, %c0_44] : memref<2x10x17x128xf32, #tpu.memory_space<vmem>>, vector<2x8x8x128xf32>
    %37 = vector.shape_cast %36 : vector<2x8x8x128xf32> to vector<128x128xf32>
    %38 = arith.truncf %37 : vector<128x128xf32> to vector<128x128xbf16>
    %c0_45 = arith.constant 0 : index
    %c768 = arith.constant 768 : index
    %39 = vector.load %arg23[%c0_45, %c768] : memref<128x1152xbf16, #tpu.memory_space<vmem>>, vector<128x128xbf16>
    tpu.vector_store %arg23[%c0_45, %c768], %38 {strides = array<i32>} : memref<128x1152xbf16, #tpu.memory_space<vmem>>, vector<128x128xbf16>,
    %c0_46 = arith.constant 0 : index
    %c2_47 = arith.constant 2 : index
    %c8_48 = arith.constant 8 : index
    %c0_49 = arith.constant 0 : index
    %40 = vector.load %arg22[%c0_46, %c2_47, %c8_48, %c0_49] : memref<2x10x17x128xf32, #tpu.memory_space<vmem>>, vector<2x8x8x128xf32>
    %41 = vector.shape_cast %40 : vector<2x8x8x128xf32> to vector<128x128xf32>
    %42 = arith.truncf %41 : vector<128x128xf32> to vector<128x128xbf16>
    %c0_50 = arith.constant 0 : index
    %c896 = arith.constant 896 : index
    %43 = vector.load %arg23[%c0_50, %c896] : memref<128x1152xbf16, #tpu.memory_space<vmem>>, vector<128x128xbf16>
    tpu.vector_store %arg23[%c0_50, %c896], %42 {strides = array<i32>} : memref<128x1152xbf16, #tpu.memory_space<vmem>>, vector<128x128xbf16>,
    %c0_51 = arith.constant 0 : index
    %c2_52 = arith.constant 2 : index
    %c9_53 = arith.constant 9 : index
    %c0_54 = arith.constant 0 : index
    %44 = vector.load %arg22[%c0_51, %c2_52, %c9_53, %c0_54] : memref<2x10x17x128xf32, #tpu.memory_space<vmem>>, vector<2x8x8x128xf32>
    %45 = vector.shape_cast %44 : vector<2x8x8x128xf32> to vector<128x128xf32>
    %46 = arith.truncf %45 : vector<128x128xf32> to vector<128x128xbf16>
    %c0_55 = arith.constant 0 : index
    %c1024 = arith.constant 1024 : index
    %47 = vector.load %arg23[%c0_55, %c1024] : memref<128x1152xbf16, #tpu.memory_space<vmem>>, vector<128x128xbf16>
    tpu.vector_store %arg23[%c0_55, %c1024], %46 {strides = array<i32>} : memref<128x1152xbf16, #tpu.memory_space<vmem>>, vector<128x128xbf16>,
    %c0_56 = arith.constant 0 : index
    %c0_57 = arith.constant 0 : index
    %48 = vector.load %arg23[%c0_56, %c0_57] : memref<128x1152xbf16, #tpu.memory_space<vmem>>, vector<128x1152xbf16>
    %c0_58 = arith.constant 0 : index
    %c0_59 = arith.constant 0 : index
    %49 = vector.load %arg4[%c0_58, %c0_59] : memref<1152x128xbf16, #tpu.memory_space<vmem>>, vector<1152x128xbf16>
    %cst_60 = arith.constant dense<0.000000e+00> : vector<128x128xf32>
    %50 = tpu.matmul %48, %49, %cst_60 {dimension_numbers = #tpu.dot_dimension_numbers<[1], [0], [0], [1], [0, 0, 1, 1], [], []>} : vector<128x1152xbf16>, vector<1152x128xbf16>, vector<128x128xf32> -> vector<128x128xf32>
    %c0_61 = arith.constant 0 : index
    %c0_62 = arith.constant 0 : index
    %51 = vector.load %arg5[%c0_61, %c0_62] : memref<1x128xf32, #tpu.memory_space<vmem>>, vector<1x128xf32>
    %52 = vector.broadcast %51 : vector<1x128xf32> to vector<128x128xf32>
    %53 = arith.addf %50, %52 : vector<128x128xf32>
    %cst_63 = arith.constant 0.000000e+00 : f32
    %54 = vector.broadcast %cst_63 : f32 to vector<128x128xf32>
    %55 = arith.maximumf %53, %54 : vector<128x128xf32>
    %56 = vector.shape_cast %55 : vector<128x128xf32> to vector<2x8x8x128xf32>
    %c0_64 = arith.constant 0 : index
    %c1_65 = arith.constant 1 : index
    %c8_66 = arith.constant 8 : index
    %c0_67 = arith.constant 0 : index
    %57 = vector.load %arg22[%c0_64, %c1_65, %c8_66, %c0_67] : memref<2x10x17x128xf32, #tpu.memory_space<vmem>>, vector<2x8x8x128xf32>
    tpu.vector_store %arg22[%c0_64, %c1_65, %c8_66, %c0_67], %56 {strides = array<i32>} : memref<2x10x17x128xf32, #tpu.memory_space<vmem>>, vector<2x8x8x128xf32>,
    %c0_68 = arith.constant 0 : index
    %c0_69 = arith.constant 0 : index
    %c7_70 = arith.constant 7 : index
    %c0_71 = arith.constant 0 : index
    %58 = vector.load %arg22[%c0_68, %c0_69, %c7_70, %c0_71] : memref<2x10x17x128xf32, #tpu.memory_space<vmem>>, vector<2x8x8x128xf32>
    %59 = vector.shape_cast %58 : vector<2x8x8x128xf32> to vector<128x128xf32>
    %60 = arith.truncf %59 : vector<128x128xf32> to vector<128x128xbf16>
    %c0_72 = arith.constant 0 : index
    %c0_73 = arith.constant 0 : index
    %61 = vector.load %arg23[%c0_72, %c0_73] : memref<128x1152xbf16, #tpu.memory_space<vmem>>, vector<128x128xbf16>
    tpu.vector_store %arg23[%c0_72, %c0_73], %60 {strides = array<i32>} : memref<128x1152xbf16, #tpu.memory_space<vmem>>, vector<128x128xbf16>,
    %c0_74 = arith.constant 0 : index
    %c0_75 = arith.constant 0 : index
    %c8_76 = arith.constant 8 : index
    %c0_77 = arith.constant 0 : index
    %62 = vector.load %arg22[%c0_74, %c0_75, %c8_76, %c0_77] : memref<2x10x17x128xf32, #tpu.memory_space<vmem>>, vector<2x8x8x128xf32>
    %63 = vector.shape_cast %62 : vector<2x8x8x128xf32> to vector<128x128xf32>
    %64 = arith.truncf %63 : vector<128x128xf32> to vector<128x128xbf16>
    %c0_78 = arith.constant 0 : index
    %c128_79 = arith.constant 128 : index
    %65 = vector.load %arg23[%c0_78, %c128_79] : memref<128x1152xbf16, #tpu.memory_space<vmem>>, vector<128x128xbf16>
    tpu.vector_store %arg23[%c0_78, %c128_79], %64 {strides = array<i32>} : memref<128x1152xbf16, #tpu.memory_space<vmem>>, vector<128x128xbf16>,
    %c0_80 = arith.constant 0 : index
    %c0_81 = arith.constant 0 : index
    %c9_82 = arith.constant 9 : index
    %c0_83 = arith.constant 0 : index
    %66 = vector.load %arg22[%c0_80, %c0_81, %c9_82, %c0_83] : memref<2x10x17x128xf32, #tpu.memory_space<vmem>>, vector<2x8x8x128xf32>
    %67 = vector.shape_cast %66 : vector<2x8x8x128xf32> to vector<128x128xf32>
    %68 = arith.truncf %67 : vector<128x128xf32> to vector<128x128xbf16>
    %c0_84 = arith.constant 0 : index
    %c256_85 = arith.constant 256 : index
    %69 = vector.load %arg23[%c0_84, %c256_85] : memref<128x1152xbf16, #tpu.memory_space<vmem>>, vector<128x128xbf16>
    tpu.vector_store %arg23[%c0_84, %c256_85], %68 {strides = array<i32>} : memref<128x1152xbf16, #tpu.memory_space<vmem>>, vector<128x128xbf16>,
    %c0_86 = arith.constant 0 : index
    %c1_87 = arith.constant 1 : index
    %c7_88 = arith.constant 7 : index
    %c0_89 = arith.constant 0 : index
    %70 = vector.load %arg22[%c0_86, %c1_87, %c7_88, %c0_89] : memref<2x10x17x128xf32, #tpu.memory_space<vmem>>, vector<2x8x8x128xf32>
    %71 = vector.shape_cast %70 : vector<2x8x8x128xf32> to vector<128x128xf32>
    %72 = arith.truncf %71 : vector<128x128xf32> to vector<128x128xbf16>
    %c0_90 = arith.constant 0 : index
    %c384_91 = arith.constant 384 : index
    %73 = vector.load %arg23[%c0_90, %c384_91] : memref<128x1152xbf16, #tpu.memory_space<vmem>>, vector<128x128xbf16>
    tpu.vector_store %arg23[%c0_90, %c384_91], %72 {strides = array<i32>} : memref<128x1152xbf16, #tpu.memory_space<vmem>>, vector<128x128xbf16>,
    %c0_92 = arith.constant 0 : index
    %c1_93 = arith.constant 1 : index
    %c8_94 = arith.constant 8 : index
    %c0_95 = arith.constant 0 : index
    %74 = vector.load %arg22[%c0_92, %c1_93, %c8_94, %c0_95] : memref<2x10x17x128xf32, #tpu.memory_space<vmem>>, vector<2x8x8x128xf32>
    %75 = vector.shape_cast %74 : vector<2x8x8x128xf32> to vector<128x128xf32>
    %76 = arith.truncf %75 : vector<128x128xf32> to vector<128x128xbf16>
    %c0_96 = arith.constant 0 : index
    %c512_97 = arith.constant 512 : index
    %77 = vector.load %arg23[%c0_96, %c512_97] : memref<128x1152xbf16, #tpu.memory_space<vmem>>, vector<128x128xbf16>
    tpu.vector_store %arg23[%c0_96, %c512_97], %76 {strides = array<i32>} : memref<128x1152xbf16, #tpu.memory_space<vmem>>, vector<128x128xbf16>,
    %c0_98 = arith.constant 0 : index
    %c1_99 = arith.constant 1 : index
    %c9_100 = arith.constant 9 : index
    %c0_101 = arith.constant 0 : index
    %78 = vector.load %arg22[%c0_98, %c1_99, %c9_100, %c0_101] : memref<2x10x17x128xf32, #tpu.memory_space<vmem>>, vector<2x8x8x128xf32>
    %79 = vector.shape_cast %78 : vector<2x8x8x128xf32> to vector<128x128xf32>
    %80 = arith.truncf %79 : vector<128x128xf32> to vector<128x128xbf16>
    %c0_102 = arith.constant 0 : index
    %c640_103 = arith.constant 640 : index
    %81 = vector.load %arg23[%c0_102, %c640_103] : memref<128x1152xbf16, #tpu.memory_space<vmem>>, vector<128x128xbf16>
    tpu.vector_store %arg23[%c0_102, %c640_103], %80 {strides = array<i32>} : memref<128x1152xbf16, #tpu.memory_space<vmem>>, vector<128x128xbf16>,
    %c0_104 = arith.constant 0 : index
    %c2_105 = arith.constant 2 : index
    %c7_106 = arith.constant 7 : index
    %c0_107 = arith.constant 0 : index
    %82 = vector.load %arg22[%c0_104, %c2_105, %c7_106, %c0_107] : memref<2x10x17x128xf32, #tpu.memory_space<vmem>>, vector<2x8x8x128xf32>
    %83 = vector.shape_cast %82 : vector<2x8x8x128xf32> to vector<128x128xf32>
    %84 = arith.truncf %83 : vector<128x128xf32> to vector<128x128xbf16>
    %c0_108 = arith.constant 0 : index
    %c768_109 = arith.constant 768 : index
    %85 = vector.load %arg23[%c0_108, %c768_109] : memref<128x1152xbf16, #tpu.memory_space<vmem>>, vector<128x128xbf16>
    tpu.vector_store %arg23[%c0_108, %c768_109], %84 {strides = array<i32>} : memref<128x1152xbf16, #tpu.memory_space<vmem>>, vector<128x128xbf16>,
    %c0_110 = arith.constant 0 : index
    %c2_111 = arith.constant 2 : index
    %c8_112 = arith.constant 8 : index
    %c0_113 = arith.constant 0 : index
    %86 = vector.load %arg22[%c0_110, %c2_111, %c8_112, %c0_113] : memref<2x10x17x128xf32, #tpu.memory_space<vmem>>, vector<2x8x8x128xf32>
    %87 = vector.shape_cast %86 : vector<2x8x8x128xf32> to vector<128x128xf32>
    %88 = arith.truncf %87 : vector<128x128xf32> to vector<128x128xbf16>
    %c0_114 = arith.constant 0 : index
    %c896_115 = arith.constant 896 : index
    %89 = vector.load %arg23[%c0_114, %c896_115] : memref<128x1152xbf16, #tpu.memory_space<vmem>>, vector<128x128xbf16>
    tpu.vector_store %arg23[%c0_114, %c896_115], %88 {strides = array<i32>} : memref<128x1152xbf16, #tpu.memory_space<vmem>>, vector<128x128xbf16>,
    %c0_116 = arith.constant 0 : index
    %c2_117 = arith.constant 2 : index
    %c9_118 = arith.constant 9 : index
    %c0_119 = arith.constant 0 : index
    %90 = vector.load %arg22[%c0_116, %c2_117, %c9_118, %c0_119] : memref<2x10x17x128xf32, #tpu.memory_space<vmem>>, vector<2x8x8x128xf32>
    %91 = vector.shape_cast %90 : vector<2x8x8x128xf32> to vector<128x128xf32>
    %92 = arith.truncf %91 : vector<128x128xf32> to vector<128x128xbf16>
    %c0_120 = arith.constant 0 : index
    %c1024_121 = arith.constant 1024 : index
    %93 = vector.load %arg23[%c0_120, %c1024_121] : memref<128x1152xbf16, #tpu.memory_space<vmem>>, vector<128x128xbf16>
    tpu.vector_store %arg23[%c0_120, %c1024_121], %92 {strides = array<i32>} : memref<128x1152xbf16, #tpu.memory_space<vmem>>, vector<128x128xbf16>,
    %c0_122 = arith.constant 0 : index
    %c0_123 = arith.constant 0 : index
    %94 = vector.load %arg23[%c0_122, %c0_123] : memref<128x1152xbf16, #tpu.memory_space<vmem>>, vector<128x1152xbf16>
    %c0_124 = arith.constant 0 : index
    %c0_125 = arith.constant 0 : index
    %95 = vector.load %arg6[%c0_124, %c0_125] : memref<1152x128xbf16, #tpu.memory_space<vmem>>, vector<1152x128xbf16>
    %cst_126 = arith.constant dense<0.000000e+00> : vector<128x128xf32>
    %96 = tpu.matmul %94, %95, %cst_126 {dimension_numbers = #tpu.dot_dimension_numbers<[1], [0], [0], [1], [0, 0, 1, 1], [], []>} : vector<128x1152xbf16>, vector<1152x128xbf16>, vector<128x128xf32> -> vector<128x128xf32>
    %c0_127 = arith.constant 0 : index
    %c0_128 = arith.constant 0 : index
    %97 = vector.load %arg7[%c0_127, %c0_128] : memref<1x128xf32, #tpu.memory_space<vmem>>, vector<1x128xf32>
    %98 = vector.broadcast %97 : vector<1x128xf32> to vector<128x128xf32>
    %99 = arith.addf %96, %98 : vector<128x128xf32>
    %cst_129 = arith.constant 0.000000e+00 : f32
    %100 = vector.broadcast %cst_129 : f32 to vector<128x128xf32>
    %101 = arith.maximumf %99, %100 : vector<128x128xf32>
    %102 = arith.truncf %101 : vector<128x128xf32> to vector<128x128xbf16>
    %c0_130 = arith.constant 0 : index
    %c0_131 = arith.constant 0 : index
    %103 = vector.load %arg8[%c0_130, %c0_131] : memref<128x8xbf16, #tpu.memory_space<vmem>>, vector<128x8xbf16>
    %cst_132 = arith.constant dense<0.000000e+00> : vector<128x8xf32>
    %104 = tpu.matmul %102, %103, %cst_132 {dimension_numbers = #tpu.dot_dimension_numbers<[1], [0], [0], [1], [0, 0, 1, 1], [], []>} : vector<128x128xbf16>, vector<128x8xbf16>, vector<128x8xf32> -> vector<128x8xf32>
    %105 = vector.extract_strided_slice %104 {offsets = [0, 0], sizes = [128, 1], strides = [1, 1]} : vector<128x8xf32> to vector<128x1xf32>
    %c0_133 = arith.constant 0 : index
    %c0_134 = arith.constant 0 : index
    %106 = vector.load %arg9[%c0_133, %c0_134] : memref<1x1xf32, #tpu.memory_space<vmem>>, vector<1x1xf32>
    %107 = vector.broadcast %106 : vector<1x1xf32> to vector<128x1xf32>
    %108 = arith.addf %105, %107 : vector<128x1xf32>
    %cst_135 = arith.constant 0.000000e+00 : f32
    %109 = vector.broadcast %cst_135 : f32 to vector<128x1xf32>
    %110 = arith.maximumf %108, %109 : vector<128x1xf32>
    %c0_136 = arith.constant 0 : index
    %c0_137 = arith.constant 0 : index
    %111 = vector.load %arg10[%c0_136, %c0_137] : memref<128x8xbf16, #tpu.memory_space<vmem>>, vector<128x8xbf16>
    %cst_138 = arith.constant dense<0.000000e+00> : vector<128x8xf32>
    %112 = tpu.matmul %102, %111, %cst_138 {dimension_numbers = #tpu.dot_dimension_numbers<[1], [0], [0], [1], [0, 0, 1, 1], [], []>} : vector<128x128xbf16>, vector<128x8xbf16>, vector<128x8xf32> -> vector<128x8xf32>
    %113 = vector.extract_strided_slice %112 {offsets = [0, 0], sizes = [128, 1], strides = [1, 1]} : vector<128x8xf32> to vector<128x1xf32>
    %c0_139 = arith.constant 0 : index
    %c0_140 = arith.constant 0 : index
    %114 = vector.load %arg11[%c0_139, %c0_140] : memref<1x1xf32, #tpu.memory_space<vmem>>, vector<1x1xf32>
    %115 = vector.broadcast %114 : vector<1x1xf32> to vector<128x1xf32>
    %116 = arith.addf %113, %115 : vector<128x1xf32>
    %cst_141 = arith.constant 0.000000e+00 : f32
    %117 = vector.broadcast %cst_141 : f32 to vector<128x1xf32>
    %118 = arith.maximumf %116, %117 : vector<128x1xf32>
    %c0_142 = arith.constant 0 : index
    %c0_143 = arith.constant 0 : index
    %119 = vector.load %arg12[%c0_142, %c0_143] : memref<128x64xbf16, #tpu.memory_space<vmem>>, vector<128x64xbf16>
    %120 = arith.extf %119 : vector<128x64xbf16> to vector<128x64xf32>
    %121 = vector.broadcast %110 : vector<128x1xf32> to vector<128x64xf32>
    %122 = arith.mulf %121, %120 : vector<128x64xf32>
    %c0_144 = arith.constant 0 : index
    %c0_145 = arith.constant 0 : index
    %123 = vector.load %arg13[%c0_144, %c0_145] : memref<128x64xbf16, #tpu.memory_space<vmem>>, vector<128x64xbf16>
    %124 = arith.extf %123 : vector<128x64xbf16> to vector<128x64xf32>
    %125 = vector.broadcast %118 : vector<128x1xf32> to vector<128x64xf32>
    %126 = arith.mulf %125, %124 : vector<128x64xf32>
    %127 = arith.addf %122, %126 : vector<128x64xf32>
    %c0_146 = arith.constant 0 : index
    %c0_147 = arith.constant 0 : index
    %128 = vector.load %arg14[%c0_146, %c0_147] : memref<2x128xbf16, #tpu.memory_space<vmem>>, vector<2x128xbf16>
    %129 = arith.truncf %127 : vector<128x64xf32> to vector<128x64xbf16>
    %cst_148 = arith.constant dense<0.000000e+00> : vector<2x64xf32>
    %130 = tpu.matmul %128, %129, %cst_148 {dimension_numbers = #tpu.dot_dimension_numbers<[1], [0], [0], [1], [0, 0, 1, 1], [], []>} : vector<2x128xbf16>, vector<128x64xbf16>, vector<2x64xf32> -> vector<2x64xf32>
    %c0_149 = arith.constant 0 : index
    %c0_150 = arith.constant 0 : index
    %131 = vector.load %arg15[%c0_149, %c0_150] : memref<1x64xf32, #tpu.memory_space<vmem>>, vector<1x64xf32>
    %132 = vector.broadcast %131 : vector<1x64xf32> to vector<2x64xf32>
    %133 = arith.addf %130, %132 : vector<2x64xf32>
    %cst_151 = arith.constant 0.000000e+00 : f32
    %134 = vector.broadcast %cst_151 : f32 to vector<2x64xf32>
    %135 = arith.maximumf %133, %134 : vector<2x64xf32>
    %136 = arith.truncf %135 : vector<2x64xf32> to vector<2x64xbf16>
    %c0_152 = arith.constant 0 : index
    %c0_153 = arith.constant 0 : index
    %137 = vector.load %arg16[%c0_152, %c0_153] : memref<64x512xbf16, #tpu.memory_space<vmem>>, vector<64x512xbf16>
    %cst_154 = arith.constant dense<0.000000e+00> : vector<2x512xf32>
    %138 = tpu.matmul %136, %137, %cst_154 {dimension_numbers = #tpu.dot_dimension_numbers<[1], [0], [0], [1], [0, 0, 1, 1], [], []>} : vector<2x64xbf16>, vector<64x512xbf16>, vector<2x512xf32> -> vector<2x512xf32>
    %c0_155 = arith.constant 0 : index
    %c0_156 = arith.constant 0 : index
    %139 = vector.load %arg17[%c0_155, %c0_156] : memref<1x512xf32, #tpu.memory_space<vmem>>, vector<1x512xf32>
    %140 = vector.broadcast %139 : vector<1x512xf32> to vector<2x512xf32>
    %141 = arith.addf %138, %140 : vector<2x512xf32>
    %c0_157 = arith.constant 0 : index
    %c0_158 = arith.constant 0 : index
    %142 = vector.load %arg20[%c0_157, %c0_158] : memref<2x512xf32, #tpu.memory_space<vmem>>, vector<2x512xf32>
    tpu.vector_store %arg20[%c0_157, %c0_158], %141 {strides = array<i32>} : memref<2x512xf32, #tpu.memory_space<vmem>>, vector<2x512xf32>,
    %c0_159 = arith.constant 0 : index
    %c0_160 = arith.constant 0 : index
    %143 = vector.load %arg18[%c0_159, %c0_160] : memref<64x64xbf16, #tpu.memory_space<vmem>>, vector<64x64xbf16>
    %cst_161 = arith.constant dense<0.000000e+00> : vector<2x64xf32>
    %144 = tpu.matmul %136, %143, %cst_161 {dimension_numbers = #tpu.dot_dimension_numbers<[1], [0], [0], [1], [0, 0, 1, 1], [], []>} : vector<2x64xbf16>, vector<64x64xbf16>, vector<2x64xf32> -> vector<2x64xf32>
    %c0_162 = arith.constant 0 : index
    %c0_163 = arith.constant 0 : index
    %145 = vector.load %arg19[%c0_162, %c0_163] : memref<1x64xf32, #tpu.memory_space<vmem>>, vector<1x64xf32>
    %146 = vector.broadcast %145 : vector<1x64xf32> to vector<2x64xf32>
    %147 = arith.addf %144, %146 : vector<2x64xf32>
    %cst_164 = arith.constant dense<0xFF800000> : vector<2xf32>
    %148 = vector.multi_reduction <maximumf>, %147, %cst_164 [1] : vector<2x64xf32> to vector<2xf32>
    %149 = vector.shape_cast %148 : vector<2xf32> to vector<2x1xf32>
    %150 = vector.broadcast %149 : vector<2x1xf32> to vector<2x64xf32>
    %151 = arith.subf %147, %150 : vector<2x64xf32>
    %152 = math.exp %151 : vector<2x64xf32>
    %cst_165 = arith.constant dense<0.000000e+00> : vector<2xf32>
    %153 = vector.multi_reduction <add>, %152, %cst_165 [1] : vector<2x64xf32> to vector<2xf32>
    %154 = vector.shape_cast %153 : vector<2xf32> to vector<2x1xf32>
    %155 = math.log %154 : vector<2x1xf32>
    %156 = vector.broadcast %155 : vector<2x1xf32> to vector<2x64xf32>
    %157 = arith.subf %151, %156 : vector<2x64xf32>
    %c0_166 = arith.constant 0 : index
    %c0_167 = arith.constant 0 : index
    %158 = vector.load %arg21[%c0_166, %c0_167] : memref<2x64xf32, #tpu.memory_space<vmem>>, vector<2x64xf32>
    tpu.vector_store %arg21[%c0_166, %c0_167], %157 {strides = array<i32>} : memref<2x64xf32, #tpu.memory_space<vmem>>, vector<2x64xf32>,
    return
  }
  func.func @transform_0(%arg0: i32) -> (i32, i32) {
    %c0_i32 = arith.constant 0 : i32
    %c0_i32_0 = arith.constant 0 : i32
    %c0_i32_1 = arith.constant 0 : i32
    return %c0_i32, %c0_i32_0 : i32, i32
  }
  func.func @transform_1(%arg0: i32) -> (i32, i32) {
    %c0_i32 = arith.constant 0 : i32
    %c0_i32_0 = arith.constant 0 : i32
    %c0_i32_1 = arith.constant 0 : i32
    return %c0_i32, %c0_i32_0 : i32, i32
  }
  func.func @transform_2(%arg0: i32) -> (i32, i32) {
    %c0_i32 = arith.constant 0 : i32
    %c0_i32_0 = arith.constant 0 : i32
    %c0_i32_1 = arith.constant 0 : i32
    return %c0_i32, %c0_i32_0 : i32, i32
  }
  func.func @transform_3(%arg0: i32) -> (i32, i32) {
    %c0_i32 = arith.constant 0 : i32
    %c0_i32_0 = arith.constant 0 : i32
    %c0_i32_1 = arith.constant 0 : i32
    return %c0_i32, %c0_i32_0 : i32, i32
  }
  func.func @transform_4(%arg0: i32) -> (i32, i32) {
    %c0_i32 = arith.constant 0 : i32
    %c0_i32_0 = arith.constant 0 : i32
    %c0_i32_1 = arith.constant 0 : i32
    return %c0_i32, %c0_i32_0 : i32, i32
  }
  func.func @transform_5(%arg0: i32) -> (i32, i32) {
    %c0_i32 = arith.constant 0 : i32
    %c0_i32_0 = arith.constant 0 : i32
    %c0_i32_1 = arith.constant 0 : i32
    return %c0_i32, %c0_i32_0 : i32, i32
  }
  func.func @transform_6(%arg0: i32) -> (i32, i32) {
    %c0_i32 = arith.constant 0 : i32
    %c0_i32_0 = arith.constant 0 : i32
    %c0_i32_1 = arith.constant 0 : i32
    return %c0_i32, %c0_i32_0 : i32, i32
  }
  func.func @transform_7(%arg0: i32) -> (i32, i32) {
    %c0_i32 = arith.constant 0 : i32
    %c0_i32_0 = arith.constant 0 : i32
    %c0_i32_1 = arith.constant 0 : i32
    return %c0_i32, %c0_i32_0 : i32, i32
  }
  func.func @transform_8(%arg0: i32) -> (i32, i32) {
    %c0_i32 = arith.constant 0 : i32
    %c0_i32_0 = arith.constant 0 : i32
    %c0_i32_1 = arith.constant 0 : i32
    return %c0_i32, %c0_i32_0 : i32, i32
  }
  func.func @transform_9(%arg0: i32) -> (i32, i32) {
    %c0_i32 = arith.constant 0 : i32
    %c0_i32_0 = arith.constant 0 : i32
    %c0_i32_1 = arith.constant 0 : i32
    return %c0_i32, %c0_i32_0 : i32, i32
  }
  func.func @transform_10(%arg0: i32) -> (i32, i32) {
    %c0_i32 = arith.constant 0 : i32
    %c0_i32_0 = arith.constant 0 : i32
    %c0_i32_1 = arith.constant 0 : i32
    return %c0_i32, %c0_i32_0 : i32, i32
  }
  func.func @transform_11(%arg0: i32) -> (i32, i32) {
    %c0_i32 = arith.constant 0 : i32
    %c0_i32_0 = arith.constant 0 : i32
    %c0_i32_1 = arith.constant 0 : i32
    return %c0_i32, %c0_i32_0 : i32, i32
  }
  func.func @transform_12(%arg0: i32) -> (i32, i32) {
    %c0_i32 = arith.constant 0 : i32
    %c0_i32_0 = arith.constant 0 : i32
    %c0_i32_1 = arith.constant 0 : i32
    return %c0_i32, %c0_i32_0 : i32, i32
  }
  func.func @transform_13(%arg0: i32) -> (i32, i32) {
    %c0_i32 = arith.constant 0 : i32
    %c0_i32_0 = arith.constant 0 : i32
    %c0_i32_1 = arith.constant 0 : i32
    return %c0_i32, %c0_i32_0 : i32, i32
  }
  func.func @transform_14(%arg0: i32) -> (i32, i32) {
    %c0_i32 = arith.constant 0 : i32
    %c0_i32_0 = arith.constant 0 : i32
    %c0_i32_1 = arith.constant 0 : i32
    return %c0_i32, %c0_i32_0 : i32, i32
  }
  func.func @transform_15(%arg0: i32) -> (i32, i32) {
    %c0_i32 = arith.constant 0 : i32
    %c0_i32_0 = arith.constant 0 : i32
    %c0_i32_1 = arith.constant 0 : i32
    return %c0_i32, %c0_i32_0 : i32, i32
  }
  func.func @transform_16(%arg0: i32) -> (i32, i32) {
    %c0_i32 = arith.constant 0 : i32
    %c0_i32_0 = arith.constant 0 : i32
    %c0_i32_1 = arith.constant 0 : i32
    return %c0_i32, %c0_i32_0 : i32, i32
  }
  func.func @transform_17(%arg0: i32) -> (i32, i32) {
    %c0_i32 = arith.constant 0 : i32
    %c0_i32_0 = arith.constant 0 : i32
    %c0_i32_1 = arith.constant 0 : i32
    return %c0_i32, %c0_i32_0 : i32, i32
  }
  func.func @transform_18(%arg0: i32) -> (i32, i32) {
    %c0_i32 = arith.constant 0 : i32
    %c0_i32_0 = arith.constant 0 : i32
    %c0_i32_1 = arith.constant 0 : i32
    return %c0_i32, %c0_i32_0 : i32, i32
  }
  func.func @transform_19(%arg0: i32) -> (i32, i32) {
    %c0_i32 = arith.constant 0 : i32
    %c0_i32_0 = arith.constant 0 : i32
    %c0_i32_1 = arith.constant 0 : i32
    return %c0_i32, %c0_i32_0 : i32, i32
  }
  func.func @transform_20(%arg0: i32) -> (i32, i32) {
    %c0_i32 = arith.constant 0 : i32
    %c0_i32_0 = arith.constant 0 : i32
    %c0_i32_1 = arith.constant 0 : i32
    return %c0_i32, %c0_i32_0 : i32, i32
  }
}

</mosaic_0001>

<bundles_post_ra>
// kernel: qrdqn_forward.1
= control target key start
LH: loop header
LB: loop body
LE: loop exit
PB: predicated region body
PF: predicated region fallthrough
CT: control target
= control target key end

     0   :  { %s9849_s0 = inlined_call_operand.vmem [shape: bf16[128,45], index: 0, kind: input, shape index: {}]   ;;  %s9850_s1 = inlined_call_operand.vmem [shape: bf16[45,128], index: 1, kind: input, shape index: {}]   ;;  %s9851_s2 = inlined_call_operand.vmem [shape: f32[1,128], index: 2, kind: input, shape index: {}]   ;;  %s9852_s3 = inlined_call_operand.vmem [shape: bf16[1152,128], index: 3, kind: input, shape index: {}]   ;;  %s9853_s4 = inlined_call_operand.vmem [shape: f32[1,128], index: 4, kind: input, shape index: {}]   ;;  %s9854_s5 = inlined_call_operand.vmem [shape: bf16[1152,128], index: 5, kind: input, shape index: {}]   ;;  %s9855_s6 = inlined_call_operand.vmem [shape: f32[1,128], index: 6, kind: input, shape index: {}]   ;;  %s9856_s7 = inlined_call_operand.vmem [shape: bf16[128,8], index: 7, kind: input, shape index: {}]   ;;  %s9857_s8 = inlined_call_operand.<no memory space> [shape: f32[1,1], index: 8, kind: input, shape index: {}]   ;;  %s9858_s9 = inlined_call_operand.vmem [shape: bf16[128,8], index: 9, kind: input, shape index: {}]   ;;  %s9859_s11 = inlined_call_operand.vmem [shape: bf16[128,64], index: 11, kind: input, shape index: {}]   ;;  %s9860_s12 = inlined_call_operand.vmem [shape: bf16[128,64], index: 12, kind: input, shape index: {}]   ;;  %s9861_s13 = inlined_call_operand.vmem [shape: bf16[2,128], index: 13, kind: input, shape index: {}]   ;;  %s9862_s14 = inlined_call_operand.vmem [shape: f32[1,64], index: 14, kind: input, shape index: {}]   ;;  %s9863_s15 = inlined_call_operand.vmem [shape: bf16[64,512], index: 15, kind: input, shape index: {}]   ;;  %s9864_s16 = inlined_call_operand.vmem [shape: f32[1,512], index: 16, kind: input, shape index: {}]   ;;  %s9865_s17 = inlined_call_operand.vmem [shape: bf16[64,64], index: 17, kind: input, shape index: {}]   ;;  %s9866_s18 = inlined_call_operand.vmem [shape: f32[1,64], index: 18, kind: input, shape index: {}]   ;;  %s9867_s19 = inlined_call_operand.vmem [shape: f32[2,512], index: 19, kind: output, shape index: {0}]   ;;  %s9868_s20 = inlined_call_operand.hbm [shape: f32[2,64], index: 20, kind: output, shape index: {1}]   ;;  %s9869_s10 = inlined_call_operand.<no memory space> [shape: f32[1,1], index: 10, kind: input, shape index: {}]  }
   0x1   :  { %9876 = sst [smem:[#allocation34_spill]] %s9849_s0  ;;  %v26_v0 = vstv %s9857_s8  ;;  %v28_v1 = vstv %s9869_s10 }
   0x2   :  { %9877 = sst [smem:[#allocation35_spill]] %s9850_s1  ;;  %27 = vst [vmem:[#allocation4] sm:$0x1] %v26_v0  ;;  %29 = vst [vmem:[#allocation5] sm:$0x1] %v28_v1 }
   0x3   :  { %9878 = sst [smem:[#allocation36_spill]] %s9851_s2 }
   0x4   :  { %9879 = sst [smem:[#allocation37_spill]] %s9852_s3 }
   0x5   :  { %9880 = sst [smem:[#allocation38_spill]] %s9853_s4 }
   0x6   :  { %s9881_s3 = sld [smem:[#allocation35_spill]]  ;;  %vm241_vm0 = vcmask 1045504   ;;  %vm242_vm1 = vcmask 1046528   ;;  %v8481_v3 = vmov 65535   ;;  %vm216_vm2 = vcmask 367616  }
   0x7   :  { %v243_v4 = vsel %vm241_vm0, 4294967295, %v8481_v3  ;;  %s9882_s28 = sld [smem:[#allocation34_spill]]  ;;  %v8482_v9 = vmov 0.0   ;;  %v8483_v46 = vmov 0.0|0.0  }
   0x8   :  { %v244_v5 = vsel %vm242_vm1, %v243_v4, 0  ;;  %79 = vst [vmem:[#allocation2 + $0x48] sm:$0xff] %v8482_v9  ;;  %81 = vst [vmem:[#allocation2 + $0x58] sm:$0x1] %v8482_v9  ;;  %s9883_s22 = sld [smem:[#allocation37_spill]] }
   0x9   :  { %70 = vst [vmem:[#allocation2] sm:$0xff] %v8482_v9  ;;  %71 = vst [vmem:[#allocation2 + $0x8] sm:$0xff] %v8482_v9 }
   0xa   :  { %72 = vst [vmem:[#allocation2 + $0x10] sm:$0x1] %v8482_v9  ;;  %73 = vst [vmem:[#allocation2 + $0x18] sm:$0xff] %v8482_v9 }
   0xb   :  { %75 = vst [vmem:[#allocation2 + $0x28] sm:$0x1] %v8482_v9  ;;  %76 = vst [vmem:[#allocation2 + $0x30] sm:$0xff] %v8482_v9 }
   0xc   :  { %v8061_v2 = vld [vmem:[%s9881_s3 + $0x10] sm:$0x7f]   ;;  %v8062_v8 = vld [vmem:[%s9881_s3 + $0x8] sm:$0xff]   ;;  %78 = vst [vmem:[#allocation2 + $0x40] sm:$0x1] %v8482_v9  ;;  %82 = vst [vmem:[#allocation2 + $0x60] sm:$0xff] %v8482_v9 }
   0xd   :  { %v8064_v6 = vld [vmem:[%s9882_s28] sm:$0xff]   ;;  %v246_v7 = vand.u32 %v8061_v2, %v244_v5  ;;  %84 = vst [vmem:[#allocation2 + $0x70] sm:$0x1] %v8482_v9  ;;  %85 = vst [vmem:[#allocation2 + $0x78] sm:$0xff] %v8482_v9  ;;  %v8065_v11 = vld [vmem:[%s9882_s28 + $0x8] sm:$0xff]  }
   0xe   :  { %7877 = vmatprep.mubr.msk.bf16.mxu0 %vm216_vm2, %v8064_v6  ;;  %87 = vst [vmem:[#allocation2 + $0x88] sm:$0x1] %v8482_v9  ;;  %88 = vst [vmem:[#allocation2 + $0x90] sm:$0xff] %v8482_v9  ;;  %v8063_v10 = vld [vmem:[%s9881_s3] sm:$0xff]   ;;  %v8072_v12 = vld [vmem:[%s9883_s22 + $0x78] sm:$0xff]  }
   0xf   :  { %7871 = vmatprep.subr.bf16.mxu0 %v246_v7  ;;  %90 = vst [vmem:[#allocation2 + $0xa0] sm:$0x1] %v8482_v9  ;;  %91 = vst [vmem:[#allocation2 + $0xa8] sm:$0xff] %v8482_v9  ;;  %v8066_v13 = vld [vmem:[%s9882_s28 + $0x10] sm:$0xff]   ;;  %v8073_v14 = vld [vmem:[%s9883_s22 + $0x38] sm:$0xff]   ;;  %7281 = vmatprep.subr.bf16.mxu1 %v8072_v12 }
  0x10   :  { %7872 = vmatpush3.bf16.msra.mxu0 %v246_v7  ;;  %93 = vst [vmem:[#allocation2 + $0xb8] sm:$0x1] %v8482_v9  ;;  %94 = vst [vmem:[#allocation2 + $0xc0] sm:$0xff] %v8482_v9  ;;  %7282 = vmatpush3.bf16.msra.mxu1 %v8073_v14  ;;  %v8067_v15 = vld [vmem:[%s9882_s28 + $0x18] sm:$0xff]   ;;  %v8068_v16 = vld [vmem:[%s9882_s28 + $0x20] sm:$0xff]  }
  0x11   :  { %96 = vst [vmem:[#allocation2 + $0xd0] sm:$0x1] %v8482_v9  ;;  %97 = vst [vmem:[#allocation2 + $0xd8] sm:$0xff] %v8482_v9  ;;  %7873 = vmatprep.subr.bf16.mxu0 %v8062_v8  ;;  %v8069_v17 = vld [vmem:[%s9882_s28 + $0x28] sm:$0xff]   ;;  %v8070_v18 = vld [vmem:[%s9882_s28 + $0x30] sm:$0xff]  }
  0x12   :  { %98 = vst [vmem:[#allocation2 + $0xe0] sm:$0xff] %v8482_v9  ;;  %99 = vst [vmem:[#allocation2 + $0xe8] sm:$0x1] %v8482_v9  ;;  %v8071_v19 = vld [vmem:[%s9882_s28 + $0x38] sm:$0xff]   ;;  %v8074_v20 = vld [vmem:[%s9883_s22 + $0x70] sm:$0xff]  }
  0x13   :  { %100 = vst [vmem:[#allocation2 + $0xf0] sm:$0xff] %v8482_v9  ;;  %101 = vst [vmem:[#allocation2 + $0xf8] sm:$0xff] %v8482_v9  ;;  %v8075_v21 = vld [vmem:[%s9883_s22 + $0xf8] sm:$0xff]   ;;  %v8076_v22 = vld [vmem:[%s9883_s22 + $0x30] sm:$0xff]   ;;  %7283 = vmatprep.subr.bf16.mxu1 %v8074_v20 }
  0x14   :  { %102 = vst [vmem:[#allocation2 + $0x100] sm:$0x1] %v8482_v9  ;;  %103 = vst [vmem:[#allocation2 + $0x108] sm:$0xff] %v8482_v9  ;;  %7874 = vmatpush3.bf16.msra.mxu0 %v8062_v8  ;;  %v8077_v23 = vld [vmem:[%s9883_s22 + $0xb8] sm:$0xff]   ;;  %7284 = vmatpush3.bf16.msra.mxu1 %v8076_v22  ;;  %v8078_v24 = vld [vmem:[%s9883_s22 + $0x68] sm:$0xff]  }
  0x15   :  { %105 = vst [vmem:[#allocation2 + $0x118] sm:$0x1] %v8482_v9  ;;  %106 = vst [vmem:[#allocation2 + $0x120] sm:$0xff] %v8482_v9  ;;  %7875 = vmatprep.subr.bf16.mxu0 %v8063_v10  ;;  %v8079_v25 = vld [vmem:[%s9883_s22 + $0xf0] sm:$0xff]   ;;  %v8080_v26 = vld [vmem:[%s9883_s22 + $0x28] sm:$0xff]   ;;  %7285 = vmatprep.subr.bf16.mxu1 %v8078_v24 }
  0x16   :  { %108 = vst [vmem:[#allocation2 + $0x130] sm:$0x1] %v8482_v9  ;;  %109 = vst [vmem:[#allocation2 + $0x138] sm:$0xff] %v8482_v9  ;;  %v8081_v27 = vld [vmem:[%s9883_s22 + $0xb0] sm:$0xff]   ;;  %v8082_v28 = vld [vmem:[%s9883_s22 + $0x60] sm:$0xff]  }
  0x17   :  { %111 = vst [vmem:[#allocation2 + $0x148] sm:$0x1] %v8482_v9  ;;  %112 = vst [vmem:[#allocation2 + $0x150] sm:$0xff] %v8482_v9  ;;  %v8083_v29 = vld [vmem:[%s9883_s22 + $0xe8] sm:$0xff]   ;;  %v8084_v30 = vld [vmem:[%s9883_s22 + $0x20] sm:$0xff]  }
  0x18   :  { %114 = vst [vmem:[#allocation2 + $0x160] sm:$0x1] %v8482_v9  ;;  %115 = vst [vmem:[#allocation2 + $0x168] sm:$0xff] %v8482_v9  ;;  %7876 = vmatpush3.bf16.msra.mxu0 %v8063_v10  ;;  %7286 = vmatpush3.bf16.msra.mxu1 %v8080_v26  ;;  %v8085_v31 = vld [vmem:[%s9883_s22 + $0xa8] sm:$0xff]   ;;  %v8086_v32 = vld [vmem:[%s9883_s22 + $0x58] sm:$0xff]  }
  0x19   :  { %117 = vst [vmem:[#allocation2 + $0x178] sm:$0x1] %v8482_v9  ;;  %118 = vst [vmem:[#allocation2 + $0x180] sm:$0xff] %v8482_v9  ;;  %7345 = vmatprep.subr.bf16.mxu0 %v8075_v21  ;;  %7287 = vmatprep.subr.bf16.mxu1 %v8082_v28  ;;  %v8087_v33 = vld [vmem:[%s9883_s22 + $0xe0] sm:$0xff]   ;;  %v8088_v34 = vld [vmem:[%s9883_s22 + $0x18] sm:$0xff]  }
  0x1a   :  { %120 = vst [vmem:[#allocation2 + $0x190] sm:$0x1] %v8482_v9  ;;  %121 = vst [vmem:[#allocation2 + $0x198] sm:$0xff] %v8482_v9  ;;  %v8089_v35 = vld [vmem:[%s9883_s22 + $0xa0] sm:$0xff]   ;;  %v8090_v36 = vld [vmem:[%s9883_s22 + $0x50] sm:$0xff]  }
  0x1b   :  { %123 = vst [vmem:[#allocation2 + $0x1a8] sm:$0x1] %v8482_v9  ;;  %124 = vst [vmem:[#allocation2 + $0x1b0] sm:$0xff] %v8482_v9  ;;  %7878 = vmatmul.mubr.msk.bf16.vlgmr.msra.gmra.mxu0 %vm216_vm2, %v8065_v11  ;;  %v8091_v37 = vld [vmem:[%s9883_s22 + $0xd8] sm:$0xff]   ;;  %v8092_v38 = vld [vmem:[%s9883_s22 + $0x10] sm:$0xff]  }
  0x1c   :  { %126 = vst [vmem:[#allocation2 + $0x1c0] sm:$0x1] %v8482_v9  ;;  %127 = vst [vmem:[#allocation2 + $0x1c8] sm:$0xff] %v8482_v9  ;;  %7881 = vmatprep.mubr.msk.bf16.mxu0 %vm216_vm2, %v8066_v13  ;;  %7346 = vmatpush3.bf16.msra.mxu0 %v8077_v23  ;;  %v8093_v39 = vld [vmem:[%s9883_s22 + $0x98] sm:$0xff]   ;;  %v378_v40 = vld [vmem:[#allocation2 + $0x7] sm:$0xff] }
  0x1d   :  { %128 = vst [vmem:[#allocation2 + $0x1d0] sm:$0xff] %v8482_v9  ;;  %129 = vst [vmem:[#allocation2 + $0x1d8] sm:$0x1] %v8482_v9  ;;  %7347 = vmatprep.subr.bf16.mxu0 %v8079_v25  ;;  %7288 = vmatpush3.bf16.msra.mxu1 %v8084_v30  ;;  %v8706_v41 = vpack.c.bf16 %v378_v40, %v378_v40  ;;  %v570_v42 = vld [vmem:[#allocation2 + $0x9] sm:$0xff]  ;;  %v8098_v49 = vld [vmem:[%s9883_s22 + $0x40] sm:$0xff]  }
  0x1e   :  { %7289 = vmatprep.subr.bf16.mxu1 %v8086_v32  ;;  %v8708_v43 = vpack.c.bf16 %v570_v42, %v570_v42  ;;  %v8094_v44 = vld [vmem:[%s9883_s22 + $0x48] sm:$0xff]   ;;  %v8095_v45 = vld [vmem:[%s9883_s22 + $0xd0] sm:$0xff]   ;;  %554 = vst [vmem:[#allocation3 + $0x4] sm:$0xf] %v8483_v46  ;;  %562 = vst [vmem:[#allocation3 + $0x124] sm:$0xf] %v8483_v46 }
  0x1f   :  { %458 = vst [vmem:[#allocation3] sm:$0xf] %v8706_v41  ;;  %1138 = vst [vmem:[#allocation3 + $0x118] sm:$0xf] %v8483_v46  ;;  %v8096_v47 = vld [vmem:[%s9883_s22 + $0x8] sm:$0xff]   ;;  %v8097_v48 = vld [vmem:[%s9883_s22 + $0x90] sm:$0xff]  }
  0x20   :  { %7348 = vmatpush3.bf16.msra.mxu0 %v8081_v27  ;;  %1146 = vst [vmem:[#allocation3 + $0x238] sm:$0xf] %v8483_v46  ;;  %650 = vst [vmem:[#allocation3 + $0x8] sm:$0xf] %v8708_v43  ;;  %v8099_v50 = vld [vmem:[%s9883_s22 + $0xc8] sm:$0xff]   ;;  %v8100_v51 = vld [vmem:[%s9883_s22] sm:$0xff]  }
  0x21   :  { %7349 = vmatprep.subr.bf16.mxu0 %v8083_v29  ;;  %7290 = vmatpush3.bf16.msra.mxu1 %v8088_v34  ;;  %v8101_v52 = vld [vmem:[%s9883_s22 + $0x88] sm:$0xff]   ;;  %v8104_v53 = vld [vmem:[%s9883_s22 + $0xc0] sm:$0xff]   ;;  %v386_v55 = vld [vmem:[#allocation2 + $0xf7] sm:$0xff] }
  0x22   :  { %7291 = vmatprep.subr.bf16.mxu1 %v8090_v36  ;;  %v8106_v54 = vld [vmem:[%s9883_s22 + $0x80] sm:$0xff]   ;;  %v8746_v56 = vpack.c.bf16 %v386_v55, %v386_v55  ;;  %v8105_v57 = vld [vmem:[%s9883_s22 + $0x178] sm:$0xff]  }
  0x23   :  { %7882 = vmatmul.mubr.msk.bf16.gmra.mxu0 %vm216_vm2, %v8067_v15  ;;  %v578_v58 = vld [vmem:[#allocation2 + $0xf9] sm:$0xff] }
  0x24   :  { %7885 = vmatprep.mubr.msk.bf16.mxu0 %vm216_vm2, %v8068_v16  ;;  %7350 = vmatpush3.bf16.msra.mxu0 %v8085_v31  ;;  %466 = vst [vmem:[#allocation3 + $0x120] sm:$0xf] %v8746_v56  ;;  %v8752_v59 = vpack.c.bf16 %v578_v58, %v578_v58  ;;  %v962_v60 = vld [vmem:[#allocation2 + $0xdf] sm:$0xff] }
  0x25   :  { %7351 = vmatprep.subr.bf16.mxu0 %v8087_v33  ;;  %7292 = vmatpush3.bf16.msra.mxu1 %v8092_v38  ;;  %v8755_v61 = vpack.c.bf16 %v962_v60, %v962_v60 }
  0x26   :  { %7293 = vmatprep.subr.bf16.mxu1 %v8094_v44  ;;  %658 = vst [vmem:[#allocation3 + $0x128] sm:$0xf] %v8752_v59 }
  0x27   :  { %1042 = vst [vmem:[#allocation3 + $0x114] sm:$0xf] %v8755_v61 }
  0x28   :  { %7352 = vmatpush3.bf16.msra.mxu0 %v8089_v35 }
  0x29   :  { %7353 = vmatprep.subr.bf16.mxu0 %v8091_v37  ;;  %7294 = vmatpush3.bf16.msra.mxu1 %v8096_v47 }
  0x2a   :  { %7295 = vmatprep.subr.bf16.mxu1 %v8098_v49 }
  0x2b   :  { %7886 = vmatmul.mubr.msk.bf16.gmra.mxu0 %vm216_vm2, %v8069_v17 }
  0x2c   :  { %7889 = vmatprep.mubr.msk.bf16.mxu0 %vm216_vm2, %v8070_v18  ;;  %7354 = vmatpush3.bf16.msra.mxu0 %v8093_v39 }
  0x2d   :  { %7355 = vmatprep.subr.bf16.mxu0 %v8095_v45  ;;  %7296 = vmatpush3.bf16.msra.mxu1 %v8100_v51 }
  0x2e   :  { %7409 = vmatprep.subr.bf16.mxu1 %v8105_v57 }
  0x30   :  { %7356 = vmatpush3.bf16.msra.mxu0 %v8097_v48 }
  0x31   :  { %7357 = vmatprep.subr.bf16.mxu0 %v8099_v50 }
  0x33   :  { %7890 = vmatmul.mubr.msk.bf16.gmra.mxu0 %vm216_vm2, %v8071_v19 }
  0x34   :  { %7358 = vmatpush3.bf16.msra.mxu0 %v8101_v52 }
  0x35   :  { %7359 = vmatprep.subr.bf16.mxu0 %v8104_v53 }
  0x38   :  { %7360 = vmatpush3.bf16.msra.mxu0 %v8106_v54 }
  0x39   :  { %30 = vsyncpa [#allocation7], 0  ;;  %v8142_v62 = vld [vmem:[%s9883_s22 + $0x1f8] sm:$0xff]   ;;  %v1154_v63 = vld [vmem:[#allocation2 + $0xe1] sm:$0xff]  ;;  %s9884_s24 = sld [smem:[#allocation36_spill]]  ;;  %vm8485_vm3 = vmmov 0  }
  0x3a   :  { %7473 = vmatprep.subr.bf16.mxu0 %v8142_v62  ;;  %v8761_v0 = vpack.c.bf16 %v1154_v63, %v1154_v63  ;;  %v970_v1 = vld [vmem:[#allocation2 + $0x1cf] sm:$0xff]  ;;  %2879 = vst [vmem:[#allocation3 + $0x120] sm:$0xf] %v8746_v56  ;;  %3071 = vst [vmem:[#allocation3 + $0x128] sm:$0xf] %v8752_v59  ;;  %s9885_s2 = sld [smem:[#allocation38_spill]] }
  0x3b   :  { %v8764_v2 = vpack.c.bf16 %v970_v1, %v970_v1  ;;  %v1162_v3 = vld [vmem:[#allocation2 + $0x1d1] sm:$0xff]  ;;  %v8159_v56 = vld [vmem:[%s9883_s22 + $0x148] sm:$0xff]   ;;  %3454 = vst [vmem:[#allocation3 + $0x114] sm:$0xf] %v8755_v61  ;;  %vm6043_vm4 = vcmask 523264   ;;  %vm6231_vm5 = vcmask 517120  }
  0x3c   :  { %1234 = vst [vmem:[#allocation3 + $0x11c] sm:$0xf] %v8761_v0  ;;  %v8767_v4 = vpack.c.bf16 %v1162_v3, %v1162_v3  ;;  %v8172_v59 = vld [vmem:[%s9883_s22 + $0x1d0] sm:$0xff]  }
  0x3d   :  { %1050 = vst [vmem:[#allocation3 + $0x234] sm:$0xf] %v8764_v2 }
  0x3e   :  { %1242 = vst [vmem:[#allocation3 + $0x23c] sm:$0xf] %v8767_v4  ;;  %3462 = vst [vmem:[#allocation3 + $0x234] sm:$0xf] %v8764_v2 }
  0x3f   :  { %v8773_v5 = vld [vmem:[%s9884_s24] ss:$0 sm:$0xff] }
  0xdb   :  { %v7879_v6 = vpop.f32.mrf.mxu0 }
  0xdc   :  { %v291_v7 = vadd.f32 %v7879_v6, %v8773_v5 }
  0xdd   :  { %v282_v8 = vpop.f32.mrf.mxu0 }
  0xde   :  { %v347_v9 = vmax.f32 %v291_v7, 0.0  ;;  %v283_v10 = vadd.f32 %v8773_v5, %v282_v8 }
  0xdf   :  { %v7880_v11 = vpop.f32.mrf.mxu0 }
  0xe0   :  { %364 = vst [vmem:[#allocation2 + $0x50] sm:$0xff] %v347_v9  ;;  %v6923_v12 = vpack.c.bf16 %v347_v9, %v347_v9  ;;  %v345_v13 = vmax.f32 %v283_v10, 0.0  ;;  %v294_v14 = vadd.f32 %v7880_v11, %v8773_v5 }
  0xe1   :  { %v285_v15 = vpop.f32.mrf.mxu0 }
  0xe2   :  { %557 = vst [vmem:[#allocation3 + $0x70] sm:$0xf] %v6923_v12  ;;  %844 = vst [vmem:[#allocation3 + $0x58] sm:$0xf] %v6923_v12  ;;  %v6921_v16 = vpack.c.bf16 %v345_v13, %v345_v13  ;;  %v348_v17 = vmax.f32 %v294_v14, 0.0  ;;  %v286_v18 = vadd.f32 %v8773_v5, %v285_v15 }
  0xe3   :  { %1132 = vst [vmem:[#allocation3 + $0x40] sm:$0xf] %v6923_v12  ;;  %362 = vst [vmem:[#allocation2 + $0x20] sm:$0xff] %v345_v13  ;;  %v7883_v19 = vpop.f32.mrf.mxu0  ;;  %v1243_v12 = vld [vmem:[#allocation3] sm:$0xff] }
  0xe4   :  { %842 = vst [vmem:[#allocation3 + $0x10] sm:$0xf] %v6921_v16  ;;  %555 = vst [vmem:[#allocation3 + $0x28] sm:$0xf] %v6921_v16  ;;  %v6924_v20 = vpack.c.bf16 %v348_v17, %v348_v17  ;;  %v346_v21 = vmax.f32 %v286_v18, 0.0  ;;  %v307_v22 = vadd.f32 %v7883_v19, %v8773_v5 }
  0xe5   :  { %365 = vst [vmem:[#allocation2 + $0x68] sm:$0xff] %v348_v17  ;;  %v298_v23 = vpop.f32.mrf.mxu0  ;;  %v8107_v17 = vld [vmem:[%s9883_s22 + $0x138] sm:$0xff]   ;;  %2871 = vst [vmem:[#allocation3] sm:$0xf] %v8706_v41 }
  0xe6   :  { %558 = vst [vmem:[#allocation3 + $0x94] sm:$0xf] %v6924_v20  ;;  %845 = vst [vmem:[#allocation3 + $0x7c] sm:$0xf] %v6924_v20  ;;  %v6922_v24 = vpack.c.bf16 %v346_v21, %v346_v21  ;;  %v351_v25 = vmax.f32 %v307_v22, 0.0  ;;  %v299_v26 = vadd.f32 %v8773_v5, %v298_v23 }
  0xe7   :  { %1133 = vst [vmem:[#allocation3 + $0x64] sm:$0xf] %v6924_v20  ;;  %363 = vst [vmem:[#allocation2 + $0x38] sm:$0xff] %v346_v21  ;;  %v381_v27 = vld [vmem:[#allocation2 + $0x4f] sm:$0xff]  ;;  %v7884_v29 = vpop.f32.mrf.mxu0 }
  0xe8   :  { %v573_v28 = vld [vmem:[#allocation2 + $0x51] sm:$0xff]  ;;  %v6907_v30 = vpack.c.bf16 %v381_v27, %v381_v27  ;;  %556 = vst [vmem:[#allocation3 + $0x4c] sm:$0xf] %v6922_v24  ;;  %843 = vst [vmem:[#allocation3 + $0x34] sm:$0xf] %v6922_v24  ;;  %v6927_v32 = vpack.c.bf16 %v351_v25, %v351_v25  ;;  %v349_v33 = vmax.f32 %v299_v26, 0.0  ;;  %v310_v36 = vadd.f32 %v7884_v29, %v8773_v5 }
  0xe9   :  { %v6939_v31 = vpack.c.bf16 %v573_v28, %v573_v28  ;;  %1131 = vst [vmem:[#allocation3 + $0x1c] sm:$0xf] %v6922_v24  ;;  %368 = vst [vmem:[#allocation2 + $0xb0] sm:$0xff] %v351_v25  ;;  %v301_v37 = vpop.f32.mrf.mxu0  ;;  %v8115_v26 = vld [vmem:[%s9883_s22 + $0x170] sm:$0xff]  }
  0xea   :  { %v379_v34 = vld [vmem:[#allocation2 + $0x1f] sm:$0xff]  ;;  %461 = vst [vmem:[#allocation3 + $0x6c] sm:$0xf] %v6907_v30  ;;  %748 = vst [vmem:[#allocation3 + $0x54] sm:$0xf] %v6907_v30  ;;  %v6925_v40 = vpack.c.bf16 %v349_v33, %v349_v33  ;;  %v302_v42 = vadd.f32 %v8773_v5, %v301_v37  ;;  %v352_v47 = vmax.f32 %v310_v36, 0.0 }
  0xeb   :  { %v571_v35 = vld [vmem:[#allocation2 + $0x21] sm:$0xff]  ;;  %653 = vst [vmem:[#allocation3 + $0x74] sm:$0xf] %v6939_v31  ;;  %940 = vst [vmem:[#allocation3 + $0x5c] sm:$0xf] %v6939_v31  ;;  %v6905_v38 = vpack.c.bf16 %v379_v34, %v379_v34  ;;  %v7887_v48 = vpop.f32.mrf.mxu0 }
  0xec   :  { %1036 = vst [vmem:[#allocation3 + $0x3c] sm:$0xf] %v6907_v30  ;;  %1228 = vst [vmem:[#allocation3 + $0x44] sm:$0xf] %v6939_v31  ;;  %v6937_v39 = vpack.c.bf16 %v571_v35, %v571_v35  ;;  %v382_v44 = vld [vmem:[#allocation2 + $0x67] sm:$0xff]  ;;  %v350_v51 = vmax.f32 %v302_v42, 0.0  ;;  %v323_v52 = vadd.f32 %v7887_v48, %v8773_v5  ;;  %v6975_v55 = vpack.c.bf16 %v352_v47, %v352_v47 }
  0xed   :  { %561 = vst [vmem:[#allocation3 + $0x100] sm:$0xf] %v6927_v32  ;;  %848 = vst [vmem:[#allocation3 + $0xe8] sm:$0xf] %v6927_v32  ;;  %v574_v45 = vld [vmem:[#allocation2 + $0x69] sm:$0xff]  ;;  %v6908_v49 = vpack.c.bf16 %v382_v44, %v382_v44  ;;  %v314_v57 = vpop.f32.mrf.mxu0 }
  0xee   :  { %1136 = vst [vmem:[#allocation3 + $0xd0] sm:$0xf] %v6927_v32  ;;  %366 = vst [vmem:[#allocation2 + $0x80] sm:$0xff] %v349_v33  ;;  %v6940_v50 = vpack.c.bf16 %v574_v45, %v574_v45  ;;  %v380_v53 = vld [vmem:[#allocation2 + $0x37] sm:$0xff]  ;;  %v6926_v62 = vpack.c.bf16 %v350_v51, %v350_v51  ;;  %v355_v63 = vmax.f32 %v323_v52, 0.0  ;;  %v315_v6 = vadd.f32 %v8773_v5, %v314_v57  ;;  %v8804_v45 = vld [vmem:[%s9883_s22 + $0x168] sm:$0xff]  }
  0xef   :  { %651 = vst [vmem:[#allocation3 + $0x2c] sm:$0xf] %v6937_v39  ;;  %746 = vst [vmem:[#allocation3 + $0xc] sm:$0xf] %v6905_v38  ;;  %v572_v54 = vld [vmem:[#allocation2 + $0x39] sm:$0xff]  ;;  %v6906_v58 = vpack.c.bf16 %v380_v53, %v380_v53  ;;  %v7888_v7 = vpop.f32.mrf.mxu0 }
  0xf0   :  { %938 = vst [vmem:[#allocation3 + $0x14] sm:$0xf] %v6937_v39  ;;  %459 = vst [vmem:[#allocation3 + $0x24] sm:$0xf] %v6905_v38  ;;  %v6938_v60 = vpack.c.bf16 %v572_v54, %v572_v54  ;;  %v385_v1 = vld [vmem:[#allocation2 + $0xaf] sm:$0xff]  ;;  %v6931_v10 = vpack.c.bf16 %v355_v63, %v355_v63  ;;  %v326_v11 = vadd.f32 %v7888_v7, %v8773_v5  ;;  %v353_v15 = vmax.f32 %v315_v6, 0.0 }
  0xf1   :  { %559 = vst [vmem:[#allocation3 + $0xb8] sm:$0xf] %v6925_v40  ;;  %846 = vst [vmem:[#allocation3 + $0xa0] sm:$0xf] %v6925_v40  ;;  %v577_v3 = vld [vmem:[#allocation2 + $0xb1] sm:$0xff]  ;;  %v6911_v8 = vpack.c.bf16 %v385_v1, %v385_v1  ;;  %v317_v16 = vpop.f32.mrf.mxu0  ;;  %v8812_v1 = vld [vmem:[%s9883_s22 + $0x128] sm:$0xff]  }
  0xf2   :  { %1134 = vst [vmem:[#allocation3 + $0x88] sm:$0xf] %v6925_v40  ;;  %369 = vst [vmem:[#allocation2 + $0xc8] sm:$0xff] %v352_v47  ;;  %v6943_v9 = vpack.c.bf16 %v577_v3, %v577_v3  ;;  %v356_v20 = vmax.f32 %v326_v11, 0.0  ;;  %v318_v21 = vadd.f32 %v8773_v5, %v317_v16  ;;  %v6929_v22 = vpack.c.bf16 %v353_v15, %v353_v15  ;;  %v8102_v25 = vld [vmem:[#allocation3 + $0x4] ss:$36 sps:$4 sm:$0xff]  }
  0xf3   :  { %462 = vst [vmem:[#allocation3 + $0x90] sm:$0xf] %v6908_v49  ;;  %654 = vst [vmem:[#allocation3 + $0x98] sm:$0xf] %v6940_v50  ;;  %v7891_v23 = vpop.f32.mrf.mxu0  ;;  %2306 = vmatprep.mubr.bf16.mxu1 %v8102_v25  ;;  %v8799_v38 = vld [vmem:[%s9883_s22 + $0x130] sm:$0xff]   ;;  %v8145_v3 = vld [vmem:[%s9883_s22 + $0x1b8] sm:$0xff]  }
  0xf4   :  { %749 = vst [vmem:[#allocation3 + $0x78] sm:$0xf] %v6908_v49  ;;  %941 = vst [vmem:[#allocation3 + $0x80] sm:$0xf] %v6940_v50  ;;  %v6932_v29 = vpack.c.bf16 %v356_v20, %v356_v20  ;;  %v354_v30 = vmax.f32 %v318_v21, 0.0  ;;  %v339_v31 = vadd.f32 %v7891_v23, %v8773_v5  ;;  %v8148_v6 = vld [vmem:[%s9883_s22 + $0x1f0] sm:$0xff]  }
  0xf5   :  { %1037 = vst [vmem:[#allocation3 + $0x60] sm:$0xf] %v6908_v49  ;;  %1229 = vst [vmem:[#allocation3 + $0x68] sm:$0xf] %v6940_v50  ;;  %v383_v13 = vld [vmem:[#allocation2 + $0x7f] sm:$0xff]  ;;  %v330_v37 = vpop.f32.mrf.mxu0 }
  0xf6   :  { %367 = vst [vmem:[#allocation2 + $0x98] sm:$0xff] %v350_v51  ;;  %849 = vst [vmem:[#allocation3 + $0x10c] sm:$0xf] %v6975_v55  ;;  %v575_v14 = vld [vmem:[#allocation2 + $0x81] sm:$0xff]  ;;  %v6909_v18 = vpack.c.bf16 %v383_v13, %v383_v13  ;;  %v6930_v41 = vpack.c.bf16 %v354_v30, %v354_v30  ;;  %v359_v42 = vmax.f32 %v339_v31, 0.0  ;;  %v331_v49 = vadd.f32 %v8773_v5, %v330_v37  ;;  %v8141_v37 = vld [vmem:[%s9883_s22 + $0x118] sm:$0xff]  }
  0xf7   :  { %1137 = vst [vmem:[#allocation3 + $0xf4] sm:$0xf] %v6975_v55  ;;  %460 = vst [vmem:[#allocation3 + $0x48] sm:$0xf] %v6906_v58  ;;  %v6941_v19 = vpack.c.bf16 %v575_v14, %v575_v14  ;;  %v1248_v24 = vld [vmem:[#allocation3 + $0x24] sm:$0xff]  ;;  %v7892_v50 = vpop.f32.mrf.mxu0 }
  0xf8   :  { %652 = vst [vmem:[#allocation3 + $0x50] sm:$0xf] %v6938_v60  ;;  %747 = vst [vmem:[#allocation3 + $0x30] sm:$0xf] %v6906_v58  ;;  %v6428_v32 = vcombine.low %v1243_v12, %v1248_v24  ;;  %v1244_v44 = vld [vmem:[#allocation3 + $0x8] sm:$0xff]  ;;  %v6935_v53 = vpack.c.bf16 %v359_v42, %v359_v42  ;;  %v342_v54 = vadd.f32 %v7892_v50, %v8773_v5  ;;  %v8131_v11 = vld [vmem:[%s9883_s22 + $0x160] sm:$0xff]  }
  0xf9   :  { %939 = vst [vmem:[#allocation3 + $0x38] sm:$0xf] %v6938_v60  ;;  %1035 = vst [vmem:[#allocation3 + $0x18] sm:$0xf] %v6906_v58  ;;  %v673_v27 = vld [vmem:[#allocation2 + $0xc7] sm:$0xff] }
  0xfa   :  { %1227 = vst [vmem:[#allocation3 + $0x20] sm:$0xf] %v6938_v60  ;;  %560 = vst [vmem:[#allocation3 + $0xdc] sm:$0xf] %v6926_v62  ;;  %v865_v28 = vld [vmem:[#allocation2 + $0xc9] sm:$0xff]  ;;  %v6959_v33 = vpack.c.bf16 %v673_v27, %v673_v27  ;;  %2307 = vmatmul.mubr.bf16.vlgmr.msra.gmra.mxu1 %v6428_v32  ;;  %v357_v60 = vmax.f32 %v331_v49, 0.0 }
  0xfb   :  { %847 = vst [vmem:[#allocation3 + $0xc4] sm:$0xf] %v6926_v62  ;;  %1135 = vst [vmem:[#allocation3 + $0xac] sm:$0xf] %v6926_v62  ;;  %v6991_v34 = vpack.c.bf16 %v865_v28, %v865_v28  ;;  %7410 = vmatpush3.bf16.msra.mxu1 %v8107_v17  ;;  %v8108_v55 = vld [vmem:[#allocation3 + $0x4c] ss:$36 sps:$4 sm:$0xff]   ;;  %v333_v62 = vpop.f32.mrf.mxu0 }
  0xfc   :  { %372 = vst [vmem:[#allocation2 + $0x140] sm:$0xff] %v355_v63  ;;  %465 = vst [vmem:[#allocation3 + $0xfc] sm:$0xf] %v6911_v8  ;;  %7411 = vmatprep.subr.bf16.mxu1 %v8115_v26  ;;  %2314 = vmatprep.mubr.bf16.mxu1 %v8108_v55  ;;  %v6933_v16 = vpack.c.bf16 %v357_v60, %v357_v60  ;;  %v8152_v17 = vld [vmem:[%s9883_s22 + $0x1b0] sm:$0xff]   ;;  %v8132_v25 = vld [vmem:[%s9883_s22 + $0x120] sm:$0xff]  }
  0xfd   :  { %657 = vst [vmem:[#allocation3 + $0x104] sm:$0xf] %v6943_v9  ;;  %752 = vst [vmem:[#allocation3 + $0xe4] sm:$0xf] %v6911_v8  ;;  %v384_v35 = vld [vmem:[#allocation2 + $0x97] sm:$0xff]  ;;  %v8164_v49 = vld [vmem:[%s9883_s22 + $0x1a0] sm:$0xff]  }
  0xfe   :  { %944 = vst [vmem:[#allocation3 + $0xec] sm:$0xf] %v6943_v9  ;;  %1040 = vst [vmem:[#allocation3 + $0xcc] sm:$0xf] %v6911_v8  ;;  %v576_v36 = vld [vmem:[#allocation2 + $0x99] sm:$0xff]  ;;  %v6910_v39 = vpack.c.bf16 %v384_v35, %v384_v35  ;;  %v360_v8 = vmax.f32 %v342_v54, 0.0 }
  0xff   :  { %1232 = vst [vmem:[#allocation3 + $0xd4] sm:$0xf] %v6943_v9  ;;  %565 = vst [vmem:[#allocation3 + $0x190] sm:$0xf] %v6931_v10  ;;  %v6942_v40 = vpack.c.bf16 %v576_v36, %v576_v36  ;;  %v1249_v57 = vld [vmem:[#allocation3 + $0x2c] sm:$0xff]  ;;  %v334_v9 = vadd.f32 %v8773_v5, %v333_v62  ;;  %7412 = vmatpush3.bf16.msra.mxu1 %v8799_v38  ;;  %v8160_v38 = vld [vmem:[%s9883_s22 + $0x1e0] sm:$0xff]  }
 0x100   :  { %852 = vst [vmem:[#allocation3 + $0x178] sm:$0xf] %v6931_v10  ;;  %1140 = vst [vmem:[#allocation3 + $0x160] sm:$0xf] %v6931_v10  ;;  %v8110_v58 = vld [vmem:[#allocation3 + $0xc] ss:$36 sps:$4 sm:$0xff]   ;;  %v6430_v63 = vcombine.low %v1244_v44, %v1249_v57  ;;  %7413 = vmatprep.subr.bf16.mxu1 %v8804_v45 }
 0x101   :  { %370 = vst [vmem:[#allocation2 + $0x110] sm:$0xff] %v353_v15  ;;  %463 = vst [vmem:[#allocation3 + $0xb4] sm:$0xf] %v6909_v18  ;;  %2403 = vmatprep.mubr.bf16.mxu0 %v8110_v58  ;;  %v8112_v10 = vld [vmem:[#allocation3 + $0x54] ss:$36 sps:$4 sm:$0xff]   ;;  %v8157_v35 = vld [vmem:[%s9883_s22 + $0x1a8] sm:$0xff]  }
 0x102   :  { %655 = vst [vmem:[#allocation3 + $0xbc] sm:$0xf] %v6941_v19  ;;  %750 = vst [vmem:[#allocation3 + $0x9c] sm:$0xf] %v6909_v18  ;;  %2404 = vmatmul.mubr.bf16.vlgmr.msra.gmra.mxu0 %v6430_v63  ;;  %v8114_v21 = vld [vmem:[#allocation3 + $0x48] ss:$36 sps:$4 sm:$0xff]  }
 0x103   :  { %942 = vst [vmem:[#allocation3 + $0xa4] sm:$0xf] %v6941_v19  ;;  %1038 = vst [vmem:[#allocation3 + $0x84] sm:$0xf] %v6909_v18  ;;  %v389_v47 = vld [vmem:[#allocation2 + $0x13f] sm:$0xff]  ;;  %2411 = vmatprep.mubr.bf16.mxu0 %v8112_v10  ;;  %7474 = vmatpush3.bf16.msra.mxu0 %v8145_v3  ;;  %v8176_v10 = vld [vmem:[%s9883_s22 + $0x190] sm:$0xff]  }
 0x104   :  { %1230 = vst [vmem:[#allocation3 + $0x8c] sm:$0xf] %v6941_v19  ;;  %373 = vst [vmem:[#allocation2 + $0x158] sm:$0xff] %v356_v20  ;;  %v581_v48 = vld [vmem:[#allocation2 + $0x141] sm:$0xff]  ;;  %v6915_v51 = vpack.c.bf16 %v389_v47, %v389_v47  ;;  %v6983_v19 = vpack.c.bf16 %v360_v8, %v360_v8  ;;  %v358_v20 = vmax.f32 %v334_v9, 0.0  ;;  %2315 = vmatmul.mubr.bf16.gmra.mxu1 %v8114_v21  ;;  %7475 = vmatprep.subr.bf16.mxu0 %v8148_v6  ;;  %v8166_v55 = vld [vmem:[%s9883_s22 + $0x1d8] sm:$0xff]  }
 0x105   :  { %2967 = vst [vmem:[#allocation3 + $0x4] sm:$0xf] %v8483_v46  ;;  %563 = vst [vmem:[#allocation3 + $0x148] sm:$0xf] %v6929_v22  ;;  %v6947_v52 = vpack.c.bf16 %v581_v48, %v581_v48  ;;  %7414 = vmatpush3.bf16.msra.mxu1 %v8812_v1  ;;  %v8119_v36 = vld [vmem:[#allocation3 + $0x50] ss:$36 sps:$4 sm:$0xff]  }
 0x106   :  { %850 = vst [vmem:[#allocation3 + $0x130] sm:$0xf] %v6929_v22  ;;  %566 = vst [vmem:[#allocation3 + $0x1b4] sm:$0xf] %v6932_v29  ;;  %v8116_v22 = vld [vmem:[#allocation3 + $0x94] ss:$36 sps:$4 sm:$0xff]   ;;  %v6934_v28 = vpack.c.bf16 %v358_v20, %v358_v20  ;;  %7415 = vmatprep.subr.bf16.mxu1 %v8131_v11 }
 0x107   :  { %853 = vst [vmem:[#allocation3 + $0x19c] sm:$0xf] %v6932_v29  ;;  %1141 = vst [vmem:[#allocation3 + $0x184] sm:$0xf] %v6932_v29  ;;  %v8154_v29 = vld [vmem:[%s9883_s22 + $0x1e8] sm:$0xff]   ;;  %2322 = vmatprep.mubr.bf16.mxu1 %v8116_v22  ;;  %7476 = vmatpush3.bf16.msra.mxu0 %v8152_v17  ;;  %v8151_v1 = vld [vmem:[%s9883_s22 + $0x110] sm:$0xff]  }
 0x108   :  { %371 = vst [vmem:[#allocation2 + $0x128] sm:$0xff] %v354_v30  ;;  %753 = vst [vmem:[#allocation3 + $0x108] sm:$0xf] %v6959_v33  ;;  %v579_v7 = vld [vmem:[#allocation2 + $0x111] sm:$0xff]  ;;  %7477 = vmatprep.subr.bf16.mxu0 %v8154_v29  ;;  %v8178_v11 = vld [vmem:[%s9883_s22 + $0x1c8] sm:$0xff]  }
 0x109   :  { %945 = vst [vmem:[#allocation3 + $0x110] sm:$0xf] %v6991_v34  ;;  %1041 = vst [vmem:[#allocation3 + $0xf0] sm:$0xf] %v6959_v33  ;;  %v6945_v13 = vpack.c.bf16 %v579_v7, %v579_v7  ;;  %7416 = vmatpush3.bf16.msra.mxu1 %v8132_v25  ;;  %v8127_v3 = vld [vmem:[#allocation3 + $0x98] ss:$36 sps:$4 sm:$0xff]  }
 0x10a   :  { %1233 = vst [vmem:[#allocation3 + $0xf8] sm:$0xf] %v6991_v34  ;;  %464 = vst [vmem:[#allocation3 + $0xd8] sm:$0xf] %v6910_v39  ;;  %v8138_v34 = vld [vmem:[%s9883_s22 + $0x158] sm:$0xff]   ;;  %2412 = vmatmul.mubr.bf16.gmra.mxu0 %v8119_v36  ;;  %v8163_v7 = vld [vmem:[%s9883_s22 + $0x108] sm:$0xff]  }
 0x10b   :  { %656 = vst [vmem:[#allocation3 + $0xe0] sm:$0xf] %v6942_v40  ;;  %751 = vst [vmem:[#allocation3 + $0xc0] sm:$0xf] %v6910_v39  ;;  %v390_v14 = vld [vmem:[#allocation2 + $0x157] sm:$0xff]  ;;  %7417 = vmatprep.subr.bf16.mxu1 %v8138_v34  ;;  %7478 = vmatpush3.bf16.msra.mxu0 %v8157_v35  ;;  %v8179_v17 = vld [vmem:[%s9883_s22 + $0x188] sm:$0xff]  }
 0x10c   :  { %943 = vst [vmem:[#allocation3 + $0xc8] sm:$0xf] %v6942_v40  ;;  %1039 = vst [vmem:[#allocation3 + $0xa8] sm:$0xf] %v6910_v39  ;;  %v582_v15 = vld [vmem:[#allocation2 + $0x159] sm:$0xff]  ;;  %v6916_v18 = vpack.c.bf16 %v390_v14, %v390_v14  ;;  %7479 = vmatprep.subr.bf16.mxu0 %v8160_v38  ;;  %v8192_v38 = vld [vmem:[%s9883_s22 + $0x230] sm:$0xff]  }
 0x10d   :  { %1231 = vst [vmem:[#allocation3 + $0xb0] sm:$0xf] %v6942_v40  ;;  %564 = vst [vmem:[#allocation3 + $0x16c] sm:$0xf] %v6930_v41  ;;  %v6948_v5 = vpack.c.bf16 %v582_v15, %v582_v15  ;;  %v8134_v54 = vld [vmem:[#allocation3 + $0x124] ss:$36 sps:$4 sm:$0xff]   ;;  %7418 = vmatpush3.bf16.msra.mxu1 %v8141_v37 }
 0x10e   :  { %851 = vst [vmem:[#allocation3 + $0x154] sm:$0xf] %v6930_v41  ;;  %1139 = vst [vmem:[#allocation3 + $0x13c] sm:$0xf] %v6930_v41  ;;  %v8169_v6 = vld [vmem:[%s9883_s22 + $0x198] sm:$0xff]  }
 0x10f   :  { %376 = vst [vmem:[#allocation2 + $0x1a0] sm:$0xff] %v359_v42  ;;  %3063 = vst [vmem:[#allocation3 + $0x8] sm:$0xf] %v8708_v43  ;;  %v387_v43 = vld [vmem:[#allocation2 + $0x10f] sm:$0xff]  ;;  %v388_v23 = vld [vmem:[#allocation2 + $0x127] sm:$0xff]  ;;  %7480 = vmatpush3.bf16.msra.mxu0 %v8164_v49 }
 0x110   :  { %469 = vst [vmem:[#allocation3 + $0x18c] sm:$0xf] %v6915_v51  ;;  %661 = vst [vmem:[#allocation3 + $0x194] sm:$0xf] %v6947_v52  ;;  %v6913_v12 = vpack.c.bf16 %v387_v43, %v387_v43  ;;  %v580_v24 = vld [vmem:[#allocation2 + $0x129] sm:$0xff]  ;;  %v6914_v26 = vpack.c.bf16 %v388_v23, %v388_v23  ;;  %7481 = vmatprep.subr.bf16.mxu0 %v8166_v55  ;;  %v8890_v14 = vld [vmem:[%s9883_s22 + $0x238] sm:$0xff]  }
 0x111   :  { %756 = vst [vmem:[#allocation3 + $0x174] sm:$0xf] %v6915_v51  ;;  %948 = vst [vmem:[#allocation3 + $0x17c] sm:$0xf] %v6947_v52  ;;  %v6946_v27 = vpack.c.bf16 %v580_v24, %v580_v24  ;;  %v8147_v42 = vld [vmem:[%s9883_s22 + $0x150] sm:$0xff]  }
 0x112   :  { %1044 = vst [vmem:[#allocation3 + $0x15c] sm:$0xf] %v6915_v51  ;;  %1236 = vst [vmem:[#allocation3 + $0x164] sm:$0xf] %v6947_v52  ;;  %v8120_v41 = vld [vmem:[#allocation3 + $0x9c] ss:$36 sps:$4 sm:$0xff]   ;;  %7419 = vmatprep.subr.bf16.mxu1 %v8147_v42 }
 0x113   :  { %569 = vst [vmem:[#allocation3 + $0x220] sm:$0xf] %v6935_v53  ;;  %856 = vst [vmem:[#allocation3 + $0x208] sm:$0xf] %v6935_v53  ;;  %2419 = vmatprep.mubr.bf16.mxu0 %v8120_v41  ;;  %v8122_v52 = vld [vmem:[#allocation3 + $0x90] ss:$36 sps:$4 sm:$0xff]   ;;  %7420 = vmatpush3.bf16.msra.mxu1 %v8151_v1 }
 0x114   :  { %1144 = vst [vmem:[#allocation3 + $0x1f0] sm:$0xf] %v6935_v53  ;;  %374 = vst [vmem:[#allocation2 + $0x170] sm:$0xff] %v357_v60  ;;  %v8124_v53 = vld [vmem:[#allocation3 + $0xdc] ss:$36 sps:$4 sm:$0xff]   ;;  %2323 = vmatmul.mubr.bf16.gmra.mxu1 %v8122_v52  ;;  %2420 = vmatmul.mubr.bf16.gmra.mxu0 %v8127_v3 }
 0x115   :  { %377 = vst [vmem:[#allocation2 + $0x1b8] sm:$0xff] %v360_v8  ;;  %467 = vst [vmem:[#allocation3 + $0x144] sm:$0xf] %v6913_v12  ;;  %2330 = vmatprep.mubr.bf16.mxu1 %v8124_v53  ;;  %v8128_v43 = vld [vmem:[#allocation3 + $0xe4] ss:$36 sps:$4 sm:$0xff]   ;;  %7421 = vmatprep.subr.bf16.mxu1 %v8159_v56 }
 0x116   :  { %659 = vst [vmem:[#allocation3 + $0x14c] sm:$0xf] %v6945_v13  ;;  %754 = vst [vmem:[#allocation3 + $0x12c] sm:$0xf] %v6913_v12  ;;  %v393_v30 = vld [vmem:[#allocation2 + $0x19f] sm:$0xff]  ;;  %2427 = vmatprep.mubr.bf16.mxu0 %v8128_v43  ;;  %7482 = vmatpush3.bf16.msra.mxu0 %v8169_v6  ;;  %v8225_v53 = vld [vmem:[%s9883_s22 + $0x208] sm:$0xff]  }
 0x117   :  { %946 = vst [vmem:[#allocation3 + $0x134] sm:$0xf] %v6945_v13  ;;  %567 = vst [vmem:[#allocation3 + $0x1d8] sm:$0xf] %v6933_v16  ;;  %v585_v31 = vld [vmem:[#allocation2 + $0x1a1] sm:$0xff]  ;;  %v6919_v32 = vpack.c.bf16 %v393_v30, %v393_v30  ;;  %7483 = vmatprep.subr.bf16.mxu0 %v8172_v59  ;;  %7422 = vmatpush3.bf16.msra.mxu1 %v8163_v7 }
 0x118   :  { %854 = vst [vmem:[#allocation3 + $0x1c0] sm:$0xf] %v6933_v16  ;;  %1142 = vst [vmem:[#allocation3 + $0x1a8] sm:$0xf] %v6933_v16  ;;  %v6951_v33 = vpack.c.bf16 %v585_v31, %v585_v31  ;;  %v8171_v8 = vld [vmem:[%s9883_s22 + $0x140] sm:$0xff]  }
 0x119   :  { %470 = vst [vmem:[#allocation3 + $0x1b0] sm:$0xf] %v6916_v18  ;;  %662 = vst [vmem:[#allocation3 + $0x1b8] sm:$0xf] %v6948_v5  ;;  %v8130_v9 = vld [vmem:[#allocation3 + $0xd8] ss:$36 sps:$4 sm:$0xff]   ;;  %7423 = vmatprep.subr.bf16.mxu1 %v8171_v8 }
 0x11a   :  { %757 = vst [vmem:[#allocation3 + $0x198] sm:$0xf] %v6916_v18  ;;  %949 = vst [vmem:[#allocation3 + $0x1a0] sm:$0xf] %v6948_v5  ;;  %v8173_v12 = vld [vmem:[%s9883_s22 + $0x100] sm:$0xff]   ;;  %7484 = vmatpush3.bf16.msra.mxu0 %v8176_v10 }
 0x11b   :  { %1045 = vst [vmem:[#allocation3 + $0x180] sm:$0xf] %v6916_v18  ;;  %1237 = vst [vmem:[#allocation3 + $0x188] sm:$0xf] %v6948_v5  ;;  %v391_v39 = vld [vmem:[#allocation2 + $0x16f] sm:$0xff]  ;;  %7485 = vmatprep.subr.bf16.mxu0 %v8178_v11  ;;  %v8183_v18 = vld [vmem:[%s9883_s22 + $0x1c0] sm:$0xff]   ;;  %7424 = vmatpush3.bf16.msra.mxu1 %v8173_v12 }
 0x11c   :  { %857 = vst [vmem:[#allocation3 + $0x22c] sm:$0xf] %v6983_v19  ;;  %1145 = vst [vmem:[#allocation3 + $0x214] sm:$0xf] %v6983_v19  ;;  %v583_v40 = vld [vmem:[#allocation2 + $0x171] sm:$0xff]  ;;  %v6917_v44 = vpack.c.bf16 %v391_v39, %v391_v39  ;;  %v873_v48 = vld [vmem:[#allocation2 + $0x1b9] sm:$0xff]  ;;  %2331 = vmatmul.mubr.bf16.gmra.mxu1 %v8130_v9  ;;  %7893 = vmatprep.subr.bf16.mxu1 %v8890_v14 }
 0x11d   :  { %375 = vst [vmem:[#allocation2 + $0x188] sm:$0xff] %v358_v20  ;;  %468 = vst [vmem:[#allocation3 + $0x168] sm:$0xf] %v6914_v26  ;;  %v6949_v45 = vpack.c.bf16 %v583_v40, %v583_v40  ;;  %v681_v47 = vld [vmem:[#allocation2 + $0x1b7] sm:$0xff]  ;;  %v6999_v51 = vpack.c.bf16 %v873_v48, %v873_v48  ;;  %2338 = vmatprep.mubr.bf16.mxu1 %v8134_v54  ;;  %v8133_v15 = vld [vmem:[#allocation3 + $0xe0] ss:$36 sps:$4 sm:$0xff]  }
 0x11e   :  { %660 = vst [vmem:[#allocation3 + $0x170] sm:$0xf] %v6946_v27  ;;  %755 = vst [vmem:[#allocation3 + $0x150] sm:$0xf] %v6914_v26  ;;  %v6967_v50 = vpack.c.bf16 %v681_v47, %v681_v47  ;;  %v1288_v16 = vld [vmem:[#allocation3 + $0x144] sm:$0xff]  ;;  %2428 = vmatmul.mubr.bf16.gmra.mxu0 %v8133_v15  ;;  %v8211_v47 = vld [vmem:[%s9883_s22 + $0x218] sm:$0xff]  }
 0x11f   :  { %947 = vst [vmem:[#allocation3 + $0x158] sm:$0xf] %v6946_v27  ;;  %1043 = vst [vmem:[#allocation3 + $0x138] sm:$0xf] %v6914_v26  ;;  %v1284_v5 = vld [vmem:[#allocation3 + $0x128] sm:$0xff]  ;;  %v8187_v20 = vld [vmem:[%s9883_s22 + $0x180] sm:$0xff]   ;;  %7486 = vmatpush3.bf16.msra.mxu0 %v8179_v17 }
 0x120   :  { %1235 = vst [vmem:[#allocation3 + $0x140] sm:$0xf] %v6946_v27  ;;  %568 = vst [vmem:[#allocation3 + $0x1fc] sm:$0xf] %v6934_v28  ;;  %v8139_v21 = vld [vmem:[#allocation3 + $0x16c] ss:$36 sps:$4 sm:$0xff]   ;;  %7487 = vmatprep.subr.bf16.mxu0 %v8183_v18 }
 0x121   :  { %855 = vst [vmem:[#allocation3 + $0x1e4] sm:$0xf] %v6934_v28  ;;  %1143 = vst [vmem:[#allocation3 + $0x1cc] sm:$0xf] %v6934_v28  ;;  %v8902_v22 = vld [vmem:[#allocation3 + $0xf4] ss:$36 sps:$4 sm:$0xff]  }
 0x122   :  { %473 = vst [vmem:[#allocation3 + $0x21c] sm:$0xf] %v6919_v32  ;;  %665 = vst [vmem:[#allocation3 + $0x224] sm:$0xf] %v6951_v33  ;;  %v8143_v25 = vld [vmem:[#allocation3 + $0x174] ss:$36 sps:$4 sm:$0xff]  }
 0x123   :  { %760 = vst [vmem:[#allocation3 + $0x204] sm:$0xf] %v6919_v32  ;;  %952 = vst [vmem:[#allocation3 + $0x20c] sm:$0xf] %v6951_v33  ;;  %7488 = vmatpush3.bf16.msra.mxu0 %v8187_v20  ;;  %v8149_v27 = vld [vmem:[#allocation3 + $0x1b4] ss:$36 sps:$4 sm:$0xff]  }
 0x124   :  { %1048 = vst [vmem:[#allocation3 + $0x1ec] sm:$0xf] %v6919_v32  ;;  %1240 = vst [vmem:[#allocation3 + $0x1f4] sm:$0xf] %v6951_v33  ;;  %v392_v57 = vld [vmem:[#allocation2 + $0x187] sm:$0xff] }
 0x125   :  { %471 = vst [vmem:[#allocation3 + $0x1d4] sm:$0xf] %v6917_v44  ;;  %663 = vst [vmem:[#allocation3 + $0x1dc] sm:$0xf] %v6949_v45  ;;  %v584_v58 = vld [vmem:[#allocation2 + $0x189] sm:$0xff]  ;;  %v6918_v60 = vpack.c.bf16 %v392_v57, %v392_v57 }
 0x126   :  { %758 = vst [vmem:[#allocation3 + $0x1bc] sm:$0xf] %v6917_v44  ;;  %950 = vst [vmem:[#allocation3 + $0x1c4] sm:$0xf] %v6949_v45  ;;  %v6950_v62 = vpack.c.bf16 %v584_v58, %v584_v58  ;;  %v8136_v63 = vld [vmem:[#allocation3 + $0x12c] ss:$36 sps:$4 sm:$0xff]  }
 0x127   :  { %1046 = vst [vmem:[#allocation3 + $0x1a4] sm:$0xf] %v6917_v44  ;;  %1238 = vst [vmem:[#allocation3 + $0x1ac] sm:$0xf] %v6949_v45  ;;  %2435 = vmatprep.mubr.bf16.mxu0 %v8136_v63  ;;  %v1289_v23 = vld [vmem:[#allocation3 + $0x14c] sm:$0xff]  ;;  %v8205_v44 = vld [vmem:[%s9883_s22 + $0x220] sm:$0xff]  }
 0x128   :  { %2975 = vst [vmem:[#allocation3 + $0x124] sm:$0xf] %v8483_v46  ;;  %761 = vst [vmem:[#allocation3 + $0x228] sm:$0xf] %v6967_v50  ;;  %v6466_v24 = vcombine.low %v1284_v5, %v1289_v23  ;;  %v8146_v26 = vld [vmem:[#allocation3 + $0x168] ss:$36 sps:$4 sm:$0xff]  }
 0x129   :  { %953 = vst [vmem:[#allocation3 + $0x230] sm:$0xf] %v6999_v51  ;;  %1049 = vst [vmem:[#allocation3 + $0x210] sm:$0xf] %v6967_v50  ;;  %v8906_v28 = vld [vmem:[#allocation3 + $0x214] ss:$36 sps:$4 sm:$0xff]  }
 0x12a   :  { %1241 = vst [vmem:[#allocation3 + $0x218] sm:$0xf] %v6999_v51  ;;  %472 = vst [vmem:[#allocation3 + $0x1f8] sm:$0xf] %v6918_v60  ;;  %2436 = vmatmul.mubr.bf16.gmra.mxu0 %v6466_v24  ;;  %v8153_v29 = vld [vmem:[#allocation3 + $0x170] ss:$36 sps:$4 sm:$0xff]  }
 0x12b   :  { %664 = vst [vmem:[#allocation3 + $0x200] sm:$0xf] %v6950_v62  ;;  %759 = vst [vmem:[#allocation3 + $0x1e0] sm:$0xf] %v6918_v60  ;;  %2443 = vmatprep.mubr.bf16.mxu0 %v8143_v25  ;;  %v8910_v30 = vld [vmem:[#allocation3 + $0xf8] ss:$36 sps:$4 sm:$0xff]  }
 0x12c   :  { %951 = vst [vmem:[#allocation3 + $0x1e8] sm:$0xf] %v6950_v62  ;;  %1047 = vst [vmem:[#allocation3 + $0x1c8] sm:$0xf] %v6918_v60  ;;  %v8158_v31 = vld [vmem:[#allocation3 + $0x1b0] ss:$36 sps:$4 sm:$0xff]  }
 0x12d   :  { %1239 = vst [vmem:[#allocation3 + $0x1d0] sm:$0xf] %v6950_v62  ;;  %3550 = vst [vmem:[#allocation3 + $0x118] sm:$0xf] %v8483_v46  ;;  %v8161_v32 = vld [vmem:[#allocation3 + $0x1fc] ss:$36 sps:$4 sm:$0xff]  }
 0x12e   :  { %3558 = vst [vmem:[#allocation3 + $0x238] sm:$0xf] %v8483_v46  ;;  %3646 = vst [vmem:[#allocation3 + $0x11c] sm:$0xf] %v8761_v0  ;;  %v8165_v34 = vld [vmem:[#allocation3 + $0x1b8] ss:$36 sps:$4 sm:$0xff]  }
 0x12f   :  { %v1283_v13 = vld [vmem:[#allocation3 + $0x120] sm:$0xff]  ;;  %v8174_v2 = vld [vmem:[#allocation3 + $0x14] ss:$36 sps:$4 sm:$0xff]   ;;  %v8196_v49 = vld [vmem:[#allocation3 + $0xac] ss:$36 sps:$4 sm:$0xff]  }
 0x130   :  { %v6464_v19 = vcombine.low %v1283_v13, %v1288_v16  ;;  %v8167_v35 = vld [vmem:[#allocation3 + $0x204] ss:$36 sps:$4 sm:$0xff]   ;;  %v8180_v37 = vld [vmem:[#allocation3 + $0x1c] ss:$36 sps:$4 sm:$0xff]   ;;  %v8182_v0 = vld [vmem:[#allocation3 + $0x10] ss:$36 sps:$4 sm:$0xff]  }
 0x131   :  { %v8913_v33 = vld [vmem:[#allocation3 + $0x218] ss:$36 sps:$4 sm:$0xff]   ;;  %v8189_v41 = vld [vmem:[#allocation3 + $0x64] ss:$36 sps:$4 sm:$0xff]   ;;  %v8218_v51 = vld [vmem:[%s9883_s22 + $0x210] sm:$0xff]  }
 0x132   :  { %2339 = vmatmul.mubr.bf16.gmra.mxu1 %v6464_v19  ;;  %v8155_v61 = vld [vmem:[#allocation3 + $0x1bc] ss:$36 sps:$4 sm:$0xff]   ;;  %2444 = vmatmul.mubr.bf16.gmra.mxu0 %v8153_v29  ;;  %3654 = vst [vmem:[#allocation3 + $0x23c] sm:$0xf] %v8767_v4  ;;  %v8199_v4 = vld [vmem:[%s9883_s22 + $0x228] sm:$0xff]   ;;  %v1276_v63 = vld [vmem:[#allocation3 + $0xf0] sm:$0xff] }
 0x133   :  { %2346 = vmatprep.mubr.bf16.mxu1 %v8139_v21  ;;  %2451 = vmatprep.mubr.bf16.mxu0 %v8155_v61  ;;  %v8170_v46 = vld [vmem:[#allocation3 + $0x1f8] ss:$36 sps:$4 sm:$0xff]   ;;  %v8177_v36 = vld [vmem:[#allocation3 + $0x200] ss:$36 sps:$4 sm:$0xff]   ;;  %v8200_v52 = vld [vmem:[#allocation3 + $0xec] ss:$36 sps:$4 sm:$0xff]  }
 0x134   :  { %v8185_v39 = vld [vmem:[#allocation3 + $0x5c] ss:$36 sps:$4 sm:$0xff]   ;;  %v8193_v45 = vld [vmem:[#allocation3 + $0xa4] ss:$36 sps:$4 sm:$0xff]   ;;  %v1280_v54 = vld [vmem:[#allocation3 + $0x10c] sm:$0xff] }
 0x135   :  { %v8188_v40 = vld [vmem:[#allocation3 + $0x18] ss:$36 sps:$4 sm:$0xff]   ;;  %v8195_v48 = vld [vmem:[#allocation3 + $0x60] ss:$36 sps:$4 sm:$0xff]   ;;  %v8202_v55 = vld [vmem:[#allocation3 + $0xa8] ss:$36 sps:$4 sm:$0xff]  }
 0x136   :  { %v8191_v42 = vld [vmem:[#allocation3 + $0x58] ss:$36 sps:$4 sm:$0xff]   ;;  %v8198_v50 = vld [vmem:[#allocation3 + $0xa0] ss:$36 sps:$4 sm:$0xff]   ;;  %v1275_v57 = vld [vmem:[#allocation3 + $0xe8] sm:$0xff] }
 0x137   :  { %v6459_v58 = vcombine.low %v1275_v57, %v1280_v54  ;;  %v8231_v60 = vld [vmem:[%s9883_s22 + $0x200] sm:$0xff]   ;;  %v8206_v62 = vld [vmem:[#allocation3 + $0x134] ss:$36 sps:$4 sm:$0xff]   ;;  %v8222_v11 = vld [vmem:[#allocation3 + $0x1cc] ss:$36 sps:$4 sm:$0xff]  }
 0x138   :  { %v1281_v1 = vld [vmem:[#allocation3 + $0x114] sm:$0xff]  ;;  %v8208_v3 = vld [vmem:[#allocation3 + $0x13c] ss:$36 sps:$4 sm:$0xff]   ;;  %v8215_v59 = vld [vmem:[#allocation3 + $0x184] ss:$36 sps:$4 sm:$0xff]  }
 0x139   :  { %v6461_v56 = vcombine.low %v1276_v63, %v1281_v1  ;;  %v8210_v6 = vld [vmem:[#allocation3 + $0x130] ss:$36 sps:$4 sm:$0xff]   ;;  %v8212_v43 = vld [vmem:[#allocation3 + $0x17c] ss:$36 sps:$4 sm:$0xff]   ;;  %v8219_v9 = vld [vmem:[#allocation3 + $0x1c4] ss:$36 sps:$4 sm:$0xff]  }
 0x13a   :  { %2347 = vmatmul.mubr.bf16.gmra.mxu1 %v8146_v26  ;;  %2452 = vmatmul.mubr.bf16.gmra.mxu0 %v8165_v34  ;;  %v8214_v7 = vld [vmem:[#allocation3 + $0x138] ss:$36 sps:$4 sm:$0xff]   ;;  %v8221_v10 = vld [vmem:[#allocation3 + $0x180] ss:$36 sps:$4 sm:$0xff]   ;;  %v8226_v13 = vld [vmem:[#allocation3 + $0x20c] ss:$36 sps:$4 sm:$0xff]  }
 0x13b   :  { %2354 = vmatprep.mubr.bf16.mxu1 %v8149_v27  ;;  %2459 = vmatprep.mubr.bf16.mxu0 %v8167_v35  ;;  %v8217_v8 = vld [vmem:[#allocation3 + $0x178] ss:$36 sps:$4 sm:$0xff]   ;;  %v8224_v12 = vld [vmem:[#allocation3 + $0x1c0] ss:$36 sps:$4 sm:$0xff]   ;;  %v1320_v15 = vld [vmem:[#allocation3 + $0x22c] sm:$0xff] }
 0x13c   :  { %v8228_v16 = vld [vmem:[#allocation3 + $0x1c8] ss:$36 sps:$4 sm:$0xff]   ;;  %v8232_v18 = vld [vmem:[#allocation3 + $0x20] ss:$36 sps:$4 sm:$0xff]   ;;  %v1316_v5 = vld [vmem:[#allocation3 + $0x210] sm:$0xff] }
 0x13d   :  { %v1321_v19 = vld [vmem:[#allocation3 + $0x234] sm:$0xff]  ;;  %v8233_v21 = vld [vmem:[#allocation3 + $0x68] ss:$36 sps:$4 sm:$0xff]   ;;  %v8236_v23 = vld [vmem:[#allocation3 + $0x140] ss:$36 sps:$4 sm:$0xff]  }
 0x13e   :  { %v6497_v20 = vcombine.low %v1316_v5, %v1321_v19  ;;  %v8237_v24 = vld [vmem:[#allocation3 + $0x188] ss:$36 sps:$4 sm:$0xff]   ;;  %v8238_v25 = vld [vmem:[#allocation3 + $0x1d0] ss:$36 sps:$4 sm:$0xff]   ;;  %v8240_v26 = vld [vmem:[%s9854_s5 + $0x78] sm:$0xff]  }
 0x13f   :  { %v8241_v27 = vld [vmem:[%s9854_s5 + $0x38] sm:$0xff]   ;;  %7553 = vmatprep.subr.bf16.mxu0 %v8240_v26  ;;  %v8243_v29 = vld [vmem:[%s9854_s5 + $0x30] sm:$0xff]   ;;  %v8244_v61 = vld [vmem:[%s9854_s5 + $0x68] sm:$0xff]  }
 0x140   :  { %v8249_v34 = vld [vmem:[%s9854_s5 + $0x18] sm:$0xff]   ;;  %v8256_v63 = vld [vmem:[%s9854_s5 + $0xe8] sm:$0xff]  }
 0x141   :  { %v8257_v1 = vld [vmem:[%s9854_s5 + $0xa8] sm:$0xff]  }
 0x142   :  { %2355 = vmatmul.mubr.bf16.gmra.mxu1 %v8158_v31  ;;  %2460 = vmatmul.mubr.bf16.gmra.mxu0 %v8177_v36  ;;  %v8246_v31 = vld [vmem:[%s9854_s5 + $0x60] sm:$0xff]  }
 0x143   :  { %2362 = vmatprep.mubr.bf16.mxu1 %v8161_v32  ;;  %2597 = vmatprep.mubr.bf16.mxu0 %v8180_v37  ;;  %v8247_v32 = vld [vmem:[%s9854_s5 + $0x20] sm:$0xff]  }
 0x144   :  { %v8975_v37 = vld [vmem:[%s9885_s2] ss:$0 sm:$0xff] }
 0x14a   :  { %2363 = vmatmul.mubr.bf16.gmra.mxu1 %v8170_v46  ;;  %2598 = vmatmul.mubr.bf16.vlgmr.msra.gmra.mxu0 %v8188_v40 }
 0x14b   :  { %2500 = vmatprep.mubr.bf16.mxu1 %v8174_v2  ;;  %2605 = vmatprep.mubr.bf16.mxu0 %v8189_v41 }
 0x14c   :  { %7554 = vmatpush3.bf16.msra.mxu0 %v8241_v27 }
 0x152   :  { %2501 = vmatmul.mubr.bf16.vlgmr.msra.gmra.mxu1 %v8182_v0  ;;  %2606 = vmatmul.mubr.bf16.gmra.mxu0 %v8195_v48  ;;  %v8252_v48 = vld [vmem:[%s9854_s5 + $0x50] sm:$0xff]  }
 0x153   :  { %2508 = vmatprep.mubr.bf16.mxu1 %v8185_v39  ;;  %7894 = vmatpush3.bf16.msra.mxu1 %v8890_v14  ;;  %v1315_v14 = vld [vmem:[#allocation3 + $0x208] sm:$0xff]  ;;  %v8251_v39 = vld [vmem:[%s9854_s5 + $0xb8] sm:$0xff]  }
 0x154   :  { %7895 = vmatprep.subr.bf16.mxu1 %v8192_v38  ;;  %2613 = vmatprep.mubr.bf16.mxu0 %v8196_v49  ;;  %v6495_v17 = vcombine.low %v1315_v14, %v1320_v15  ;;  %v8253_v49 = vld [vmem:[%s9854_s5 + $0xf0] sm:$0xff]   ;;  %v8261_v15 = vld [vmem:[%s9854_s5 + $0xa0] sm:$0xff]  }
 0x157   :  { %7896 = vmatpush3.bf16.msra.mxu1 %v8192_v38  ;;  %v8250_v38 = vld [vmem:[%s9854_s5 + $0xf8] sm:$0xff]  }
 0x158   :  { %7897 = vmatprep.subr.bf16.mxu1 %v8199_v4 }
 0x15a   :  { %2509 = vmatmul.mubr.bf16.gmra.mxu1 %v8191_v42  ;;  %2614 = vmatmul.mubr.bf16.gmra.mxu0 %v8202_v55 }
 0x15b   :  { %2516 = vmatprep.mubr.bf16.mxu1 %v8193_v45  ;;  %7898 = vmatpush3.bf16.msra.mxu1 %v8199_v4 }
 0x15c   :  { %7899 = vmatprep.subr.bf16.mxu1 %v8205_v44  ;;  %2621 = vmatprep.mubr.bf16.mxu0 %v8902_v22  ;;  %v8234_v22 = vld [vmem:[#allocation3 + $0xb0] ss:$36 sps:$4 sm:$0xff]  }
 0x15f   :  { %7900 = vmatpush3.bf16.msra.mxu1 %v8205_v44 }
 0x160   :  { %7901 = vmatprep.subr.bf16.mxu1 %v8211_v47 }
 0x162   :  { %2517 = vmatmul.mubr.bf16.gmra.mxu1 %v8198_v50  ;;  %2622 = vmatmul.mubr.bf16.gmra.mxu0 %v6461_v56  ;;  %v8254_v50 = vld [vmem:[%s9854_s5 + $0x10] sm:$0xff]  }
 0x163   :  { %2524 = vmatprep.mubr.bf16.mxu1 %v8200_v52  ;;  %7902 = vmatpush3.bf16.msra.mxu1 %v8211_v47 }
 0x164   :  { %7903 = vmatprep.subr.bf16.mxu1 %v8218_v51  ;;  %2629 = vmatprep.mubr.bf16.mxu0 %v8208_v3 }
 0x167   :  { %7904 = vmatpush3.bf16.msra.mxu1 %v8218_v51 }
 0x168   :  { %7905 = vmatprep.subr.bf16.mxu1 %v8225_v53 }
 0x16a   :  { %2525 = vmatmul.mubr.bf16.gmra.mxu1 %v6459_v58  ;;  %2630 = vmatmul.mubr.bf16.gmra.mxu0 %v8214_v7 }
 0x16b   :  { %2532 = vmatprep.mubr.bf16.mxu1 %v8206_v62  ;;  %7906 = vmatpush3.bf16.msra.mxu1 %v8225_v53  ;;  %v8255_v53 = vld [vmem:[%s9854_s5 + $0xb0] sm:$0xff]  }
 0x16c   :  { %7907 = vmatprep.subr.bf16.mxu1 %v8231_v60  ;;  %2637 = vmatprep.mubr.bf16.mxu0 %v8215_v59 }
 0x16f   :  { %7908 = vmatpush3.bf16.msra.mxu1 %v8231_v60 }
 0x170   :  { %7617 = vmatprep.subr.bf16.mxu1 %v8250_v38 }
 0x172   :  { %2533 = vmatmul.mubr.bf16.gmra.mxu1 %v8210_v6  ;;  %2638 = vmatmul.mubr.bf16.gmra.mxu0 %v8221_v10  ;;  %v8258_v10 = vld [vmem:[%s9854_s5 + $0x48] sm:$0xff]  }
 0x173   :  { %2540 = vmatprep.mubr.bf16.mxu1 %v8212_v43  ;;  %2645 = vmatprep.mubr.bf16.mxu0 %v8222_v11  ;;  %v8259_v11 = vld [vmem:[%s9854_s5 + $0xe0] sm:$0xff]  }
 0x17a   :  { %2541 = vmatmul.mubr.bf16.gmra.mxu1 %v8217_v8  ;;  %2646 = vmatmul.mubr.bf16.gmra.mxu0 %v8228_v16 }
 0x17b   :  { %2548 = vmatprep.mubr.bf16.mxu1 %v8219_v9  ;;  %2653 = vmatprep.mubr.bf16.mxu0 %v8906_v28  ;;  %v8242_v28 = vld [vmem:[%s9854_s5 + $0x70] sm:$0xff]  }
 0x17c   :  { %7555 = vmatprep.subr.bf16.mxu0 %v8242_v28 }
 0x17d   :  { %7556 = vmatpush3.bf16.msra.mxu0 %v8243_v29 }
 0x17e   :  { %7557 = vmatprep.subr.bf16.mxu0 %v8244_v61 }
 0x182   :  { %2549 = vmatmul.mubr.bf16.gmra.mxu1 %v8224_v12  ;;  %2654 = vmatmul.mubr.bf16.gmra.mxu0 %v6497_v20  ;;  %v8260_v12 = vld [vmem:[%s9854_s5 + $0x8] sm:$0xff]  }
 0x183   :  { %2556 = vmatprep.mubr.bf16.mxu1 %v8226_v13 }
 0x18a   :  { %2557 = vmatmul.mubr.bf16.gmra.mxu1 %v6495_v17 }
 0x18b   :  { %7909 = vmatprep.mubr.bf16.mxu1 %v8232_v18 }
 0x192   :  { %7910 = vmatmul.mubr.bf16.vlgmr.msra.gmra.mxu1 %v8233_v21  ;;  %v8262_v21 = vld [vmem:[%s9854_s5 + $0xd8] sm:$0xff]  }
 0x193   :  { %7913 = vmatprep.mubr.bf16.mxu1 %v8234_v22  ;;  %7618 = vmatpush3.bf16.msra.mxu1 %v8251_v39  ;;  %v8263_v22 = vld [vmem:[%s9854_s5 + $0x98] sm:$0xff]  }
 0x194   :  { %7619 = vmatprep.subr.bf16.mxu1 %v8253_v49 }
 0x197   :  { %7620 = vmatpush3.bf16.msra.mxu1 %v8255_v53  ;;  %v8274_v53 = vld [vmem:[%s9854_s5 + $0x178] sm:$0xff]  }
 0x198   :  { %7621 = vmatprep.subr.bf16.mxu1 %v8256_v63 }
 0x19a   :  { %7914 = vmatmul.mubr.bf16.gmra.mxu1 %v8910_v30  ;;  %v8245_v30 = vld [vmem:[%s9854_s5 + $0x28] sm:$0xff]  }
 0x19b   :  { %7917 = vmatprep.mubr.bf16.mxu1 %v8236_v23  ;;  %7558 = vmatpush3.bf16.msra.mxu0 %v8245_v30  ;;  %v8264_v30 = vld [vmem:[%s9854_s5 + $0x40] sm:$0xff]  }
 0x19c   :  { %7559 = vmatprep.subr.bf16.mxu0 %v8246_v31  ;;  %7622 = vmatpush3.bf16.msra.mxu1 %v8257_v1  ;;  %v8265_v31 = vld [vmem:[%s9854_s5 + $0xd0] sm:$0xff]  }
 0x19d   :  { %7623 = vmatprep.subr.bf16.mxu1 %v8259_v11 }
 0x19f   :  { %7560 = vmatpush3.bf16.msra.mxu0 %v8247_v32  ;;  %v8266_v32 = vld [vmem:[%s9854_s5] sm:$0xff]  }
 0x1a0   :  { %7624 = vmatpush3.bf16.msra.mxu1 %v8261_v15 }
 0x1a1   :  { %7625 = vmatprep.subr.bf16.mxu1 %v8262_v21 }
 0x1a2   :  { %7918 = vmatmul.mubr.bf16.gmra.mxu1 %v8237_v24 }
 0x1a3   :  { %7921 = vmatprep.mubr.bf16.mxu1 %v8238_v25 }
 0x1a4   :  { %7626 = vmatpush3.bf16.msra.mxu1 %v8263_v22 }
 0x1a5   :  { %7627 = vmatprep.subr.bf16.mxu1 %v8265_v31 }
 0x1aa   :  { %7922 = vmatmul.mubr.bf16.gmra.mxu1 %v8913_v33  ;;  %v8248_v33 = vld [vmem:[%s9854_s5 + $0x58] sm:$0xff]  }
 0x1ab   :  { %7561 = vmatprep.subr.bf16.mxu0 %v8248_v33 }
 0x1ac   :  { %7562 = vmatpush3.bf16.msra.mxu0 %v8249_v34 }
 0x1ad   :  { %7563 = vmatprep.subr.bf16.mxu0 %v8252_v48 }
 0x1b0   :  { %7564 = vmatpush3.bf16.msra.mxu0 %v8254_v50 }
 0x1b1   :  { %7565 = vmatprep.subr.bf16.mxu0 %v8258_v10 }
 0x1b4   :  { %7566 = vmatpush3.bf16.msra.mxu0 %v8260_v12 }
 0x1b5   :  { %7567 = vmatprep.subr.bf16.mxu0 %v8264_v30 }
 0x1b8   :  { %7568 = vmatpush3.bf16.msra.mxu0 %v8266_v32 }
 0x1b9   :  { %7681 = vmatprep.subr.bf16.mxu0 %v8274_v53 }
 0x1ba   :  { %v7297_v35 = vpop.f32.mrf.mxu1 }
 0x1bc   :  { %v7298_v46 = vpop.f32.mrf.mxu1 }
 0x1bd   :  { %v7299_v2 = vadd.f32 %v7298_v46, %v7297_v35  ;;  %v8267_v35 = vld [vmem:[%s9854_s5 + $0x90] sm:$0xff]  }
 0x1be   :  { %v7300_v36 = vpop.f32.mrf.mxu1  ;;  %7628 = vmatpush3.bf16.msra.mxu1 %v8267_v35 }
 0x1bf   :  { %v2309_v41 = vadd.f32 %v7299_v2, %v8975_v37 }
 0x1c0   :  { %v7301_v4 = vpop.f32.mrf.mxu1 }
 0x1c1   :  { %v7302_v42 = vadd.f32 %v7301_v4, %v7300_v36  ;;  %v8268_v4 = vld [vmem:[%s9854_s5 + $0xc8] sm:$0xff]  }
 0x1c2   :  { %v7361_v0 = vpop.f32.mrf.mxu0  ;;  %7629 = vmatprep.subr.bf16.mxu1 %v8268_v4 }
 0x1c3   :  { %v2312_v57 = vadd.f32 %v7302_v42, %v8975_v37 }
 0x1c4   :  { %v7362_v40 = vpop.f32.mrf.mxu0  ;;  %v7303_v45 = vpop.f32.mrf.mxu1 }
 0x1c5   :  { %v7363_v44 = vadd.f32 %v7362_v40, %v7361_v0  ;;  %v8269_v40 = vld [vmem:[%s9854_s5 + $0x88] sm:$0xff]  }
 0x1c6   :  { %v7364_v47 = vpop.f32.mrf.mxu0  ;;  %v7304_v52 = vpop.f32.mrf.mxu1  ;;  %7630 = vmatpush3.bf16.msra.mxu1 %v8269_v40 }
 0x1c7   :  { %v8993_v51 = vadd.f32 %v7363_v44, %v2309_v41  ;;  %v7305_v54 = vadd.f32 %v7304_v52, %v7303_v45  ;;  %v8273_v52 = vld [vmem:[%s9854_s5 + $0xc0] sm:$0xff]  }
 0x1c8   :  { %v7365_v55 = vpop.f32.mrf.mxu0  ;;  %v7306_v60 = vpop.f32.mrf.mxu1  ;;  %7631 = vmatprep.subr.bf16.mxu1 %v8273_v52 }
 0x1c9   :  { %v7366_v58 = vadd.f32 %v7365_v55, %v7364_v47  ;;  %v2317_v43 = vadd.f32 %v7305_v54, %v8975_v37  ;;  %v8275_v54 = vld [vmem:[%s9854_s5 + $0x80] sm:$0xff]  }
 0x1ca   :  { %v7367_v62 = vpop.f32.mrf.mxu0  ;;  %v7307_v3 = vpop.f32.mrf.mxu1  ;;  %7632 = vmatpush3.bf16.msra.mxu1 %v8275_v54 }
 0x1cb   :  { %v9005_v56 = vadd.f32 %v7366_v58, %v2312_v57  ;;  %v7308_v7 = vadd.f32 %v7307_v3, %v7306_v60 }
 0x1cc   :  { %v7368_v6 = vpop.f32.mrf.mxu0 }
 0x1cd   :  { %v7369_v59 = vadd.f32 %v7368_v6, %v7367_v62  ;;  %v2320_v18 = vadd.f32 %v7308_v7, %v8975_v37 }
 0x1ce   :  { %v7370_v9 = vpop.f32.mrf.mxu0 }
 0x1cf   :  { %v9017_v13 = vadd.f32 %v7369_v59, %v2317_v43 }
 0x1d0   :  { %v7371_v17 = vpop.f32.mrf.mxu0 }
 0x1d1   :  { %v7372_v5 = vadd.f32 %v7371_v17, %v7370_v9 }
 0x1d3   :  { %v9029_v23 = vadd.f32 %v7372_v5, %v2320_v18 }
 0x1d4   :  { %v7309_v8 = vpop.f32.mrf.mxu1  ;;  %v7373_v20 = vpop.f32.mrf.mxu0 }
 0x1d6   :  { %v7310_v14 = vpop.f32.mrf.mxu1  ;;  %v7374_v25 = vpop.f32.mrf.mxu0 }
 0x1d7   :  { %v7311_v16 = vadd.f32 %v7310_v14, %v7309_v8  ;;  %v7375_v28 = vadd.f32 %v7374_v25, %v7373_v20 }
 0x1d8   :  { %v7312_v19 = vpop.f32.mrf.mxu1  ;;  %v7376_v61 = vpop.f32.mrf.mxu0 }
 0x1d9   :  { %v2325_v26 = vadd.f32 %v7311_v16, %v8975_v37 }
 0x1da   :  { %v7313_v24 = vpop.f32.mrf.mxu1  ;;  %v7377_v2 = vpop.f32.mrf.mxu0 }
 0x1db   :  { %v7314_v27 = vadd.f32 %v7313_v24, %v7312_v19  ;;  %v9041_v33 = vadd.f32 %v7375_v28, %v2325_v26  ;;  %v7378_v0 = vadd.f32 %v7377_v2, %v7376_v61 }
 0x1dc   :  { %v7315_v29 = vpop.f32.mrf.mxu1 }
 0x1dd   :  { %v2328_v36 = vadd.f32 %v7314_v27, %v8975_v37 }
 0x1de   :  { %v7316_v34 = vpop.f32.mrf.mxu1  ;;  %v7379_v39 = vpop.f32.mrf.mxu0 }
 0x1df   :  { %v7317_v46 = vadd.f32 %v7316_v34, %v7315_v29  ;;  %v9053_v41 = vadd.f32 %v7378_v0, %v2328_v36 }
 0x1e0   :  { %v7318_v38 = vpop.f32.mrf.mxu1  ;;  %v7380_v44 = vpop.f32.mrf.mxu0 }
 0x1e1   :  { %v2333_v45 = vadd.f32 %v7317_v46, %v8975_v37  ;;  %v7381_v48 = vadd.f32 %v7380_v44, %v7379_v39 }
 0x1e2   :  { %v7319_v42 = vpop.f32.mrf.mxu1  ;;  %v7382_v50 = vpop.f32.mrf.mxu0 }
 0x1e3   :  { %v7320_v47 = vadd.f32 %v7319_v42, %v7318_v38  ;;  %v9065_v55 = vadd.f32 %v7381_v48, %v2333_v45 }
 0x1e4   :  { %v7383_v60 = vpop.f32.mrf.mxu0 }
 0x1e5   :  { %v2336_v62 = vadd.f32 %v7320_v47, %v8975_v37  ;;  %v7384_v63 = vadd.f32 %v7383_v60, %v7382_v50 }
 0x1e7   :  { %v9068_v6 = vadd.f32 %v7384_v63, %v2336_v62  ;;  %v8310_v62 = vld [vmem:[%s9854_s5 + $0x1f8] sm:$0xff]  }
 0x1e8   :  { %7745 = vmatprep.subr.bf16.mxu1 %v8310_v62 }
 0x1ea   :  { %v7385_v3 = vpop.f32.mrf.mxu0 }
 0x1ec   :  { %v7386_v7 = vpop.f32.mrf.mxu0 }
 0x1ed   :  { %v7387_v9 = vadd.f32 %v7386_v7, %v7385_v3 }
 0x1ee   :  { %v7388_v11 = vpop.f32.mrf.mxu0 }
 0x1f0   :  { %v7389_v16 = vpop.f32.mrf.mxu0 }
 0x1f1   :  { %v7390_v18 = vadd.f32 %v7389_v16, %v7388_v11 }
 0x1f2   :  { %v7321_v49 = vpop.f32.mrf.mxu1  ;;  %v7391_v19 = vpop.f32.mrf.mxu0 }
 0x1f4   :  { %v7322_v57 = vpop.f32.mrf.mxu1  ;;  %v7392_v22 = vpop.f32.mrf.mxu0 }
 0x1f5   :  { %v7323_v58 = vadd.f32 %v7322_v57, %v7321_v49  ;;  %v7393_v26 = vadd.f32 %v7392_v22, %v7391_v19 }
 0x1f6   :  { %v7324_v1 = vpop.f32.mrf.mxu1  ;;  %v7394_v28 = vpop.f32.mrf.mxu0 }
 0x1f7   :  { %v2341_v59 = vadd.f32 %v7323_v58, %v8975_v37 }
 0x1f8   :  { %v7325_v43 = vpop.f32.mrf.mxu1  ;;  %v7395_v31 = vpop.f32.mrf.mxu0 }
 0x1f9   :  { %v7326_v8 = vadd.f32 %v7325_v43, %v7324_v1  ;;  %v9071_v12 = vadd.f32 %v7387_v9, %v2341_v59  ;;  %v7396_v34 = vadd.f32 %v7395_v31, %v7394_v28 }
 0x1fa   :  { %v7327_v10 = vpop.f32.mrf.mxu1  ;;  %v7397_v46 = vpop.f32.mrf.mxu0 }
 0x1fb   :  { %9886 = vst [vmem:[#allocation9_spill] sm:$0xff] %v9071_v12  ;;  %v2344_v17 = vadd.f32 %v7326_v8, %v8975_v37 }
 0x1fc   :  { %v7328_v14 = vpop.f32.mrf.mxu1  ;;  %v7398_v0 = vpop.f32.mrf.mxu0 }
 0x1fd   :  { %v7329_v15 = vadd.f32 %v7328_v14, %v7327_v10  ;;  %v9074_v20 = vadd.f32 %v7390_v18, %v2344_v17  ;;  %v7399_v4 = vadd.f32 %v7398_v0, %v7397_v46 }
 0x1fe   :  { %v7330_v5 = vpop.f32.mrf.mxu1  ;;  %v7400_v42 = vpop.f32.mrf.mxu0 }
 0x1ff   :  { %9887 = vst [vmem:[#allocation10_spill] sm:$0xff] %v9074_v20  ;;  %v2349_v24 = vadd.f32 %v7329_v15, %v8975_v37 }
 0x200   :  { %v7331_v21 = vpop.f32.mrf.mxu1  ;;  %v7401_v48 = vpop.f32.mrf.mxu0 }
 0x201   :  { %v7332_v25 = vadd.f32 %v7331_v21, %v7330_v5  ;;  %v9077_v29 = vadd.f32 %v7393_v26, %v2349_v24  ;;  %v7402_v50 = vadd.f32 %v7401_v48, %v7400_v42 }
 0x202   :  { %v7333_v27 = vpop.f32.mrf.mxu1  ;;  %v7403_v53 = vpop.f32.mrf.mxu0 }
 0x203   :  { %9888 = vst [vmem:[#allocation11_spill] sm:$0xff] %v9077_v29  ;;  %v2352_v32 = vadd.f32 %v7332_v25, %v8975_v37 }
 0x204   :  { %v7334_v61 = vpop.f32.mrf.mxu1  ;;  %v7404_v58 = vpop.f32.mrf.mxu0 }
 0x205   :  { %v7335_v30 = vadd.f32 %v7334_v61, %v7333_v27  ;;  %v9080_v2 = vadd.f32 %v7396_v34, %v2352_v32 }
 0x206   :  { %v7336_v35 = vpop.f32.mrf.mxu1  ;;  %v9095_v63 = vpop.f32.mrf.mxu0 }
 0x207   :  { %9889 = vst [vmem:[#allocation12_spill] sm:$0xff] %v9080_v2  ;;  %v2357_v38 = vadd.f32 %v7335_v30, %v8975_v37 }
 0x208   :  { %v7337_v36 = vpop.f32.mrf.mxu1  ;;  %v9097_v3 = vpop.f32.mrf.mxu0 }
 0x209   :  { %v7338_v39 = vadd.f32 %v7337_v36, %v7336_v35  ;;  %v9083_v44 = vadd.f32 %v7399_v4, %v2357_v38 }
 0x20a   :  { %v7339_v40 = vpop.f32.mrf.mxu1  ;;  %v9099_v7 = vpop.f32.mrf.mxu0 }
 0x20b   :  { %9890 = vst [vmem:[#allocation13_spill] sm:$0xff] %v9083_v44  ;;  %v2360_v49 = vadd.f32 %v7338_v39, %v8975_v37 }
 0x20c   :  { %v7340_v45 = vpop.f32.mrf.mxu1  ;;  %v7490_v8 = vpop.f32.mrf.mxu0 }
 0x20d   :  { %v9085_v47 = vadd.f32 %v7340_v45, %v7339_v40  ;;  %v9088_v54 = vadd.f32 %v7402_v50, %v2360_v49 }
 0x20e   :  { %v7342_v52 = vpop.f32.mrf.mxu1  ;;  %v9101_v10 = vpop.f32.mrf.mxu0 }
 0x20f   :  { %9891 = vst [vmem:[#allocation14_spill] sm:$0xff] %v9088_v54 }
 0x210   :  { %v7343_v57 = vpop.f32.mrf.mxu1  ;;  %v7493_v14 = vpop.f32.mrf.mxu0 }
 0x212   :  { %v9090_v60 = vpop.f32.mrf.mxu1  ;;  %v7495_v16 = vpop.f32.mrf.mxu0 }
 0x214   :  { %v7426_v1 = vpop.f32.mrf.mxu1  ;;  %v7496_v18 = vpop.f32.mrf.mxu0 }
 0x216   :  { %v7428_v43 = vpop.f32.mrf.mxu1  ;;  %v7498_v19 = vpop.f32.mrf.mxu0 }
 0x218   :  { %v7429_v59 = vpop.f32.mrf.mxu1  ;;  %v7499_v22 = vpop.f32.mrf.mxu0 }
 0x21a   :  { %v7431_v9 = vpop.f32.mrf.mxu1  ;;  %v7501_v25 = vpop.f32.mrf.mxu0 }
 0x21c   :  { %v7432_v11 = vpop.f32.mrf.mxu1  ;;  %v7502_v27 = vpop.f32.mrf.mxu0 }
 0x21e   :  { %v7434_v15 = vpop.f32.mrf.mxu1  ;;  %v7504_v61 = vpop.f32.mrf.mxu0 }
 0x220   :  { %v7435_v17 = vpop.f32.mrf.mxu1  ;;  %v7505_v31 = vpop.f32.mrf.mxu0 }
 0x222   :  { %v7437_v5 = vpop.f32.mrf.mxu1  ;;  %v7507_v34 = vpop.f32.mrf.mxu0 }
 0x224   :  { %v7438_v21 = vpop.f32.mrf.mxu1  ;;  %v7508_v46 = vpop.f32.mrf.mxu0 }
 0x226   :  { %v7440_v24 = vpop.f32.mrf.mxu1  ;;  %v9105_v0 = vpop.f32.mrf.mxu0 }
 0x228   :  { %v7441_v26 = vpop.f32.mrf.mxu1  ;;  %v9109_v39 = vpop.f32.mrf.mxu0 }
 0x22a   :  { %v7443_v28 = vpop.f32.mrf.mxu1  ;;  %v9113_v40 = vpop.f32.mrf.mxu0 }
 0x22b   :  { %9892 = vst [vmem:[#allocation15_spill] sm:$0xff] %v9113_v40 }
 0x22c   :  { %v7444_v30 = vpop.f32.mrf.mxu1  ;;  %v9117_v45 = vpop.f32.mrf.mxu0 }
 0x22d   :  { %9893 = vst [vmem:[#allocation16_spill] sm:$0xff] %v9117_v45 }
 0x22e   :  { %v7446_v32 = vpop.f32.mrf.mxu1  ;;  %v9121_v49 = vpop.f32.mrf.mxu0 }
 0x22f   :  { %9895 = vst [vmem:[#allocation18_spill] sm:$0xff] %v9121_v49 }
 0x230   :  { %v7447_v35 = vpop.f32.mrf.mxu1  ;;  %v9125_v62 = vpop.f32.mrf.mxu0 }
 0x231   :  { %9897 = vst [vmem:[#allocation20_spill] sm:$0xff] %v9125_v62 }
 0x232   :  { %v9103_v36 = vpop.f32.mrf.mxu1  ;;  %v9129_v44 = vpop.f32.mrf.mxu0 }
 0x233   :  { %9899 = vst [vmem:[#allocation22_spill] sm:$0xff] %v9129_v44  ;;  %v7405_v44 = vadd.f32 %v7404_v58, %v7403_v53  ;;  %v7491_v53 = vadd.f32 %v7490_v8, %v9099_v7  ;;  %v7436_v58 = vadd.f32 %v7435_v17, %v7434_v15  ;;  %v7448_v7 = vadd.f32 %v7447_v35, %v7446_v32 }
 0x234   :  { %v9107_v38 = vpop.f32.mrf.mxu1  ;;  %v9133_v29 = vpop.f32.mrf.mxu0 }
 0x235   :  { %9901 = vst [vmem:[#allocation24_spill] sm:$0xff] %v9133_v29 }
 0x236   :  { %v9111_v4 = vpop.f32.mrf.mxu1  ;;  %v9137_v12 = vpop.f32.mrf.mxu0 }
 0x237   :  { %9903 = vst [vmem:[#allocation26_spill] sm:$0xff] %v9137_v12  ;;  %v7427_v12 = vadd.f32 %v7426_v1, %v9090_v60  ;;  %v7494_v60 = vadd.f32 %v7493_v14, %v9101_v10  ;;  %v7442_v1 = vadd.f32 %v7441_v26, %v7440_v24 }
 0x238   :  { %v9115_v42 = vpop.f32.mrf.mxu1 }
 0x23a   :  { %v9119_v48 = vpop.f32.mrf.mxu1 }
 0x23b   :  { %9894 = vst [vmem:[#allocation17_spill] sm:$0xff] %v9119_v48  ;;  %v9141_v48 = vpop.f32.mrf.mxu0 }
 0x23c   :  { %v9123_v50 = vpop.f32.mrf.mxu1  ;;  %9905 = vst [vmem:[#allocation28_spill] sm:$0xff] %v9141_v48 }
 0x23d   :  { %9896 = vst [vmem:[#allocation19_spill] sm:$0xff] %v9123_v50  ;;  %v9147_v62 = vpop.f32.mrf.mxu0 }
 0x23e   :  { %v9127_v54 = vpop.f32.mrf.mxu1  ;;  %9908 = vst [vmem:[#allocation31_spill] sm:$0xff] %v9147_v62  ;;  %v7430_v62 = vadd.f32 %v7429_v59, %v7428_v43  ;;  %v7509_v59 = vadd.f32 %v7508_v46, %v7507_v34 }
 0x23f   :  { %9898 = vst [vmem:[#allocation21_spill] sm:$0xff] %v9127_v54  ;;  %v7344_v54 = vadd.f32 %v7343_v57, %v7342_v52  ;;  %v9156_v48 = vpop.f32.mrf.mxu0 }
 0x240   :  { %v9131_v2 = vpop.f32.mrf.mxu1 }
 0x241   :  { %9900 = vst [vmem:[#allocation23_spill] sm:$0xff] %v9131_v2  ;;  %v7433_v2 = vadd.f32 %v7432_v11, %v7431_v9  ;;  %v7408_v9 = vadd.f32 %v9097_v3, %v9095_v63  ;;  %v7445_v11 = vadd.f32 %v7444_v30, %v7443_v28  ;;  %v2514_v63 = vadd.f32 %v7436_v58, %v9029_v23  ;;  %v9909_v30 = vld [vmem:[#allocation15_spill] sm:$0xff] }
 0x242   :  { %v9135_v20 = vpop.f32.mrf.mxu1  ;;  %v2530_v23 = vadd.f32 %v7448_v7, %v9068_v6  ;;  %v9911_v32 = vld [vmem:[#allocation17_spill] sm:$0xff] }
 0x243   :  { %9902 = vst [vmem:[#allocation25_spill] sm:$0xff] %v9135_v20  ;;  %v2365_v20 = vadd.f32 %v9085_v47, %v8975_v37  ;;  %v2511_v57 = vadd.f32 %v7433_v2, %v9017_v13  ;;  %v7439_v47 = vadd.f32 %v7438_v21, %v7437_v5  ;;  %v2506_v13 = vadd.f32 %v7430_v62, %v9005_v56  ;;  %v9916_v62 = vld [vmem:[#allocation20_spill] sm:$0xff] }
 0x244   :  { %v9139_v45 = vpop.f32.mrf.mxu1  ;;  %v7506_v2 = vadd.f32 %v7505_v31, %v7504_v61  ;;  %v7512_v61 = vadd.f32 %v9109_v39, %v9105_v0  ;;  %v9910_v31 = vld [vmem:[#allocation16_spill] sm:$0xff]  ;;  %v9912_v34 = vld [vmem:[#allocation19_spill] sm:$0xff]  ;;  %v9917_v0 = vld [vmem:[#allocation9_spill] sm:$0xff] }
 0x245   :  { %9904 = vst [vmem:[#allocation27_spill] sm:$0xff] %v9139_v45  ;;  %v7497_v45 = vadd.f32 %v7496_v18, %v7495_v16  ;;  %v2519_v3 = vadd.f32 %v7439_v47, %v9041_v33  ;;  %v2603_v18 = vadd.f32 %v7494_v60, %v2506_v13  ;;  %v7451_v33 = vadd.f32 %v9107_v38, %v9103_v36  ;;  %v9918_v47 = vld [vmem:[#allocation22_spill] sm:$0xff] }
 0x246   :  { %v9143_v49 = vpop.f32.mrf.mxu1  ;;  %v7515_v6 = vadd.f32 %v9910_v31, %v9909_v30  ;;  %v7457_v35 = vadd.f32 %v9912_v34, %v9911_v32  ;;  %v9913_v46 = vld [vmem:[#allocation21_spill] sm:$0xff] }
 0x247   :  { %9906 = vst [vmem:[#allocation29_spill] sm:$0xff] %v9143_v49  ;;  %v2368_v49 = vadd.f32 %v7344_v54, %v8975_v37  ;;  %v2503_v37 = vadd.f32 %v7427_v12, %v8993_v51  ;;  %v9171_v54 = vpop.f32.mrf.mxu0  ;;  %v2608_v43 = vadd.f32 %v7497_v45, %v2511_v57  ;;  %v2522_v51 = vadd.f32 %v7442_v1, %v9053_v41 }
 0x248   :  { %v9145_v50 = vpop.f32.mrf.mxu1  ;;  %v2527_v12 = vadd.f32 %v7445_v11, %v9065_v55  ;;  %v7454_v41 = vadd.f32 %v9115_v42, %v9111_v4  ;;  %v9914_v36 = vld [vmem:[#allocation23_spill] sm:$0xff]  ;;  %v2535_v39 = vadd.f32 %v7451_v33, %v9917_v0 }
 0x249   :  { %9907 = vst [vmem:[#allocation30_spill] sm:$0xff] %v9145_v50  ;;  %v9159_v50 = vadd.f32 %v7405_v44, %v2365_v20  ;;  %v7500_v20 = vadd.f32 %v7499_v22, %v7498_v19  ;;  %v7503_v44 = vadd.f32 %v7502_v27, %v7501_v25  ;;  %v2600_v14 = vadd.f32 %v7491_v53, %v2503_v37  ;;  %v9180_v5 = vpop.f32.mrf.mxu0 }
 0x24a   :  { %v9149_v40 = vpop.f32.mrf.mxu1  ;;  %v9176_v15 = vadd.f32 %v7408_v9, %v2368_v49  ;;  %v2624_v25 = vadd.f32 %v7509_v59, %v2527_v12  ;;  %v9185_v26 = vadd.f32 %v7506_v2, %v2522_v51  ;;  %v7460_v38 = vadd.f32 %v9914_v36, %v9913_v46  ;;  %v9915_v49 = vld [vmem:[#allocation18_spill] sm:$0xff]  ;;  %v9919_v9 = vld [vmem:[#allocation24_spill] sm:$0xff]  ;;  %v9920_v1 = vld [vmem:[#allocation25_spill] sm:$0xff] }
 0x24b   :  { %v2611_v21 = vadd.f32 %v7500_v20, %v2514_v63  ;;  %v2616_v22 = vadd.f32 %v7503_v44, %v2519_v3  ;;  %v7518_v4 = vadd.f32 %v9916_v62, %v9915_v49  ;;  %v9199_v42 = vpop.f32.mrf.mxu0  ;;  %v7521_v60 = vadd.f32 %v9919_v9, %v9918_v47  ;;  %v9922_v20 = vld [vmem:[#allocation26_spill] sm:$0xff]  ;;  %v9923_v44 = vld [vmem:[#allocation28_spill] sm:$0xff]  ;;  %v9925_v3 = vld [vmem:[#allocation11_spill] sm:$0xff] }
 0x24c   :  { %v9153_v29 = vpop.f32.mrf.mxu1  ;;  %v9921_v11 = vld [vmem:[#allocation27_spill] sm:$0xff]  ;;  %v9924_v2 = vld [vmem:[#allocation10_spill] sm:$0xff] }
 0x24d   :  { %v7463_v37 = vadd.f32 %v9921_v11, %v9920_v1  ;;  %v2538_v7 = vadd.f32 %v7454_v41, %v9924_v2  ;;  %v9927_v41 = vld [vmem:[#allocation13_spill] sm:$0xff] }
 0x24e   :  { %v9161_v52 = vpop.f32.mrf.mxu1 }
 0x24f   :  { %v9213_v33 = vadd.f32 %v7518_v4, %v2538_v7 }
 0x250   :  { %v9168_v16 = vpop.f32.mrf.mxu1 }
 0x252   :  { %v7911_v8 = vpop.f32.mrf.mxu1 }
 0x253   :  { %v2705_v10 = vadd.f32 %v7911_v8, %v2608_v43  ;;  %v7524_v43 = vadd.f32 %v9923_v44, %v9922_v20 }
 0x254   :  { %v2696_v17 = vpop.f32.mrf.mxu1 }
 0x255   :  { %v2761_v56 = vmax.f32 %v2705_v10, 0.0  ;;  %v2697_v19 = vadd.f32 %v2696_v17, %v2600_v14  ;;  %v2543_v10 = vadd.f32 %v7457_v35, %v9925_v3  ;;  %v9926_v14 = vld [vmem:[#allocation12_spill] sm:$0xff]  ;;  %v2627_v17 = vadd.f32 %v7512_v61, %v2530_v23 }
 0x256   :  { %v7912_v24 = vpop.f32.mrf.mxu1  ;;  %v2546_v51 = vadd.f32 %v7460_v38, %v9926_v14  ;;  %v7469_v38 = vadd.f32 %v9153_v29, %v9149_v40  ;;  %v9930_v29 = vld [vmem:[#allocation31_spill] sm:$0xff] }
 0x257   :  { %2777 = vst [vmem:[#allocation2 + $0x50] sm:$0xff] %v2761_v56  ;;  %v2759_v55 = vmax.f32 %v2697_v19, 0.0  ;;  %v2708_v27 = vadd.f32 %v7912_v24, %v2611_v21  ;;  %v7067_v28 = vpack.c.bf16 %v2761_v56, %v2761_v56  ;;  %v7532_v56 = vpop.f32.mrf.mxu0  ;;  %v2640_v31 = vadd.f32 %v7521_v60, %v2543_v10 }
 0x258   :  { %v2699_v45 = vpop.f32.mrf.mxu1  ;;  %v9222_v23 = vadd.f32 %v7524_v43, %v2546_v51  ;;  %v9231_v40 = vadd.f32 %v9156_v48, %v9930_v29  ;;  %v7533_v1 = vadd.f32 %v7532_v56, %v9199_v42 }
 0x259   :  { %2775 = vst [vmem:[#allocation2 + $0x20] sm:$0xff] %v2759_v55  ;;  %v2762_v53 = vmax.f32 %v2708_v27, 0.0  ;;  %v2700_v57 = vadd.f32 %v2699_v45, %v2603_v18  ;;  %v7065_v58 = vpack.c.bf16 %v2759_v55, %v2759_v55  ;;  %2970 = vst [vmem:[#allocation3 + $0x70] sm:$0xf] %v7067_v28  ;;  %v9211_v18 = vadd.f32 %v7515_v6, %v2535_v39  ;;  %v9928_v55 = vld [vmem:[#allocation29_spill] sm:$0xff]  ;;  %v9929_v27 = vld [vmem:[#allocation30_spill] sm:$0xff]  ;;  %v9226_v0 = vpop.f32.mrf.mxu0 }
 0x25a   :  { %v7915_v13 = vpop.f32.mrf.mxu1  ;;  %v9220_v28 = vadd.f32 %v9929_v27, %v9928_v55 }
 0x25b   :  { %2778 = vst [vmem:[#allocation2 + $0x68] sm:$0xff] %v2762_v53  ;;  %v2760_v59 = vmax.f32 %v2700_v57, 0.0  ;;  %v2721_v8 = vadd.f32 %v7915_v13, %v2624_v25  ;;  %2968 = vst [vmem:[#allocation3 + $0x28] sm:$0xf] %v7065_v58  ;;  %v7068_v63 = vpack.c.bf16 %v2762_v53, %v2762_v53  ;;  %v9216_v25 = vadd.f32 %v7463_v37, %v9927_v41 }
 0x25c   :  { %v2712_v12 = vpop.f32.mrf.mxu1 }
 0x25d   :  { %2776 = vst [vmem:[#allocation2 + $0x38] sm:$0xff] %v2760_v59  ;;  %v2765_v19 = vmax.f32 %v2721_v8, 0.0  ;;  %v2713_v21 = vadd.f32 %v2712_v12, %v2616_v22  ;;  %v7066_v24 = vpack.c.bf16 %v2760_v59, %v2760_v59  ;;  %2971 = vst [vmem:[#allocation3 + $0x94] sm:$0xf] %v7068_v63  ;;  %v2559_v59 = vadd.f32 %v7469_v38, %v9159_v50 }
 0x25e   :  { %v7916_v30 = vpop.f32.mrf.mxu1  ;;  %v2794_v61 = vld [vmem:[#allocation2 + $0x4f] sm:$0xff]  ;;  %v9237_v8 = vadd.f32 %v9168_v16, %v9161_v52 }
 0x25f   :  { %v2986_v6 = vld [vmem:[#allocation2 + $0x51] sm:$0xff]  ;;  %2781 = vst [vmem:[#allocation2 + $0xb0] sm:$0xff] %v2765_v19  ;;  %v2763_v22 = vmax.f32 %v2713_v21, 0.0  ;;  %v2724_v34 = vadd.f32 %v7916_v30, %v2627_v17  ;;  %v7051_v35 = vpack.c.bf16 %v2794_v61, %v2794_v61  ;;  %2969 = vst [vmem:[#allocation3 + $0x4c] sm:$0xf] %v7066_v24  ;;  %v7071_v4 = vpack.c.bf16 %v2765_v19, %v2765_v19  ;;  %v7535_v17 = vpop.f32.mrf.mxu0 }
 0x260   :  { %v3464_v32 = vld [vmem:[#allocation2 + $0x50] sm:$0xff]  ;;  %v7083_v46 = vpack.c.bf16 %v2986_v6, %v2986_v6  ;;  %3256 = vst [vmem:[#allocation3 + $0x34] sm:$0xf] %v7066_v24  ;;  %v2715_v45 = vpop.f32.mrf.mxu1  ;;  %v2792_v49 = vld [vmem:[#allocation2 + $0x1f] sm:$0xff]  ;;  %v2656_v16 = vadd.f32 %v7533_v1, %v2559_v59 }
 0x261   :  { %v3560_v36 = vld [vmem:[#allocation2 + $0x51] sm:$0xff]  ;;  %v2984_v62 = vld [vmem:[#allocation2 + $0x21] sm:$0xff]  ;;  %v7161_v57 = vpack.c.bf16 %v3464_v32, %v3464_v32  ;;  %2779 = vst [vmem:[#allocation2 + $0x80] sm:$0xff] %v2763_v22  ;;  %v2766_v39 = vmax.f32 %v2724_v34, 0.0  ;;  %v2716_v47 = vadd.f32 %v2715_v45, %v9185_v26  ;;  %v7049_v9 = vpack.c.bf16 %v2792_v49, %v2792_v49  ;;  %2874 = vst [vmem:[#allocation3 + $0x6c] sm:$0xf] %v7051_v35 }
 0x262   :  { %v3175_v53 = vld [vmem:[#allocation2 + $0x20] sm:$0xff]  ;;  %v7177_v58 = vpack.c.bf16 %v3560_v36, %v3560_v36  ;;  %v7081_v60 = vpack.c.bf16 %v2984_v62, %v2984_v62  ;;  %3066 = vst [vmem:[#allocation3 + $0x74] sm:$0xf] %v7083_v46  ;;  %3161 = vst [vmem:[#allocation3 + $0x54] sm:$0xf] %v7051_v35  ;;  %v7919_v11 = vpop.f32.mrf.mxu1  ;;  %v7069_v20 = vpack.c.bf16 %v2763_v22, %v2763_v22  ;;  %v2987_v44 = vld [vmem:[#allocation2 + $0x69] sm:$0xff] }
 0x263   :  { %3448 = vst [vmem:[#allocation3 + $0x3c] sm:$0xf] %v7051_v35  ;;  %3353 = vst [vmem:[#allocation3 + $0x5c] sm:$0xf] %v7083_v46  ;;  %v3082_v37 = vld [vmem:[#allocation2 + $0x67] sm:$0xff]  ;;  %v7112_v43 = vpack.c.bf16 %v3175_v53, %v3175_v53  ;;  %v2764_v13 = vmax.f32 %v2716_v47, 0.0  ;;  %v2737_v2 = vadd.f32 %v7919_v11, %v2640_v31  ;;  %v7084_v7 = vpack.c.bf16 %v2987_v44, %v2987_v44 }
 0x264   :  { %2974 = vst [vmem:[#allocation3 + $0x100] sm:$0xf] %v7071_v4  ;;  %3544 = vst [vmem:[#allocation3 + $0x40] sm:$0xf] %v7161_v57  ;;  %v3178_v26 = vld [vmem:[#allocation2 + $0x68] sm:$0xff]  ;;  %v7099_v48 = vpack.c.bf16 %v3082_v37, %v3082_v37  ;;  %v2728_v63 = vpop.f32.mrf.mxu1  ;;  %v2793_v3 = vld [vmem:[#allocation2 + $0x37] sm:$0xff]  ;;  %v7536_v35 = vadd.f32 %v7535_v17, %v9226_v0  ;;  %v2562_v47 = vadd.f32 %v9237_v8, %v9176_v15 }
 0x265   :  { %3257 = vst [vmem:[#allocation3 + $0x58] sm:$0xf] %v7161_v57  ;;  %3640 = vst [vmem:[#allocation3 + $0x44] sm:$0xf] %v7177_v58  ;;  %v3561_v42 = vld [vmem:[#allocation2 + $0x69] sm:$0xff]  ;;  %v2985_v10 = vld [vmem:[#allocation2 + $0x39] sm:$0xff]  ;;  %v7115_v51 = vpack.c.bf16 %v3178_v26, %v3178_v26  ;;  %v2729_v19 = vadd.f32 %v2728_v63, %v9211_v18  ;;  %v7050_v21 = vpack.c.bf16 %v2793_v3, %v2793_v3 }
 0x266   :  { %2782 = vst [vmem:[#allocation2 + $0xc8] sm:$0xff] %v2766_v39  ;;  %2872 = vst [vmem:[#allocation3 + $0x24] sm:$0xf] %v7049_v9  ;;  %v3463_v14 = vld [vmem:[#allocation2 + $0x38] sm:$0xff]  ;;  %v7178_v12 = vpack.c.bf16 %v3561_v42, %v3561_v42  ;;  %v2769_v56 = vmax.f32 %v2737_v2, 0.0  ;;  %v7082_v24 = vpack.c.bf16 %v2985_v10, %v2985_v10  ;;  %v7920_v52 = vpop.f32.mrf.mxu1  ;;  %v2798_v41 = vld [vmem:[#allocation2 + $0xaf] sm:$0xff]  ;;  %v7070_v55 = vpack.c.bf16 %v2764_v13, %v2764_v13 }
 0x267   :  { %3064 = vst [vmem:[#allocation3 + $0x2c] sm:$0xf] %v7081_v60  ;;  %3159 = vst [vmem:[#allocation3 + $0xc] sm:$0xf] %v7049_v9  ;;  %v3559_v50 = vld [vmem:[#allocation2 + $0x39] sm:$0xff]  ;;  %v2990_v27 = vld [vmem:[#allocation2 + $0xb1] sm:$0xff]  ;;  %v7160_v30 = vpack.c.bf16 %v3463_v14, %v3463_v14  ;;  %v2740_v6 = vadd.f32 %v7920_v52, %v9222_v23  ;;  %v7055_v32 = vpack.c.bf16 %v2798_v41, %v2798_v41 }
 0x268   :  { %3351 = vst [vmem:[#allocation3 + $0x14] sm:$0xf] %v7081_v60  ;;  %2972 = vst [vmem:[#allocation3 + $0xb8] sm:$0xf] %v7069_v20  ;;  %v3468_v31 = vld [vmem:[#allocation2 + $0xb0] sm:$0xff]  ;;  %v7176_v61 = vpack.c.bf16 %v3559_v50, %v3559_v50  ;;  %v2767_v18 = vmax.f32 %v2729_v19, 0.0  ;;  %v7087_v22 = vpack.c.bf16 %v2990_v27, %v2990_v27  ;;  %v2731_v46 = vpop.f32.mrf.mxu1  ;;  %v7075_v49 = vpack.c.bf16 %v2769_v56, %v2769_v56 }
 0x269   :  { %3255 = vst [vmem:[#allocation3 + $0x10] sm:$0xf] %v7112_v43  ;;  %2780 = vst [vmem:[#allocation2 + $0x98] sm:$0xff] %v2764_v13  ;;  %v3564_v34 = vld [vmem:[#allocation2 + $0xb1] sm:$0xff]  ;;  %v2796_v38 = vld [vmem:[#allocation2 + $0x7f] sm:$0xff]  ;;  %v7165_v23 = vpack.c.bf16 %v3468_v31, %v3468_v31  ;;  %v2770_v4 = vmax.f32 %v2740_v6, 0.0  ;;  %v2732_v53 = vadd.f32 %v2731_v46, %v9213_v33  ;;  %v2648_v60 = vadd.f32 %v9231_v40, %v9216_v25 }
 0x26a   :  { %3162 = vst [vmem:[#allocation3 + $0x78] sm:$0xf] %v7099_v48  ;;  %2875 = vst [vmem:[#allocation3 + $0x90] sm:$0xf] %v7099_v48  ;;  %v8276_v36 = vld [vmem:[%s9854_s5 + $0x138] sm:$0xff]   ;;  %v2988_v45 = vld [vmem:[#allocation2 + $0x81] sm:$0xff]  ;;  %v7181_v62 = vpack.c.bf16 %v3564_v34, %v3564_v34  ;;  %v7053_v58 = vpack.c.bf16 %v2796_v38, %v2796_v38  ;;  %v7923_v9 = vpop.f32.mrf.mxu1  ;;  %v7073_v1 = vpack.c.bf16 %v2767_v18, %v2767_v18 }
 0x26b   :  { %3067 = vst [vmem:[#allocation3 + $0x98] sm:$0xf] %v7084_v7  ;;  %3354 = vst [vmem:[#allocation3 + $0x80] sm:$0xf] %v7084_v7  ;;  %v8284_v57 = vld [vmem:[%s9854_s5 + $0x170] sm:$0xff]   ;;  %v7085_v0 = vpack.c.bf16 %v2988_v45, %v2988_v45  ;;  %v3466_v39 = vld [vmem:[#allocation2 + $0x80] sm:$0xff]  ;;  %v7530_v37 = vadd.f32 %v9180_v5, %v9171_v54  ;;  %v2753_v44 = vadd.f32 %v7923_v9, %v2656_v16 }
 0x26c   :  { %3449 = vst [vmem:[#allocation3 + $0x60] sm:$0xf] %v7099_v48  ;;  %3258 = vst [vmem:[#allocation3 + $0x7c] sm:$0xf] %v7115_v51  ;;  %v8272_v29 = vld [vmem:[#allocation3 + $0x4] ss:$36 sps:$4 sm:$0xff]   ;;  %v7163_v11 = vpack.c.bf16 %v3466_v39, %v3466_v39  ;;  %v7076_v43 = vpack.c.bf16 %v2770_v4, %v2770_v4  ;;  %v2744_v26 = vpop.f32.mrf.mxu1  ;;  %v2659_v13 = vadd.f32 %v7536_v35, %v2562_v47 }
 0x26d   :  { %3545 = vst [vmem:[#allocation3 + $0x64] sm:$0xf] %v7115_v51  ;;  %3641 = vst [vmem:[#allocation3 + $0x68] sm:$0xf] %v7178_v12  ;;  %v8270_v33 = vld [vmem:[#allocation3] ss:$36 sps:$4 sm:$0xff]   ;;  %4718 = vmatprep.mubr.bf16.mxu0 %v8272_v29  ;;  %v2745_v7 = vadd.f32 %v2744_v26, %v2648_v60 }
 0x26e   :  { %2785 = vst [vmem:[#allocation2 + $0x140] sm:$0xff] %v2769_v56  ;;  %2873 = vst [vmem:[#allocation3 + $0x48] sm:$0xf] %v7050_v21  ;;  %v2768_v20 = vmax.f32 %v2732_v53, 0.0  ;;  %v3086_v15 = vld [vmem:[#allocation2 + $0xc7] sm:$0xff]  ;;  %v8287_v54 = vld [vmem:[%s9854_s5 + $0x130] sm:$0xff]   ;;  %4719 = vmatmul.mubr.bf16.vlgmr.msra.gmra.mxu0 %v8270_v33  ;;  %v7924_v63 = vpop.f32.mrf.mxu1 }
 0x26f   :  { %3160 = vst [vmem:[#allocation3 + $0x30] sm:$0xf] %v7050_v21  ;;  %3065 = vst [vmem:[#allocation3 + $0x50] sm:$0xf] %v7082_v24  ;;  %v9931_v25 = vld [vmem:[#allocation14_spill] sm:$0xff]  ;;  %v7103_v2 = vpack.c.bf16 %v3086_v15, %v3086_v15  ;;  %v2773_v48 = vmax.f32 %v2753_v44, 0.0  ;;  %7682 = vmatpush3.bf16.msra.mxu0 %v8276_v36  ;;  %v2756_v12 = vadd.f32 %v7924_v63, %v2659_v13 }
 0x270   :  { %3352 = vst [vmem:[#allocation3 + $0x38] sm:$0xf] %v7082_v24  ;;  %3447 = vst [vmem:[#allocation3 + $0x18] sm:$0xf] %v7050_v21  ;;  %v2554_v40 = vadd.f32 %v9220_v28, %v9931_v25  ;;  %v3084_v5 = vld [vmem:[#allocation2 + $0x97] sm:$0xff]  ;;  %v8291_v28 = vld [vmem:[%s9854_s5 + $0x168] sm:$0xff]   ;;  %v7074_v8 = vpack.c.bf16 %v2768_v20, %v2768_v20  ;;  %7683 = vmatprep.subr.bf16.mxu0 %v8284_v57  ;;  %v2747_v24 = vpop.f32.mrf.mxu1 }
 0x271   :  { %2973 = vst [vmem:[#allocation3 + $0xdc] sm:$0xf] %v7070_v55  ;;  %3543 = vst [vmem:[#allocation3 + $0x1c] sm:$0xf] %v7160_v30  ;;  %v7101_v42 = vpack.c.bf16 %v3084_v5, %v3084_v5  ;;  %v2989_v59 = vld [vmem:[#allocation2 + $0x99] sm:$0xff]  ;;  %v2771_v51 = vmax.f32 %v2745_v7, 0.0  ;;  %v7079_v21 = vpack.c.bf16 %v2773_v48, %v2773_v48 }
 0x272   :  { %3639 = vst [vmem:[#allocation3 + $0x20] sm:$0xf] %v7176_v61  ;;  %2783 = vst [vmem:[#allocation2 + $0x110] sm:$0xff] %v2767_v18  ;;  %v8277_v3 = vld [vmem:[#allocation3 + $0x4c] ss:$36 sps:$4 sm:$0xff]   ;;  %v7086_v10 = vpack.c.bf16 %v2989_v59, %v2989_v59  ;;  %v8313_v14 = vld [vmem:[%s9854_s5 + $0x1b8] sm:$0xff]   ;;  %v2651_v17 = vadd.f32 %v7530_v37, %v2554_v40 }
 0x273   :  { %2878 = vst [vmem:[#allocation3 + $0xfc] sm:$0xf] %v7055_v32  ;;  %3070 = vst [vmem:[#allocation3 + $0x104] sm:$0xf] %v7087_v22  ;;  %v8279_v56 = vld [vmem:[#allocation3 + $0x8] ss:$36 sps:$4 sm:$0xff]   ;;  %4726 = vmatprep.mubr.bf16.mxu0 %v8277_v3  ;;  %v7077_v6 = vpack.c.bf16 %v2771_v51, %v2771_v51  ;;  %7684 = vmatpush3.bf16.msra.mxu0 %v8287_v54 }
 0x274   :  { %3165 = vst [vmem:[#allocation3 + $0xe4] sm:$0xf] %v7055_v32  ;;  %3452 = vst [vmem:[#allocation3 + $0xcc] sm:$0xf] %v7055_v32  ;;  %v8282_v52 = vld [vmem:[#allocation3 + $0x54] ss:$36 sps:$4 sm:$0xff]   ;;  %v2748_v27 = vadd.f32 %v2747_v24, %v2651_v17  ;;  %7685 = vmatprep.subr.bf16.mxu0 %v8291_v28 }
 0x275   :  { %3357 = vst [vmem:[#allocation3 + $0xec] sm:$0xf] %v7087_v22  ;;  %2978 = vst [vmem:[#allocation3 + $0x190] sm:$0xf] %v7075_v49  ;;  %v3665_v50 = vld [vmem:[#allocation3 + $0x48] sm:$0xff]  ;;  %v8315_v41 = vld [vmem:[%s9854_s5 + $0x1f0] sm:$0xff]  }
 0x276   :  { %3548 = vst [vmem:[#allocation3 + $0xd0] sm:$0xf] %v7165_v23  ;;  %3261 = vst [vmem:[#allocation3 + $0xe8] sm:$0xf] %v7165_v23  ;;  %v8281_v19 = vld [vmem:[#allocation3 + $0xc] ss:$36 sps:$4 sm:$0xff]  }
 0x277   :  { %3644 = vst [vmem:[#allocation3 + $0xd4] sm:$0xf] %v7181_v62  ;;  %2786 = vst [vmem:[#allocation2 + $0x158] sm:$0xff] %v2770_v4  ;;  %v8294_v16 = vld [vmem:[%s9854_s5 + $0x128] sm:$0xff]   ;;  %v2774_v55 = vmax.f32 %v2756_v12, 0.0  ;;  %4815 = vmatprep.mubr.bf16.mxu1 %v8281_v19  ;;  %v8298_v30 = vld [vmem:[%s9854_s5 + $0x160] sm:$0xff]  }
 0x278   :  { %2876 = vst [vmem:[#allocation3 + $0xb4] sm:$0xf] %v7053_v58  ;;  %3068 = vst [vmem:[#allocation3 + $0xbc] sm:$0xf] %v7085_v0  ;;  %v2802_v18 = vld [vmem:[#allocation2 + $0x13f] sm:$0xff]  ;;  %v3670_v32 = vld [vmem:[#allocation3 + $0x6c] sm:$0xff]  ;;  %4816 = vmatmul.mubr.bf16.vlgmr.msra.gmra.mxu1 %v8279_v56  ;;  %7686 = vmatpush3.bf16.msra.mxu0 %v8294_v16 }
 0x279   :  { %3163 = vst [vmem:[#allocation3 + $0x9c] sm:$0xf] %v7053_v58  ;;  %3450 = vst [vmem:[#allocation3 + $0x84] sm:$0xf] %v7053_v58  ;;  %v2800_v31 = vld [vmem:[#allocation2 + $0x10f] sm:$0xff]  ;;  %v7059_v46 = vpack.c.bf16 %v2802_v18, %v2802_v18  ;;  %v2772_v38 = vmax.f32 %v2748_v27, 0.0  ;;  %4823 = vmatprep.mubr.bf16.mxu1 %v8282_v52  ;;  %v6726_v45 = vcombine.low %v3665_v50, %v3670_v32  ;;  %7746 = vmatpush3.bf16.msra.mxu1 %v8313_v14 }
 0x27a   :  { %3355 = vst [vmem:[#allocation3 + $0xa4] sm:$0xf] %v7085_v0  ;;  %2976 = vst [vmem:[#allocation3 + $0x148] sm:$0xf] %v7073_v1  ;;  %v2992_v61 = vld [vmem:[#allocation2 + $0x111] sm:$0xff]  ;;  %v7057_v34 = vpack.c.bf16 %v2800_v31, %v2800_v31  ;;  %v2994_v49 = vld [vmem:[#allocation2 + $0x141] sm:$0xff]  ;;  %7747 = vmatprep.subr.bf16.mxu1 %v8315_v41  ;;  %7687 = vmatprep.subr.bf16.mxu0 %v8298_v30 }
 0x27b   :  { %3546 = vst [vmem:[#allocation3 + $0x88] sm:$0xf] %v7163_v11  ;;  %3259 = vst [vmem:[#allocation3 + $0xa0] sm:$0xf] %v7163_v11  ;;  %v8285_v22 = vld [vmem:[#allocation3 + $0x94] ss:$36 sps:$4 sm:$0xff]   ;;  %v7089_v35 = vpack.c.bf16 %v2992_v61, %v2992_v61  ;;  %v7091_v57 = vpack.c.bf16 %v2994_v49, %v2994_v49  ;;  %4727 = vmatmul.mubr.bf16.gmra.mxu0 %v6726_v45  ;;  %v7078_v33 = vpack.c.bf16 %v2772_v38, %v2772_v38 }
 0x27c   :  { %2784 = vst [vmem:[#allocation2 + $0x128] sm:$0xff] %v2768_v20  ;;  %2979 = vst [vmem:[#allocation3 + $0x1b4] sm:$0xf] %v7076_v43  ;;  %v8319_v36 = vld [vmem:[%s9854_s5 + $0x1b0] sm:$0xff]   ;;  %v8301_v39 = vld [vmem:[%s9854_s5 + $0x120] sm:$0xff]   ;;  %4734 = vmatprep.mubr.bf16.mxu0 %v8285_v22 }
 0x27d   :  { %3166 = vst [vmem:[#allocation3 + $0x108] sm:$0xf] %v7103_v2  ;;  %3453 = vst [vmem:[#allocation3 + $0xf0] sm:$0xf] %v7103_v2  ;;  %v8321_v60 = vld [vmem:[%s9854_s5 + $0x1e8] sm:$0xff]   ;;  %v8305_v29 = vld [vmem:[%s9854_s5 + $0x158] sm:$0xff]   ;;  %7748 = vmatpush3.bf16.msra.mxu1 %v8319_v36  ;;  %7688 = vmatpush3.bf16.msra.mxu0 %v8301_v39 }
 0x27e   :  { %2789 = vst [vmem:[#allocation2 + $0x1a0] sm:$0xff] %v2773_v48  ;;  %3164 = vst [vmem:[#allocation3 + $0xc0] sm:$0xf] %v7101_v42  ;;  %v3090_v23 = vld [vmem:[#allocation2 + $0x157] sm:$0xff]  ;;  %v8324_v1 = vld [vmem:[%s9854_s5 + $0x1a8] sm:$0xff]   ;;  %7749 = vmatprep.subr.bf16.mxu1 %v8321_v60  ;;  %7689 = vmatprep.subr.bf16.mxu0 %v8305_v29 }
 0x27f   :  { %2877 = vst [vmem:[#allocation3 + $0xd8] sm:$0xf] %v7101_v42  ;;  %2977 = vst [vmem:[#allocation3 + $0x16c] sm:$0xf] %v7074_v8  ;;  %v2995_v62 = vld [vmem:[#allocation2 + $0x159] sm:$0xff]  ;;  %v7107_v58 = vpack.c.bf16 %v3090_v23, %v3090_v23  ;;  %v3675_v54 = vld [vmem:[#allocation3 + $0x90] sm:$0xff] }
 0x280   :  { %3451 = vst [vmem:[#allocation3 + $0xa8] sm:$0xf] %v7101_v42  ;;  %3069 = vst [vmem:[#allocation3 + $0xe0] sm:$0xf] %v7086_v10  ;;  %v7092_v0 = vpack.c.bf16 %v2995_v62, %v2995_v62  ;;  %v8288_v11 = vld [vmem:[#allocation3 + $0x50] ss:$36 sps:$4 sm:$0xff]  }
 0x281   :  { %3356 = vst [vmem:[#allocation3 + $0xc8] sm:$0xf] %v7086_v10  ;;  %2787 = vst [vmem:[#allocation2 + $0x170] sm:$0xff] %v2771_v51  ;;  %v8326_v37 = vld [vmem:[%s9854_s5 + $0x1e0] sm:$0xff]   ;;  %v3680_v20 = vld [vmem:[#allocation3 + $0xb4] sm:$0xff]  ;;  %4824 = vmatmul.mubr.bf16.gmra.mxu1 %v8288_v11 }
 0x282   :  { %2982 = vst [vmem:[#allocation3 + $0x220] sm:$0xf] %v7079_v21  ;;  %2790 = vst [vmem:[#allocation2 + $0x1b8] sm:$0xff] %v2774_v55  ;;  %v8308_v15 = vld [vmem:[%s9854_s5 + $0x118] sm:$0xff]   ;;  %v6735_v42 = vcombine.low %v3675_v54, %v3680_v20  ;;  %v8314_v28 = vld [vmem:[%s9854_s5 + $0x150] sm:$0xff]   ;;  %7750 = vmatpush3.bf16.msra.mxu1 %v8324_v1 }
 0x283   :  { %2980 = vst [vmem:[#allocation3 + $0x1d8] sm:$0xf] %v7077_v6  ;;  %2880 = vst [vmem:[#allocation3 + $0x144] sm:$0xf] %v7057_v34  ;;  %v3088_v4 = vld [vmem:[#allocation2 + $0x127] sm:$0xff]  ;;  %7751 = vmatprep.subr.bf16.mxu1 %v8326_v37  ;;  %v8332_v51 = vld [vmem:[%s9854_s5 + $0x1d8] sm:$0xff]   ;;  %7690 = vmatpush3.bf16.msra.mxu0 %v8308_v15 }
 0x284   :  { %3072 = vst [vmem:[#allocation3 + $0x14c] sm:$0xf] %v7089_v35  ;;  %3167 = vst [vmem:[#allocation3 + $0x12c] sm:$0xf] %v7057_v34  ;;  %v2993_v53 = vld [vmem:[#allocation2 + $0x129] sm:$0xff]  ;;  %v7105_v47 = vpack.c.bf16 %v3088_v4, %v3088_v4  ;;  %v8330_v59 = vld [vmem:[%s9854_s5 + $0x1a0] sm:$0xff]   ;;  %4735 = vmatmul.mubr.bf16.gmra.mxu0 %v6735_v42  ;;  %7691 = vmatprep.subr.bf16.mxu0 %v8314_v28 }
 0x285   :  { %2882 = vst [vmem:[#allocation3 + $0x18c] sm:$0xf] %v7059_v46  ;;  %3169 = vst [vmem:[#allocation3 + $0x174] sm:$0xf] %v7059_v46  ;;  %v7090_v9 = vpack.c.bf16 %v2993_v53, %v2993_v53  ;;  %v8289_v44 = vld [vmem:[#allocation3 + $0x9c] ss:$36 sps:$4 sm:$0xff]  }
 0x286   :  { %3359 = vst [vmem:[#allocation3 + $0x134] sm:$0xf] %v7089_v35  ;;  %3456 = vst [vmem:[#allocation3 + $0x15c] sm:$0xf] %v7059_v46  ;;  %v2806_v26 = vld [vmem:[#allocation2 + $0x19f] sm:$0xff]  ;;  %4831 = vmatprep.mubr.bf16.mxu1 %v8289_v44  ;;  %v8318_v17 = vld [vmem:[%s9854_s5 + $0x110] sm:$0xff]   ;;  %7752 = vmatpush3.bf16.msra.mxu1 %v8330_v59 }
 0x287   :  { %2788 = vst [vmem:[#allocation2 + $0x188] sm:$0xff] %v2772_v38  ;;  %3074 = vst [vmem:[#allocation3 + $0x194] sm:$0xf] %v7091_v57  ;;  %v2998_v13 = vld [vmem:[#allocation2 + $0x1a1] sm:$0xff]  ;;  %v7063_v2 = vpack.c.bf16 %v2806_v26, %v2806_v26  ;;  %v8335_v19 = vld [vmem:[%s9854_s5 + $0x198] sm:$0xff]   ;;  %7753 = vmatprep.subr.bf16.mxu1 %v8332_v51  ;;  %7692 = vmatpush3.bf16.msra.mxu0 %v8318_v17 }
 0x288   :  { %3170 = vst [vmem:[#allocation3 + $0x198] sm:$0xf] %v7107_v58  ;;  %2883 = vst [vmem:[#allocation3 + $0x1b0] sm:$0xf] %v7107_v58  ;;  %v2804_v43 = vld [vmem:[#allocation2 + $0x16f] sm:$0xff]  ;;  %v7095_v48 = vpack.c.bf16 %v2998_v13, %v2998_v13  ;;  %v3685_v21 = vld [vmem:[#allocation3 + $0xd8] sm:$0xff] }
 0x289   :  { %3075 = vst [vmem:[#allocation3 + $0x1b8] sm:$0xf] %v7092_v0  ;;  %3361 = vst [vmem:[#allocation3 + $0x17c] sm:$0xf] %v7091_v57  ;;  %v7061_v25 = vpack.c.bf16 %v2804_v43, %v2804_v43  ;;  %v2996_v40 = vld [vmem:[#allocation2 + $0x171] sm:$0xff]  ;;  %v8325_v56 = vld [vmem:[%s9854_s5 + $0x148] sm:$0xff]  }
 0x28a   :  { %3362 = vst [vmem:[#allocation3 + $0x1a0] sm:$0xf] %v7092_v0  ;;  %3457 = vst [vmem:[#allocation3 + $0x180] sm:$0xf] %v7107_v58  ;;  %v7093_v5 = vpack.c.bf16 %v2996_v40, %v2996_v40  ;;  %v3094_v7 = vld [vmem:[#allocation2 + $0x1b7] sm:$0xff]  ;;  %v8329_v50 = vld [vmem:[%s9854_s5 + $0x108] sm:$0xff]   ;;  %7693 = vmatprep.subr.bf16.mxu0 %v8325_v56  ;;  %7754 = vmatpush3.bf16.msra.mxu1 %v8335_v19 }
 0x28b   :  { %3649 = vst [vmem:[#allocation3 + $0x188] sm:$0xf] %v7092_v0  ;;  %3168 = vst [vmem:[#allocation3 + $0x150] sm:$0xf] %v7105_v47  ;;  %v7111_v8 = vpack.c.bf16 %v3094_v7, %v3094_v7  ;;  %v8292_v63 = vld [vmem:[#allocation3 + $0xdc] ss:$36 sps:$4 sm:$0xff]   ;;  %7694 = vmatpush3.bf16.msra.mxu0 %v8329_v50 }
 0x28c   :  { %2881 = vst [vmem:[#allocation3 + $0x168] sm:$0xf] %v7105_v47  ;;  %3073 = vst [vmem:[#allocation3 + $0x170] sm:$0xf] %v7090_v9  ;;  %4742 = vmatprep.mubr.bf16.mxu0 %v8292_v63  ;;  %v8295_v24 = vld [vmem:[#allocation3 + $0x98] ss:$36 sps:$4 sm:$0xff]  }
 0x28d   :  { %2981 = vst [vmem:[#allocation3 + $0x1fc] sm:$0xf] %v7078_v33  ;;  %3360 = vst [vmem:[#allocation3 + $0x158] sm:$0xf] %v7090_v9  ;;  %v8337_v52 = vld [vmem:[%s9854_s5 + $0x1d0] sm:$0xff]   ;;  %v8336_v41 = vld [vmem:[%s9854_s5 + $0x140] sm:$0xff]   ;;  %4832 = vmatmul.mubr.bf16.gmra.mxu1 %v8295_v24 }
 0x28e   :  { %3455 = vst [vmem:[#allocation3 + $0x138] sm:$0xf] %v7105_v47  ;;  %2884 = vst [vmem:[#allocation3 + $0x1d4] sm:$0xf] %v7061_v25  ;;  %v3092_v3 = vld [vmem:[#allocation2 + $0x187] sm:$0xff]  ;;  %v3690_v55 = vld [vmem:[#allocation3 + $0xfc] sm:$0xff]  ;;  %7755 = vmatprep.subr.bf16.mxu1 %v8337_v52  ;;  %7695 = vmatprep.subr.bf16.mxu0 %v8336_v41 }
 0x28f   :  { %3171 = vst [vmem:[#allocation3 + $0x1bc] sm:$0xf] %v7061_v25  ;;  %3458 = vst [vmem:[#allocation3 + $0x1a4] sm:$0xf] %v7061_v25  ;;  %v2997_v10 = vld [vmem:[#allocation2 + $0x189] sm:$0xff]  ;;  %v7109_v14 = vpack.c.bf16 %v3092_v3, %v3092_v3  ;;  %v6744_v30 = vcombine.low %v3685_v21, %v3690_v55  ;;  %v3180_v18 = vld [vmem:[#allocation2 + $0x98] sm:$0xff] }
 0x290   :  { %3076 = vst [vmem:[#allocation3 + $0x1dc] sm:$0xf] %v7093_v5  ;;  %2886 = vst [vmem:[#allocation3 + $0x21c] sm:$0xf] %v7063_v2  ;;  %v7094_v12 = vpack.c.bf16 %v2997_v10, %v2997_v10  ;;  %v8296_v16 = vld [vmem:[#allocation3 + $0xe4] ss:$36 sps:$4 sm:$0xff]   ;;  %v7117_v22 = vpack.c.bf16 %v3180_v18, %v3180_v18 }
 0x291   :  { %3078 = vst [vmem:[#allocation3 + $0x224] sm:$0xf] %v7095_v48  ;;  %3173 = vst [vmem:[#allocation3 + $0x204] sm:$0xf] %v7063_v2  ;;  %v8342_v27 = vld [vmem:[%s9854_s5 + $0x190] sm:$0xff]   ;;  %4839 = vmatprep.mubr.bf16.mxu1 %v8296_v16  ;;  %v8344_v61 = vld [vmem:[%s9854_s5 + $0x1c8] sm:$0xff]   ;;  %4743 = vmatmul.mubr.bf16.gmra.mxu0 %v6744_v30 }
 0x292   :  { %3363 = vst [vmem:[#allocation3 + $0x1c4] sm:$0xf] %v7093_v5  ;;  %3460 = vst [vmem:[#allocation3 + $0x1ec] sm:$0xf] %v7063_v2  ;;  %v8299_v31 = vld [vmem:[#allocation3 + $0x124] ss:$36 sps:$4 sm:$0xff]   ;;  %7756 = vmatpush3.bf16.msra.mxu1 %v8342_v27 }
 0x293   :  { %3365 = vst [vmem:[#allocation3 + $0x20c] sm:$0xf] %v7095_v48  ;;  %3650 = vst [vmem:[#allocation3 + $0x1ac] sm:$0xf] %v7093_v5  ;;  %v3695_v6 = vld [vmem:[#allocation3 + $0x120] sm:$0xff]  ;;  %v3182_v34 = vld [vmem:[#allocation2 + $0xc8] sm:$0xff]  ;;  %4750 = vmatprep.mubr.bf16.mxu0 %v8299_v31  ;;  %7757 = vmatprep.subr.bf16.mxu1 %v8344_v61 }
 0x294   :  { %3652 = vst [vmem:[#allocation3 + $0x1f4] sm:$0xf] %v7095_v48  ;;  %3174 = vst [vmem:[#allocation3 + $0x228] sm:$0xf] %v7111_v8  ;;  %v8338_v32 = vld [vmem:[%s9854_s5 + $0x100] sm:$0xff]   ;;  %v3278_v35 = vld [vmem:[#allocation2 + $0xc9] sm:$0xff]  ;;  %v7119_v38 = vpack.c.bf16 %v3182_v34, %v3182_v34 }
 0x295   :  { %3461 = vst [vmem:[#allocation3 + $0x210] sm:$0xf] %v7111_v8  ;;  %3172 = vst [vmem:[#allocation3 + $0x1e0] sm:$0xf] %v7109_v14  ;;  %v3700_v46 = vld [vmem:[#allocation3 + $0x144] sm:$0xff]  ;;  %v7135_v45 = vpack.c.bf16 %v3278_v35, %v3278_v35  ;;  %v9341_v23 = vld [vmem:[%s9854_s5 + $0x238] sm:$0xff]   ;;  %7696 = vmatpush3.bf16.msra.mxu0 %v8338_v32 }
 0x296   :  { %2885 = vst [vmem:[#allocation3 + $0x1f8] sm:$0xf] %v7109_v14  ;;  %3077 = vst [vmem:[#allocation3 + $0x200] sm:$0xf] %v7094_v12  ;;  %v8345_v36 = vld [vmem:[%s9854_s5 + $0x188] sm:$0xff]   ;;  %v8349_v49 = vld [vmem:[%s9854_s5 + $0x1c0] sm:$0xff]   ;;  %v6753_v57 = vcombine.low %v3695_v6, %v3700_v46  ;;  %7925 = vmatprep.subr.bf16.mxu0 %v9341_v23 }
 0x297   :  { %3364 = vst [vmem:[#allocation3 + $0x1e8] sm:$0xf] %v7094_v12  ;;  %3459 = vst [vmem:[#allocation3 + $0x1c8] sm:$0xf] %v7109_v14  ;;  %v8302_v62 = vld [vmem:[#allocation3 + $0xe0] ss:$36 sps:$4 sm:$0xff]   ;;  %7758 = vmatpush3.bf16.msra.mxu1 %v8345_v36 }
 0x298   :  { %3651 = vst [vmem:[#allocation3 + $0x1d0] sm:$0xf] %v7094_v12  ;;  %3260 = vst [vmem:[#allocation3 + $0xc4] sm:$0xf] %v7117_v22  ;;  %v8303_v4 = vld [vmem:[#allocation3 + $0x12c] ss:$36 sps:$4 sm:$0xff]   ;;  %4840 = vmatmul.mubr.bf16.gmra.mxu1 %v8302_v62  ;;  %7759 = vmatprep.subr.bf16.mxu1 %v8349_v49 }
 0x299   :  { %3547 = vst [vmem:[#allocation3 + $0xac] sm:$0xf] %v7117_v22  ;;  %3262 = vst [vmem:[#allocation3 + $0x10c] sm:$0xf] %v7119_v38  ;;  %v3183_v53 = vld [vmem:[#allocation2 + $0x110] sm:$0xff]  ;;  %v3184_v58 = vld [vmem:[#allocation2 + $0x128] sm:$0xff]  ;;  %4847 = vmatprep.mubr.bf16.mxu1 %v8303_v4  ;;  %4751 = vmatmul.mubr.bf16.gmra.mxu0 %v6753_v57 }
 0x29a   :  { %3358 = vst [vmem:[#allocation3 + $0x110] sm:$0xf] %v7135_v45  ;;  %3549 = vst [vmem:[#allocation3 + $0xf4] sm:$0xf] %v7119_v38  ;;  %v7120_v0 = vpack.c.bf16 %v3183_v53, %v3183_v53  ;;  %v3472_v39 = vld [vmem:[#allocation2 + $0x140] sm:$0xff]  ;;  %v3186_v47 = vld [vmem:[#allocation2 + $0x158] sm:$0xff]  ;;  %v7121_v60 = vpack.c.bf16 %v3184_v58, %v3184_v58 }
 0x29b   :  { %3645 = vst [vmem:[#allocation3 + $0xf8] sm:$0xf] %v7135_v45  ;;  %v8354_v9 = vld [vmem:[%s9854_s5 + $0x180] sm:$0xff]   ;;  %v7169_v33 = vpack.c.bf16 %v3472_v39, %v3472_v39  ;;  %v7123_v29 = vpack.c.bf16 %v3186_v47, %v3186_v47  ;;  %v3474_v1 = vld [vmem:[#allocation2 + $0x170] sm:$0xff]  ;;  %v3188_v11 = vld [vmem:[#allocation2 + $0x188] sm:$0xff] }
 0x29c   :  { %v3476_v37 = vld [vmem:[#allocation2 + $0x1a0] sm:$0xff]  ;;  %3263 = vst [vmem:[#allocation3 + $0x130] sm:$0xf] %v7120_v0  ;;  %v7171_v20 = vpack.c.bf16 %v3474_v1, %v3474_v1  ;;  %v7125_v44 = vpack.c.bf16 %v3188_v11, %v3188_v11  ;;  %v3190_v43 = vld [vmem:[#allocation2 + $0x1b8] sm:$0xff]  ;;  %v8306_v40 = vld [vmem:[#allocation3 + $0x16c] ss:$36 sps:$4 sm:$0xff]   ;;  %7760 = vmatpush3.bf16.msra.mxu1 %v8354_v9 }
 0x29d   :  { %v7173_v15 = vpack.c.bf16 %v3476_v37, %v3476_v37  ;;  %v3286_v25 = vld [vmem:[#allocation2 + $0x1b9] sm:$0xff]  ;;  %3264 = vst [vmem:[#allocation3 + $0x154] sm:$0xf] %v7121_v60  ;;  %3551 = vst [vmem:[#allocation3 + $0x13c] sm:$0xf] %v7121_v60  ;;  %v7127_v26 = vpack.c.bf16 %v3190_v43, %v3190_v43  ;;  %v3562_v54 = vld [vmem:[#allocation2 + $0x81] sm:$0xff]  ;;  %4758 = vmatprep.mubr.bf16.mxu0 %v8306_v40 }
 0x29e   :  { %3552 = vst [vmem:[#allocation3 + $0x160] sm:$0xf] %v7169_v33  ;;  %3265 = vst [vmem:[#allocation3 + $0x178] sm:$0xf] %v7169_v33  ;;  %v7143_v13 = vpack.c.bf16 %v3286_v25, %v3286_v25  ;;  %v7179_v5 = vpack.c.bf16 %v3562_v54, %v3562_v54  ;;  %v3705_v2 = vld [vmem:[#allocation3 + $0x168] sm:$0xff]  ;;  %v3563_v42 = vld [vmem:[#allocation2 + $0x99] sm:$0xff] }
 0x29f   :  { %3266 = vst [vmem:[#allocation3 + $0x19c] sm:$0xf] %v7123_v29  ;;  %3553 = vst [vmem:[#allocation3 + $0x184] sm:$0xf] %v7123_v29  ;;  %v8309_v48 = vld [vmem:[#allocation3 + $0x128] ss:$36 sps:$4 sm:$0xff]   ;;  %v7180_v59 = vpack.c.bf16 %v3563_v42, %v3563_v42 }
 0x2a0   :  { %3554 = vst [vmem:[#allocation3 + $0x1a8] sm:$0xf] %v7171_v20  ;;  %3267 = vst [vmem:[#allocation3 + $0x1c0] sm:$0xf] %v7171_v20  ;;  %v8311_v7 = vld [vmem:[#allocation3 + $0x174] ss:$36 sps:$4 sm:$0xff]   ;;  %4848 = vmatmul.mubr.bf16.gmra.mxu1 %v8309_v48 }
 0x2a1   :  { %3268 = vst [vmem:[#allocation3 + $0x1e4] sm:$0xf] %v7125_v44  ;;  %3555 = vst [vmem:[#allocation3 + $0x1cc] sm:$0xf] %v7125_v44  ;;  %v3710_v28 = vld [vmem:[#allocation3 + $0x18c] sm:$0xff]  ;;  %4855 = vmatprep.mubr.bf16.mxu1 %v8311_v7  ;;  %v3720_v10 = vld [vmem:[#allocation3 + $0x1d4] sm:$0xff] }
 0x2a2   :  { %3556 = vst [vmem:[#allocation3 + $0x1f0] sm:$0xf] %v7173_v15  ;;  %3269 = vst [vmem:[#allocation3 + $0x208] sm:$0xf] %v7173_v15  ;;  %v6762_v8 = vcombine.low %v3705_v2, %v3710_v28  ;;  %v8316_v63 = vld [vmem:[#allocation3 + $0x1b4] ss:$36 sps:$4 sm:$0xff]  }
 0x2a3   :  { %3270 = vst [vmem:[#allocation3 + $0x22c] sm:$0xf] %v7127_v26  ;;  %3366 = vst [vmem:[#allocation3 + $0x230] sm:$0xf] %v7143_v13  ;;  %v8320_v3 = vld [vmem:[#allocation3 + $0x170] ss:$36 sps:$4 sm:$0xff]  }
 0x2a4   :  { %3557 = vst [vmem:[#allocation3 + $0x214] sm:$0xf] %v7127_v26  ;;  %3653 = vst [vmem:[#allocation3 + $0x218] sm:$0xf] %v7143_v13  ;;  %4759 = vmatmul.mubr.bf16.gmra.mxu0 %v6762_v8  ;;  %v8322_v14 = vld [vmem:[#allocation3 + $0x1bc] ss:$36 sps:$4 sm:$0xff]  }
 0x2a5   :  { %3642 = vst [vmem:[#allocation3 + $0x8c] sm:$0xf] %v7179_v5  ;;  %3643 = vst [vmem:[#allocation3 + $0xb0] sm:$0xf] %v7180_v59  ;;  %4766 = vmatprep.mubr.bf16.mxu0 %v8316_v63  ;;  %v3715_v51 = vld [vmem:[#allocation3 + $0x1b0] sm:$0xff]  ;;  %v3568_v19 = vld [vmem:[#allocation2 + $0x141] sm:$0xff] }
 0x2a6   :  { %v6771_v12 = vcombine.low %v3715_v51, %v3720_v10  ;;  %v8327_v17 = vld [vmem:[#allocation3 + $0x1fc] ss:$36 sps:$4 sm:$0xff]   ;;  %v3567_v56 = vld [vmem:[#allocation2 + $0x129] sm:$0xff]  ;;  %v7185_v50 = vpack.c.bf16 %v3568_v19, %v3568_v19  ;;  %v8341_v27 = vld [vmem:[#allocation3 + $0x14] ss:$36 sps:$4 sm:$0xff]  }
 0x2a7   :  { %v3725_v21 = vld [vmem:[#allocation3 + $0x1f8] sm:$0xff]  ;;  %v7184_v24 = vpack.c.bf16 %v3567_v56, %v3567_v56  ;;  %v8333_v16 = vld [vmem:[#allocation3 + $0x204] ss:$36 sps:$4 sm:$0xff]   ;;  %v8339_v61 = vld [vmem:[#allocation3 + $0x10] ss:$36 sps:$4 sm:$0xff]  }
 0x2a8   :  { %4856 = vmatmul.mubr.bf16.gmra.mxu1 %v8320_v3  ;;  %v8331_v52 = vld [vmem:[#allocation3 + $0x1b8] ss:$36 sps:$4 sm:$0xff]   ;;  %3648 = vst [vmem:[#allocation3 + $0x164] sm:$0xf] %v7185_v50  ;;  %v8343_v30 = vld [vmem:[#allocation3 + $0x200] ss:$36 sps:$4 sm:$0xff]  }
 0x2a9   :  { %4863 = vmatprep.mubr.bf16.mxu1 %v8322_v14  ;;  %3647 = vst [vmem:[#allocation3 + $0x140] sm:$0xf] %v7184_v24  ;;  %v3730_v41 = vld [vmem:[#allocation3 + $0x21c] sm:$0xff]  ;;  %v8358_v18 = vld [vmem:[%s9854_s5 + $0x230] sm:$0xff]   ;;  %v8365_v32 = vld [vmem:[%s9854_s5 + $0x228] sm:$0xff]  }
 0x2aa   :  { %v6780_v55 = vcombine.low %v3725_v21, %v3730_v41  ;;  %v8348_v31 = vld [vmem:[#allocation3 + $0x1c] ss:$36 sps:$4 sm:$0xff]   ;;  %v8357_v34 = vld [vmem:[#allocation3 + $0x64] ss:$36 sps:$4 sm:$0xff]   ;;  %v8364_v49 = vld [vmem:[#allocation3 + $0xac] ss:$36 sps:$4 sm:$0xff]  }
 0x2ab   :  { %v8353_v6 = vld [vmem:[#allocation3 + $0x5c] ss:$36 sps:$4 sm:$0xff]   ;;  %v8361_v36 = vld [vmem:[#allocation3 + $0xa4] ss:$36 sps:$4 sm:$0xff]   ;;  %v8386_v62 = vld [vmem:[%s9854_s5 + $0x210] sm:$0xff]  }
 0x2ac   :  { %4767 = vmatmul.mubr.bf16.gmra.mxu0 %v6771_v12  ;;  %v8346_v22 = vld [vmem:[#allocation3 + $0x18] ss:$36 sps:$4 sm:$0xff]   ;;  %v8372_v46 = vld [vmem:[%s9854_s5 + $0x220] sm:$0xff]   ;;  %v8368_v4 = vld [vmem:[#allocation3 + $0xec] ss:$36 sps:$4 sm:$0xff]  }
 0x2ad   :  { %4774 = vmatprep.mubr.bf16.mxu0 %v8327_v17  ;;  %v8351_v35 = vld [vmem:[#allocation3 + $0x58] ss:$36 sps:$4 sm:$0xff]   ;;  %v8355_v45 = vld [vmem:[#allocation3 + $0x60] ss:$36 sps:$4 sm:$0xff]   ;;  %v8393_v53 = vld [vmem:[%s9854_s5 + $0x208] sm:$0xff]  }
 0x2ae   :  { %v8379_v38 = vld [vmem:[%s9854_s5 + $0x218] sm:$0xff]   ;;  %v8362_v57 = vld [vmem:[#allocation3 + $0xa8] ss:$36 sps:$4 sm:$0xff]   ;;  %v8400_v39 = vld [vmem:[%s9854_s5 + $0x200] sm:$0xff]  }
 0x2af   :  { %v8371_v58 = vld [vmem:[#allocation3 + $0xf4] ss:$36 sps:$4 sm:$0xff]   ;;  %v8366_v0 = vld [vmem:[#allocation3 + $0xe8] ss:$36 sps:$4 sm:$0xff]   ;;  %v8378_v60 = vld [vmem:[#allocation3 + $0x13c] ss:$36 sps:$4 sm:$0xff]  }
 0x2b0   :  { %4864 = vmatmul.mubr.bf16.gmra.mxu1 %v8331_v52  ;;  %v8375_v47 = vld [vmem:[#allocation3 + $0x134] ss:$36 sps:$4 sm:$0xff]   ;;  %v8382_v29 = vld [vmem:[#allocation3 + $0x17c] ss:$36 sps:$4 sm:$0xff]   ;;  %v8385_v11 = vld [vmem:[#allocation3 + $0x184] ss:$36 sps:$4 sm:$0xff]  }
 0x2b1   :  { %4871 = vmatprep.mubr.bf16.mxu1 %v8333_v16  ;;  %v8369_v9 = vld [vmem:[#allocation3 + $0xf0] ss:$36 sps:$4 sm:$0xff]   ;;  %v8376_v1 = vld [vmem:[#allocation3 + $0x138] ss:$36 sps:$4 sm:$0xff]   ;;  %v8389_v20 = vld [vmem:[#allocation3 + $0x1c4] ss:$36 sps:$4 sm:$0xff]  }
 0x2b2   :  { %v8373_v33 = vld [vmem:[#allocation3 + $0x130] ss:$36 sps:$4 sm:$0xff]   ;;  %v8380_v37 = vld [vmem:[#allocation3 + $0x178] ss:$36 sps:$4 sm:$0xff]   ;;  %v8383_v44 = vld [vmem:[#allocation3 + $0x180] ss:$36 sps:$4 sm:$0xff]  }
 0x2b3   :  { %v8392_v15 = vld [vmem:[#allocation3 + $0x1cc] ss:$36 sps:$4 sm:$0xff]   ;;  %v8387_v43 = vld [vmem:[#allocation3 + $0x1c0] ss:$36 sps:$4 sm:$0xff]   ;;  %v8399_v26 = vld [vmem:[#allocation3 + $0x214] ss:$36 sps:$4 sm:$0xff]  }
 0x2b4   :  { %4775 = vmatmul.mubr.bf16.gmra.mxu0 %v6780_v55  ;;  %v8396_v25 = vld [vmem:[#allocation3 + $0x20c] ss:$36 sps:$4 sm:$0xff]   ;;  %v8401_v54 = vld [vmem:[#allocation3 + $0x20] ss:$36 sps:$4 sm:$0xff]   ;;  %v8404_v7 = vld [vmem:[#allocation3 + $0xf8] ss:$36 sps:$4 sm:$0xff]  }
 0x2b5   :  { %4912 = vmatprep.mubr.bf16.mxu0 %v8341_v27  ;;  %v8390_v40 = vld [vmem:[#allocation3 + $0x1c8] ss:$36 sps:$4 sm:$0xff]   ;;  %v8397_v5 = vld [vmem:[#allocation3 + $0x210] ss:$36 sps:$4 sm:$0xff]   ;;  %v8405_v42 = vld [vmem:[#allocation3 + $0x140] ss:$36 sps:$4 sm:$0xff]  }
 0x2b6   :  { %v8394_v13 = vld [vmem:[#allocation3 + $0x208] ss:$36 sps:$4 sm:$0xff]   ;;  %v8403_v48 = vld [vmem:[#allocation3 + $0xb0] ss:$36 sps:$4 sm:$0xff]   ;;  %v8409_v8 = vld [vmem:[%s9856_s7 + $0x38] sm:$0xff]  }
 0x2b7   :  { %v8402_v2 = vld [vmem:[#allocation3 + $0x68] ss:$36 sps:$4 sm:$0xff]   ;;  %v8407_v59 = vld [vmem:[#allocation3 + $0x1d0] ss:$36 sps:$4 sm:$0xff]   ;;  %7957 = vmatprep.subr.bf16.mxu1 %v8409_v8  ;;  %v8408_v63 = vld [vmem:[#allocation3 + $0x218] ss:$36 sps:$4 sm:$0xff]  }
 0x2b8   :  { %4872 = vmatmul.mubr.bf16.gmra.mxu1 %v8343_v30  ;;  %v8406_v28 = vld [vmem:[#allocation3 + $0x188] ss:$36 sps:$4 sm:$0xff]   ;;  %v8410_v3 = vld [vmem:[%s9856_s7 + $0x30] sm:$0xff]   ;;  %v8412_v14 = vld [vmem:[%s9856_s7 + $0x20] sm:$0xff]  }
 0x2b9   :  { %5009 = vmatprep.mubr.bf16.mxu1 %v8348_v31  ;;  %v8411_v10 = vld [vmem:[%s9856_s7 + $0x28] sm:$0xff]   ;;  %v8413_v51 = vld [vmem:[%s9856_s7 + $0x18] sm:$0xff]   ;;  %v8415_v17 = vld [vmem:[%s9858_s9 + $0x30] sm:$0xff]  }
 0x2ba   :  { %v8414_v12 = vld [vmem:[%s9858_s9 + $0x38] sm:$0xff]   ;;  %v8416_v56 = vld [vmem:[%s9856_s7 + $0x10] sm:$0xff]   ;;  %v8417_v19 = vld [vmem:[%s9858_s9 + $0x28] sm:$0xff]  }
 0x2bb   :  { %v8418_v21 = vld [vmem:[%s9858_s9 + $0x20] sm:$0xff]   ;;  %v8419_v50 = vld [vmem:[%s9856_s7 + $0x8] sm:$0xff]   ;;  %v8420_v52 = vld [vmem:[%s9858_s9 + $0x18] sm:$0xff]  }
 0x2bc   :  { %4913 = vmatmul.mubr.bf16.vlgmr.msra.gmra.mxu0 %v8339_v61  ;;  %v9408_v27 = vld [vmem:[%s9855_s6] ss:$0 sm:$0xff]  ;;  %v8421_v31 = vld [vmem:[%s9858_s9 + $0x10] sm:$0xff]  }
 0x2bd   :  { %4920 = vmatprep.mubr.bf16.mxu0 %v8353_v6  ;;  %7926 = vmatpush3.bf16.msra.mxu0 %v9341_v23  ;;  %v8359_v23 = vld [vmem:[#allocation3 + $0xa0] ss:$36 sps:$4 sm:$0xff]   ;;  %9932 = vst [vmem:[#allocation15_spill] sm:$0xff] %v9408_v27 }
 0x2be   :  { %7927 = vmatprep.subr.bf16.mxu0 %v8358_v18 }
 0x2c0   :  { %5010 = vmatmul.mubr.bf16.vlgmr.msra.gmra.mxu1 %v8346_v22 }
 0x2c1   :  { %7928 = vmatpush3.bf16.msra.mxu0 %v8358_v18  ;;  %5017 = vmatprep.mubr.bf16.mxu1 %v8357_v34 }
 0x2c2   :  { %7929 = vmatprep.subr.bf16.mxu0 %v8365_v32  ;;  %7958 = vmatpush3.bf16.msra.mxu1 %v8409_v8 }
 0x2c3   :  { %7959 = vmatprep.subr.bf16.mxu1 %v8410_v3 }
 0x2c4   :  { %4921 = vmatmul.mubr.bf16.gmra.mxu0 %v8351_v35 }
 0x2c5   :  { %4928 = vmatprep.mubr.bf16.mxu0 %v8361_v36  ;;  %7930 = vmatpush3.bf16.msra.mxu0 %v8365_v32 }
 0x2c6   :  { %7931 = vmatprep.subr.bf16.mxu0 %v8372_v46  ;;  %7960 = vmatpush3.bf16.msra.mxu1 %v8410_v3 }
 0x2c7   :  { %7961 = vmatprep.subr.bf16.mxu1 %v8411_v10 }
 0x2c8   :  { %5018 = vmatmul.mubr.bf16.gmra.mxu1 %v8355_v45 }
 0x2c9   :  { %7932 = vmatpush3.bf16.msra.mxu0 %v8372_v46  ;;  %5025 = vmatprep.mubr.bf16.mxu1 %v8364_v49  ;;  %v8422_v49 = vld [vmem:[%s9856_s7] sm:$0xff]  }
 0x2ca   :  { %7933 = vmatprep.subr.bf16.mxu0 %v8379_v38  ;;  %7962 = vmatpush3.bf16.msra.mxu1 %v8411_v10 }
 0x2cb   :  { %7963 = vmatprep.subr.bf16.mxu1 %v8412_v14 }
 0x2cc   :  { %4929 = vmatmul.mubr.bf16.gmra.mxu0 %v8359_v23  ;;  %v8423_v23 = vld [vmem:[%s9858_s9 + $0x8] sm:$0xff]  }
 0x2cd   :  { %4936 = vmatprep.mubr.bf16.mxu0 %v8368_v4  ;;  %7934 = vmatpush3.bf16.msra.mxu0 %v8379_v38 }
 0x2ce   :  { %7935 = vmatprep.subr.bf16.mxu0 %v8386_v62  ;;  %7964 = vmatpush3.bf16.msra.mxu1 %v8412_v14 }
 0x2cf   :  { %7965 = vmatprep.subr.bf16.mxu1 %v8413_v51 }
 0x2d0   :  { %5026 = vmatmul.mubr.bf16.gmra.mxu1 %v8362_v57 }
 0x2d1   :  { %7936 = vmatpush3.bf16.msra.mxu0 %v8386_v62  ;;  %5033 = vmatprep.mubr.bf16.mxu1 %v8371_v58  ;;  %v8424_v58 = vld [vmem:[%s9858_s9] sm:$0xff]  }
 0x2d2   :  { %7937 = vmatprep.subr.bf16.mxu0 %v8393_v53  ;;  %7966 = vmatpush3.bf16.msra.mxu1 %v8413_v51 }
 0x2d3   :  { %7967 = vmatprep.subr.bf16.mxu1 %v8416_v56 }
 0x2d4   :  { %4937 = vmatmul.mubr.bf16.gmra.mxu0 %v8366_v0 }
 0x2d5   :  { %4944 = vmatprep.mubr.bf16.mxu0 %v8375_v47  ;;  %7938 = vmatpush3.bf16.msra.mxu0 %v8393_v53 }
 0x2d6   :  { %7939 = vmatprep.subr.bf16.mxu0 %v8400_v39  ;;  %7968 = vmatpush3.bf16.msra.mxu1 %v8416_v56 }
 0x2d7   :  { %7969 = vmatprep.subr.bf16.mxu1 %v8419_v50 }
 0x2d8   :  { %5034 = vmatmul.mubr.bf16.gmra.mxu1 %v8369_v9 }
 0x2d9   :  { %7940 = vmatpush3.bf16.msra.mxu0 %v8400_v39  ;;  %5041 = vmatprep.mubr.bf16.mxu1 %v8378_v60  ;;  %v9428_v60 = vld [vmem:[#allocation2 + $0x48] sm:$0xff] }
 0x2da   :  { %7989 = vmatprep.subr.bf16.mxu0 %v8414_v12  ;;  %7970 = vmatpush3.bf16.msra.mxu1 %v8419_v50  ;;  %9933 = vst [vmem:[#allocation16_spill] sm:$0xff] %v9428_v60 }
 0x2db   :  { %7971 = vmatprep.subr.bf16.mxu1 %v8422_v49 }
 0x2dc   :  { %4945 = vmatmul.mubr.bf16.gmra.mxu0 %v8373_v33 }
 0x2dd   :  { %4952 = vmatprep.mubr.bf16.mxu0 %v8382_v29 }
 0x2de   :  { %7972 = vmatpush3.bf16.msra.mxu1 %v8422_v49 }
 0x2df   :  { %8021 = vmatprep.subr.bf16.mxu1 %v9428_v60 }
 0x2e0   :  { %5042 = vmatmul.mubr.bf16.gmra.mxu1 %v8376_v1 }
 0x2e1   :  { %5049 = vmatprep.mubr.bf16.mxu1 %v8385_v11 }
 0x2e4   :  { %4953 = vmatmul.mubr.bf16.gmra.mxu0 %v8380_v37 }
 0x2e5   :  { %4960 = vmatprep.mubr.bf16.mxu0 %v8389_v20 }
 0x2e8   :  { %5050 = vmatmul.mubr.bf16.gmra.mxu1 %v8383_v44 }
 0x2e9   :  { %5057 = vmatprep.mubr.bf16.mxu1 %v8392_v15 }
 0x2ec   :  { %4961 = vmatmul.mubr.bf16.gmra.mxu0 %v8387_v43 }
 0x2ed   :  { %4968 = vmatprep.mubr.bf16.mxu0 %v8396_v25 }
 0x2f0   :  { %5058 = vmatmul.mubr.bf16.gmra.mxu1 %v8390_v40 }
 0x2f1   :  { %5065 = vmatprep.mubr.bf16.mxu1 %v8399_v26 }
 0x2f4   :  { %4969 = vmatmul.mubr.bf16.gmra.mxu0 %v8394_v13 }
 0x2f5   :  { %7941 = vmatprep.mubr.bf16.mxu0 %v8401_v54 }
 0x2f8   :  { %5066 = vmatmul.mubr.bf16.gmra.mxu1 %v8397_v5 }
 0x2fc   :  { %7942 = vmatmul.mubr.bf16.vlgmr.msra.gmra.mxu0 %v8402_v2 }
 0x2fd   :  { %7945 = vmatprep.mubr.bf16.mxu0 %v8403_v48  ;;  %7990 = vmatpush3.bf16.msra.mxu0 %v8414_v12 }
 0x2fe   :  { %7991 = vmatprep.subr.bf16.mxu0 %v8415_v17 }
 0x301   :  { %7992 = vmatpush3.bf16.msra.mxu0 %v8415_v17 }
 0x302   :  { %7993 = vmatprep.subr.bf16.mxu0 %v8417_v19 }
 0x304   :  { %7946 = vmatmul.mubr.bf16.gmra.mxu0 %v8404_v7 }
 0x305   :  { %7949 = vmatprep.mubr.bf16.mxu0 %v8405_v42  ;;  %7994 = vmatpush3.bf16.msra.mxu0 %v8417_v19 }
 0x306   :  { %7995 = vmatprep.subr.bf16.mxu0 %v8418_v21 }
 0x309   :  { %7996 = vmatpush3.bf16.msra.mxu0 %v8418_v21 }
 0x30a   :  { %7997 = vmatprep.subr.bf16.mxu0 %v8420_v52 }
 0x30c   :  { %7950 = vmatmul.mubr.bf16.gmra.mxu0 %v8406_v28 }
 0x30d   :  { %7953 = vmatprep.mubr.bf16.mxu0 %v8407_v59  ;;  %7998 = vmatpush3.bf16.msra.mxu0 %v8420_v52 }
 0x30e   :  { %7999 = vmatprep.subr.bf16.mxu0 %v8421_v31 }
 0x311   :  { %8000 = vmatpush3.bf16.msra.mxu0 %v8421_v31 }
 0x312   :  { %8001 = vmatprep.subr.bf16.mxu0 %v8423_v23 }
 0x314   :  { %7954 = vmatmul.mubr.bf16.gmra.mxu0 %v8408_v63 }
 0x315   :  { %8002 = vmatpush3.bf16.msra.mxu0 %v8423_v23 }
 0x316   :  { %8003 = vmatprep.subr.bf16.mxu0 %v8424_v58 }
 0x319   :  { %8004 = vmatpush3.bf16.msra.mxu0 %v8424_v58 }
 0x32e   :  { %v7569_v24 = vpop.f32.mrf.mxu0 }
 0x330   :  { %v7570_v16 = vpop.f32.mrf.mxu0 }
 0x331   :  { %v7571_v41 = vadd.f32 %v7570_v16, %v7569_v24 }
 0x332   :  { %v7572_v55 = vpop.f32.mrf.mxu0 }
 0x333   :  { %v4721_v32 = vadd.f32 %v7571_v41, %v9408_v27 }
 0x334   :  { %v7573_v61 = vpop.f32.mrf.mxu0 }
 0x335   :  { %v7574_v18 = vadd.f32 %v7573_v61, %v7572_v55 }
 0x337   :  { %v4724_v62 = vadd.f32 %v7574_v18, %v9408_v27 }
 0x338   :  { %v7633_v30 = vpop.f32.mrf.mxu1 }
 0x33a   :  { %v7634_v6 = vpop.f32.mrf.mxu1 }
 0x33b   :  { %v7635_v22 = vadd.f32 %v7634_v6, %v7633_v30  ;;  %v7575_v34 = vpop.f32.mrf.mxu0 }
 0x33c   :  { %v7636_v35 = vpop.f32.mrf.mxu1 }
 0x33d   :  { %v9414_v46 = vadd.f32 %v7635_v22, %v4721_v32  ;;  %v7576_v36 = vpop.f32.mrf.mxu0 }
 0x33e   :  { %v7577_v38 = vadd.f32 %v7576_v36, %v7575_v34  ;;  %v7637_v45 = vpop.f32.mrf.mxu1 }
 0x33f   :  { %v7638_v4 = vadd.f32 %v7637_v45, %v7636_v35  ;;  %v7578_v53 = vpop.f32.mrf.mxu0 }
 0x340   :  { %v4729_v33 = vadd.f32 %v7577_v38, %v9408_v27 }
 0x341   :  { %v7639_v57 = vpop.f32.mrf.mxu1  ;;  %v9426_v0 = vadd.f32 %v7638_v4, %v4724_v62  ;;  %v7579_v39 = vpop.f32.mrf.mxu0 }
 0x342   :  { %v7580_v47 = vadd.f32 %v7579_v39, %v7578_v53 }
 0x343   :  { %v7640_v9 = vpop.f32.mrf.mxu1 }
 0x344   :  { %v7641_v29 = vadd.f32 %v7640_v9, %v7639_v57  ;;  %v7581_v1 = vpop.f32.mrf.mxu0  ;;  %v4732_v43 = vadd.f32 %v7580_v47, %v9408_v27 }
 0x345   :  { %v7642_v11 = vpop.f32.mrf.mxu1 }
 0x346   :  { %v9432_v37 = vadd.f32 %v7641_v29, %v4729_v33  ;;  %v7582_v20 = vpop.f32.mrf.mxu0 }
 0x347   :  { %v7583_v44 = vadd.f32 %v7582_v20, %v7581_v1  ;;  %v7643_v15 = vpop.f32.mrf.mxu1 }
 0x348   :  { %v7644_v25 = vadd.f32 %v7643_v15, %v7642_v11  ;;  %v7584_v40 = vpop.f32.mrf.mxu0 }
 0x349   :  { %v4737_v48 = vadd.f32 %v7583_v44, %v9408_v27 }
 0x34a   :  { %v9435_v13 = vadd.f32 %v7644_v25, %v4732_v43  ;;  %v7585_v54 = vpop.f32.mrf.mxu0 }
 0x34b   :  { %v7586_v5 = vadd.f32 %v7585_v54, %v7584_v40 }
 0x34d   :  { %v7645_v26 = vpop.f32.mrf.mxu1  ;;  %v4740_v10 = vadd.f32 %v7586_v5, %v9408_v27 }
 0x34f   :  { %v7646_v2 = vpop.f32.mrf.mxu1 }
 0x350   :  { %v7647_v7 = vadd.f32 %v7646_v2, %v7645_v26 }
 0x351   :  { %v7587_v42 = vpop.f32.mrf.mxu0  ;;  %v7648_v28 = vpop.f32.mrf.mxu1 }
 0x352   :  { %v9438_v59 = vadd.f32 %v7647_v7, %v4737_v48 }
 0x353   :  { %v7588_v8 = vpop.f32.mrf.mxu0  ;;  %v7649_v3 = vpop.f32.mrf.mxu1 }
 0x354   :  { %v7589_v63 = vadd.f32 %v7588_v8, %v7587_v42  ;;  %v7650_v14 = vadd.f32 %v7649_v3, %v7648_v28 }
 0x355   :  { %v7590_v51 = vpop.f32.mrf.mxu0 }
 0x356   :  { %v9441_v17 = vadd.f32 %v7650_v14, %v4740_v10  ;;  %v4745_v24 = vadd.f32 %v7589_v63, %v9408_v27 }
 0x357   :  { %v7591_v56 = vpop.f32.mrf.mxu0 }
 0x358   :  { %v7651_v12 = vpop.f32.mrf.mxu1  ;;  %v7592_v19 = vadd.f32 %v7591_v56, %v7590_v51 }
 0x359   :  { %v7593_v52 = vpop.f32.mrf.mxu0 }
 0x35a   :  { %v7652_v21 = vpop.f32.mrf.mxu1  ;;  %v4748_v61 = vadd.f32 %v7592_v19, %v9408_v27 }
 0x35b   :  { %v7653_v50 = vadd.f32 %v7652_v21, %v7651_v12  ;;  %v7594_v55 = vpop.f32.mrf.mxu0 }
 0x35c   :  { %v7654_v16 = vpop.f32.mrf.mxu1  ;;  %v7595_v30 = vadd.f32 %v7594_v55, %v7593_v52 }
 0x35d   :  { %v9444_v41 = vadd.f32 %v7653_v50, %v4745_v24  ;;  %v7596_v6 = vpop.f32.mrf.mxu0 }
 0x35e   :  { %v7655_v31 = vpop.f32.mrf.mxu1  ;;  %v4753_v38 = vadd.f32 %v7595_v30, %v9408_v27 }
 0x35f   :  { %v7656_v18 = vadd.f32 %v7655_v31, %v7654_v16  ;;  %v7597_v34 = vpop.f32.mrf.mxu0 }
 0x360   :  { %v7657_v32 = vpop.f32.mrf.mxu1  ;;  %v7598_v35 = vadd.f32 %v7597_v34, %v7596_v6 }
 0x361   :  { %v9447_v22 = vadd.f32 %v7656_v18, %v4748_v61 }
 0x362   :  { %v7658_v36 = vpop.f32.mrf.mxu1  ;;  %v4756_v58 = vadd.f32 %v7598_v35, %v9408_v27 }
 0x363   :  { %v7659_v45 = vadd.f32 %v7658_v36, %v7657_v32 }
 0x364   :  { %v7599_v49 = vpop.f32.mrf.mxu0  ;;  %v7660_v23 = vpop.f32.mrf.mxu1 }
 0x365   :  { %v9450_v62 = vadd.f32 %v7659_v45, %v4753_v38 }
 0x366   :  { %v7600_v4 = vpop.f32.mrf.mxu0  ;;  %v7661_v57 = vpop.f32.mrf.mxu1 }
 0x367   :  { %9934 = vst [vmem:[#allocation17_spill] sm:$0xff] %v9450_v62  ;;  %v7601_v53 = vadd.f32 %v7600_v4, %v7599_v49  ;;  %v7662_v39 = vadd.f32 %v7661_v57, %v7660_v23 }
 0x368   :  { %v7602_v47 = vpop.f32.mrf.mxu0  ;;  %v7663_v9 = vpop.f32.mrf.mxu1 }
 0x369   :  { %v9453_v33 = vadd.f32 %v7662_v39, %v4756_v58  ;;  %v4761_v20 = vadd.f32 %v7601_v53, %v9408_v27 }
 0x36a   :  { %v7603_v29 = vpop.f32.mrf.mxu0  ;;  %v7664_v11 = vpop.f32.mrf.mxu1 }
 0x36b   :  { %9935 = vst [vmem:[#allocation19_spill] sm:$0xff] %v9453_v33  ;;  %v7604_v1 = vadd.f32 %v7603_v29, %v7602_v47  ;;  %v7665_v44 = vadd.f32 %v7664_v11, %v7663_v9 }
 0x36c   :  { %v7605_v15 = vpop.f32.mrf.mxu0  ;;  %v7666_v43 = vpop.f32.mrf.mxu1 }
 0x36d   :  { %v9456_v25 = vadd.f32 %v7665_v44, %v4761_v20  ;;  %v4764_v5 = vadd.f32 %v7604_v1, %v9408_v27 }
 0x36e   :  { %v7606_v40 = vpop.f32.mrf.mxu0  ;;  %v7667_v54 = vpop.f32.mrf.mxu1 }
 0x36f   :  { %9936 = vst [vmem:[#allocation21_spill] sm:$0xff] %v9456_v25  ;;  %v7607_v26 = vadd.f32 %v7606_v40, %v7605_v15  ;;  %v7668_v2 = vadd.f32 %v7667_v54, %v7666_v43 }
 0x370   :  { %v7608_v48 = vpop.f32.mrf.mxu0  ;;  %v7669_v7 = vpop.f32.mrf.mxu1 }
 0x371   :  { %v9459_v42 = vadd.f32 %v7668_v2, %v4764_v5  ;;  %v4769_v3 = vadd.f32 %v7607_v26, %v9408_v27 }
 0x372   :  { %v7609_v28 = vpop.f32.mrf.mxu0  ;;  %v7670_v63 = vpop.f32.mrf.mxu1 }
 0x373   :  { %9937 = vst [vmem:[#allocation23_spill] sm:$0xff] %v9459_v42  ;;  %v7610_v8 = vadd.f32 %v7609_v28, %v7608_v48  ;;  %v7671_v10 = vadd.f32 %v7670_v63, %v7669_v7 }
 0x374   :  { %v7611_v14 = vpop.f32.mrf.mxu0  ;;  %v7672_v51 = vpop.f32.mrf.mxu1 }
 0x375   :  { %v9462_v12 = vadd.f32 %v7671_v10, %v4769_v3  ;;  %v4772_v24 = vadd.f32 %v7610_v8, %v9408_v27 }
 0x376   :  { %v7612_v56 = vpop.f32.mrf.mxu0  ;;  %v7673_v21 = vpop.f32.mrf.mxu1 }
 0x377   :  { %9938 = vst [vmem:[#allocation18_spill] sm:$0xff] %v9462_v12  ;;  %v7613_v19 = vadd.f32 %v7612_v56, %v7611_v14  ;;  %v7674_v50 = vadd.f32 %v7673_v21, %v7672_v51 }
 0x378   :  { %v7614_v52 = vpop.f32.mrf.mxu0  ;;  %v7675_v16 = vpop.f32.mrf.mxu1 }
 0x379   :  { %v9465_v55 = vadd.f32 %v7674_v50, %v4772_v24  ;;  %v4777_v18 = vadd.f32 %v7613_v19, %v9408_v27 }
 0x37a   :  { %v7615_v30 = vpop.f32.mrf.mxu0  ;;  %v7676_v61 = vpop.f32.mrf.mxu1 }
 0x37b   :  { %9939 = vst [vmem:[#allocation20_spill] sm:$0xff] %v9465_v55  ;;  %v9467_v31 = vadd.f32 %v7615_v30, %v7614_v52  ;;  %v7677_v6 = vadd.f32 %v7676_v61, %v7675_v16 }
 0x37c   :  { %v7697_v32 = vpop.f32.mrf.mxu0  ;;  %v9470_v34 = vpop.f32.mrf.mxu1 }
 0x37d   :  { %9940 = vst [vmem:[#allocation9_spill] sm:$0xff] %v9467_v31  ;;  %9941 = vst [vmem:[#allocation22_spill] sm:$0xff] %v9470_v34  ;;  %v9472_v35 = vadd.f32 %v7677_v6, %v4777_v18 }
 0x37e   :  { %v7698_v36 = vpop.f32.mrf.mxu0  ;;  %v9474_v38 = vpop.f32.mrf.mxu1 }
 0x37f   :  { %9942 = vst [vmem:[#allocation24_spill] sm:$0xff] %v9472_v35  ;;  %9943 = vst [vmem:[#allocation25_spill] sm:$0xff] %v9474_v38  ;;  %v7699_v45 = vadd.f32 %v7698_v36, %v7697_v32 }
 0x380   :  { %v7700_v49 = vpop.f32.mrf.mxu0  ;;  %v7761_v4 = vpop.f32.mrf.mxu1 }
 0x381   :  { %v9477_v23 = vadd.f32 %v7699_v45, %v9414_v46 }
 0x382   :  { %v7701_v53 = vpop.f32.mrf.mxu0  ;;  %v7762_v57 = vpop.f32.mrf.mxu1 }
 0x384   :  { %v7703_v58 = vpop.f32.mrf.mxu0  ;;  %v7764_v39 = vpop.f32.mrf.mxu1 }
 0x386   :  { %v7704_v47 = vpop.f32.mrf.mxu0  ;;  %v7765_v9 = vpop.f32.mrf.mxu1 }
 0x388   :  { %v7706_v29 = vpop.f32.mrf.mxu0  ;;  %v7767_v1 = vpop.f32.mrf.mxu1 }
 0x38a   :  { %v7707_v11 = vpop.f32.mrf.mxu0  ;;  %v7768_v20 = vpop.f32.mrf.mxu1 }
 0x38b   :  { %v7708_v38 = vadd.f32 %v7707_v11, %v7706_v29  ;;  %v7769_v34 = vadd.f32 %v7768_v20, %v7767_v1 }
 0x38c   :  { %v7709_v44 = vpop.f32.mrf.mxu0  ;;  %v7770_v15 = vpop.f32.mrf.mxu1 }
 0x38e   :  { %v7710_v43 = vpop.f32.mrf.mxu0  ;;  %v7771_v40 = vpop.f32.mrf.mxu1 }
 0x390   :  { %v9479_v26 = vpop.f32.mrf.mxu0  ;;  %v9481_v54 = vpop.f32.mrf.mxu1 }
 0x392   :  { %v9483_v46 = vpop.f32.mrf.mxu0  ;;  %v9485_v5 = vpop.f32.mrf.mxu1 }
 0x394   :  { %v7715_v2 = vpop.f32.mrf.mxu0  ;;  %v9487_v48 = vpop.f32.mrf.mxu1 }
 0x396   :  { %v7716_v7 = vpop.f32.mrf.mxu0  ;;  %v9489_v28 = vpop.f32.mrf.mxu1 }
 0x398   :  { %v7718_v8 = vpop.f32.mrf.mxu0  ;;  %v7779_v63 = vpop.f32.mrf.mxu1 }
 0x39a   :  { %v7719_v3 = vpop.f32.mrf.mxu0  ;;  %v7780_v10 = vpop.f32.mrf.mxu1 }
 0x39c   :  { %v9491_v14 = vpop.f32.mrf.mxu0  ;;  %v7782_v51 = vpop.f32.mrf.mxu1 }
 0x39e   :  { %v9493_v56 = vpop.f32.mrf.mxu0  ;;  %v7783_v19 = vpop.f32.mrf.mxu1 }
 0x3a0   :  { %v9495_v21 = vpop.f32.mrf.mxu0  ;;  %v9497_v24 = vpop.f32.mrf.mxu1 }
 0x3a2   :  { %v9499_v50 = vpop.f32.mrf.mxu0  ;;  %v9501_v52 = vpop.f32.mrf.mxu1 }
 0x3a4   :  { %v9503_v16 = vpop.f32.mrf.mxu0  ;;  %v9505_v30 = vpop.f32.mrf.mxu1 }
 0x3a5   :  { %9944 = vst [vmem:[#allocation27_spill] sm:$0xff] %v9505_v30  ;;  %v7705_v30 = vadd.f32 %v7704_v47, %v7703_v58  ;;  %v7717_v47 = vadd.f32 %v7716_v7, %v7715_v2 }
 0x3a6   :  { %v7728_v61 = vpop.f32.mrf.mxu0  ;;  %v9507_v18 = vpop.f32.mrf.mxu1 }
 0x3a7   :  { %9945 = vst [vmem:[#allocation26_spill] sm:$0xff] %v9507_v18 }
 0x3a8   :  { %v9509_v6 = vpop.f32.mrf.mxu0  ;;  %v9511_v32 = vpop.f32.mrf.mxu1 }
 0x3aa   :  { %v9513_v36 = vpop.f32.mrf.mxu0  ;;  %v9515_v45 = vpop.f32.mrf.mxu1 }
 0x3ac   :  { %v9517_v60 = vpop.f32.mrf.mxu0  ;;  %v9519_v55 = vpop.f32.mrf.mxu1 }
 0x3ad   :  { %9946 = vst [vmem:[#allocation28_spill] sm:$0xff] %v9517_v60  ;;  %9947 = vst [vmem:[#allocation10_spill] sm:$0xff] %v9519_v55  ;;  %v7763_v55 = vadd.f32 %v7762_v57, %v7761_v4  ;;  %v7720_v4 = vadd.f32 %v7719_v3, %v7718_v8  ;;  %v7781_v57 = vadd.f32 %v7780_v10, %v7779_v63 }
 0x3ae   :  { %v9521_v12 = vpop.f32.mrf.mxu0  ;;  %v9523_v35 = vpop.f32.mrf.mxu1  ;;  %v7793_v63 = vadd.f32 %v9515_v45, %v9511_v32  ;;  %v7726_v10 = vadd.f32 %v9499_v50, %v9495_v21  ;;  %v9961_v45 = vld [vmem:[#allocation25_spill] sm:$0xff]  ;;  %v9963_v21 = vld [vmem:[#allocation27_spill] sm:$0xff]  ;;  %v9964_v50 = vld [vmem:[#allocation26_spill] sm:$0xff] }
 0x3af   :  { %9948 = vst [vmem:[#allocation11_spill] sm:$0xff] %v9521_v12  ;;  %9949 = vst [vmem:[#allocation12_spill] sm:$0xff] %v9523_v35  ;;  %v7702_v35 = vadd.f32 %v7701_v53, %v7700_v49  ;;  %v5012_v1 = vadd.f32 %v7763_v55, %v9477_v23  ;;  %v7711_v49 = vadd.f32 %v7710_v43, %v7709_v44 }
 0x3b0   :  { %v9525_v33 = vpop.f32.mrf.mxu0  ;;  %v9529_v27 = vpop.f32.mrf.mxu1  ;;  %v7784_v55 = vadd.f32 %v7783_v19, %v7782_v51  ;;  %v7787_v51 = vadd.f32 %v9501_v52, %v9497_v24  ;;  %v9965_v24 = vld [vmem:[#allocation23_spill] sm:$0xff] }
 0x3b1   :  { %9950 = vst [vmem:[#allocation13_spill] sm:$0xff] %v9525_v33  ;;  %9952 = vst [vmem:[#allocation30_spill] sm:$0xff] %v9529_v27  ;;  %v4923_v33 = vadd.f32 %v7705_v30, %v9432_v37 }
 0x3b2   :  { %v9527_v31 = vpop.f32.mrf.mxu0  ;;  %v9535_v62 = vpop.f32.mrf.mxu1 }
 0x3b3   :  { %9951 = vst [vmem:[#allocation29_spill] sm:$0xff] %v9527_v31  ;;  %9955 = vst [vmem:[#allocation32_spill] sm:$0xff] %v9535_v62  ;;  %v7772_v31 = vadd.f32 %v7771_v40, %v7770_v15  ;;  %v5020_v58 = vadd.f32 %v7769_v34, %v4923_v33  ;;  %v7775_v33 = vadd.f32 %v9485_v5, %v9481_v54 }
 0x3b4   :  { %v9531_v42 = vpop.f32.mrf.mxu0  ;;  %v9542_v25 = vpop.f32.mrf.mxu1 }
 0x3b5   :  { %9953 = vst [vmem:[#allocation31_spill] sm:$0xff] %v9531_v42  ;;  %v7766_v42 = vadd.f32 %v7765_v9, %v7764_v39 }
 0x3b6   :  { %v9533_v18 = vpop.f32.mrf.mxu0  ;;  %v9547_v53 = vpop.f32.mrf.mxu1  ;;  %v9959_v30 = vld [vmem:[#allocation12_spill] sm:$0xff] }
 0x3b7   :  { %9954 = vst [vmem:[#allocation14_spill] sm:$0xff] %v9533_v18  ;;  %v4926_v18 = vadd.f32 %v7708_v38, %v9435_v13  ;;  %v7714_v13 = vadd.f32 %v9483_v46, %v9479_v26  ;;  %v4931_v38 = vadd.f32 %v7711_v49, %v9438_v59  ;;  %v7729_v26 = vadd.f32 %v7728_v61, %v9503_v16  ;;  %v9958_v16 = vld [vmem:[#allocation10_spill] sm:$0xff] }
 0x3b8   :  { %v9537_v60 = vpop.f32.mrf.mxu0  ;;  %v7796_v61 = vadd.f32 %v9959_v30, %v9958_v16  ;;  %v7802_v16 = vadd.f32 %v9547_v53, %v9542_v25 }
 0x3b9   :  { %9956 = vst [vmem:[#allocation33_spill] sm:$0xff] %v9537_v60  ;;  %v4918_v60 = vadd.f32 %v7702_v35, %v9426_v0  ;;  %v5023_v11 = vadd.f32 %v7772_v31, %v4926_v18  ;;  %v5028_v2 = vadd.f32 %v7775_v33, %v4931_v38  ;;  %v9968_v33 = vld [vmem:[#allocation19_spill] sm:$0xff] }
 0x3ba   :  { %v9539_v12 = vpop.f32.mrf.mxu0 }
 0x3bb   :  { %v5015_v39 = vadd.f32 %v7766_v42, %v4918_v60  ;;  %v4942_v60 = vadd.f32 %v7720_v4, %v9447_v22  ;;  %v7803_v42 = vpop.f32.mrf.mxu1  ;;  %v7732_v22 = vadd.f32 %v9513_v36, %v9509_v6  ;;  %v9960_v36 = vld [vmem:[#allocation22_spill] sm:$0xff] }
 0x3bc   :  { %v7943_v27 = vpop.f32.mrf.mxu0 }
 0x3bd   :  { %v5117_v29 = vadd.f32 %v7943_v27, %v5020_v58  ;;  %v4939_v27 = vadd.f32 %v7717_v47, %v9444_v41  ;;  %v4934_v41 = vadd.f32 %v7714_v13, %v9441_v17  ;;  %v5039_v59 = vadd.f32 %v7784_v55, %v4942_v60  ;;  %v7804_v7 = vpop.f32.mrf.mxu1  ;;  %v9962_v47 = vld [vmem:[#allocation17_spill] sm:$0xff] }
 0x3be   :  { %v5108_v62 = vpop.f32.mrf.mxu0  ;;  %v7680_v58 = vadd.f32 %v9961_v45, %v9960_v36  ;;  %v4958_v52 = vadd.f32 %v7732_v22, %v9965_v24  ;;  %v9970_v55 = vld [vmem:[#allocation14_spill] sm:$0xff]  ;;  %v9975_v22 = vld [vmem:[#allocation29_spill] sm:$0xff]  ;;  %v9980_v45 = vld [vmem:[#allocation20_spill] sm:$0xff] }
 0x3bf   :  { %v5109_v20 = vadd.f32 %v5108_v62, %v5012_v1  ;;  %v5173_v31 = vmax.f32 %v5117_v29, 0.0  ;;  %v7778_v62 = vadd.f32 %v9489_v28, %v9487_v48  ;;  %v5036_v40 = vadd.f32 %v7781_v57, %v4939_v27 }
 0x3c0   :  { %v7944_v37 = vpop.f32.mrf.mxu0  ;;  %v7723_v48 = vadd.f32 %v9493_v56, %v9491_v14  ;;  %v9957_v14 = vld [vmem:[#allocation21_spill] sm:$0xff]  ;;  %v7790_v1 = vadd.f32 %v9964_v50, %v9963_v21  ;;  %v4950_v27 = vadd.f32 %v7726_v10, %v9968_v33  ;;  %v5055_v60 = vadd.f32 %v7796_v61, %v4958_v52 }
 0x3c1   :  { %v5120_v15 = vadd.f32 %v7944_v37, %v5023_v11  ;;  %v5171_v9 = vmax.f32 %v5109_v20, 0.0  ;;  %v5031_v8 = vadd.f32 %v7778_v62, %v4934_v41  ;;  %v4955_v56 = vadd.f32 %v7729_v26, %v9957_v14  ;;  %v7806_v11 = vpop.f32.mrf.mxu1 }
 0x3c2   :  { %v5111_v0 = vpop.f32.mrf.mxu0  ;;  %v4947_v29 = vadd.f32 %v7723_v48, %v9962_v47  ;;  %v9974_v48 = vld [vmem:[#allocation13_spill] sm:$0xff] }
 0x3c3   :  { %v5174_v34 = vmax.f32 %v5120_v15, 0.0  ;;  %v5112_v35 = vadd.f32 %v5111_v0, %v5015_v39  ;;  %v5052_v20 = vadd.f32 %v7793_v63, %v4955_v56  ;;  %v9966_v15 = vld [vmem:[#allocation15_spill] sm:$0xff]  ;;  %v9967_v39 = vld [vmem:[#allocation9_spill] sm:$0xff]  ;;  %v7807_v26 = vpop.f32.mrf.mxu1  ;;  %v9977_v63 = vld [vmem:[#allocation32_spill] sm:$0xff] }
 0x3c4   :  { %v7947_v23 = vpop.f32.mrf.mxu0  ;;  %v4780_v13 = vadd.f32 %v9967_v39, %v9966_v15  ;;  %v9969_v0 = vld [vmem:[#allocation31_spill] sm:$0xff]  ;;  %v5044_v62 = vadd.f32 %v7787_v51, %v4947_v29 }
 0x3c5   :  { %v5188_v44 = vpack.c.bf16 %v5174_v34, %v5173_v31  ;;  %v5172_v43 = vmax.f32 %v5112_v35, 0.0  ;;  %v5133_v5 = vadd.f32 %v7947_v23, %v5036_v40  ;;  %v7741_v31 = vadd.f32 %v9970_v55, %v9969_v0  ;;  %v9973_v40 = vld [vmem:[#allocation33_spill] sm:$0xff] }
 0x3c6   :  { %v5124_v54 = vpop.f32.mrf.mxu0  ;;  %v4877_v23 = vadd.f32 %v7680_v58, %v4780_v13  ;;  %v7744_v41 = vadd.f32 %v9539_v12, %v9973_v40  ;;  %v7808_v12 = vadd.f32 %v7807_v26, %v7806_v11  ;;  %v8484_v13 = vmov 0  }
 0x3c7   :  { %v5187_v46 = vpack.c.bf16 %v5172_v43, %v5171_v9  ;;  %v5125_v17 = vadd.f32 %v5124_v54, %v5028_v2  ;;  %v5177_v18 = vmax.f32 %v5133_v5, 0.0  ;;  %v9971_v9 = vld [vmem:[#allocation28_spill] sm:$0xff]  ;;  %v7805_v5 = vadd.f32 %v7804_v7, %v7803_v42  ;;  %v9979_v42 = vld [vmem:[#allocation18_spill] sm:$0xff]  ;;  %8059 = vset.pattern.permute.xlu0 %v8484_v13  ;;  %8060 = vset.pattern.permute.xlu1 %v8484_v13 }
 0x3c8   :  { %v7948_v28 = vpop.f32.mrf.mxu0  ;;  %v4974_v30 = vadd.f32 %v7744_v41, %v4877_v23 }
 0x3c9   :  { %v5136_v3 = vadd.f32 %v7948_v28, %v5039_v59  ;;  %7973 = vmatprep.mubr.bf16.mxu1 %v5187_v46  ;;  %8005 = vmatprep.mubr.bf16.mxu0 %v5187_v46  ;;  %v5175_v4 = vmax.f32 %v5125_v17, 0.0  ;;  %v5047_v46 = vadd.f32 %v7790_v1, %v4950_v27  ;;  %v7738_v28 = vadd.f32 %v9975_v22, %v9974_v48 }
 0x3ca   :  { %v5127_v19 = vpop.f32.mrf.mxu0  ;;  %7974 = vmatmul.mubr.bf16.vlgmr.msra.gmra.mxu1 %v5188_v44  ;;  %8006 = vmatmul.mubr.bf16.vlgmr.msra.gmra.mxu0 %v5188_v44  ;;  %v9972_v44 = vld [vmem:[#allocation11_spill] sm:$0xff]  ;;  %v5071_v1 = vadd.f32 %v7808_v12, %v4974_v30 }
 0x3cb   :  { %v5178_v6 = vmax.f32 %v5136_v3, 0.0  ;;  %v5128_v32 = vadd.f32 %v5127_v19, %v5031_v8  ;;  %v7735_v43 = vadd.f32 %v9972_v44, %v9971_v9  ;;  %v9976_v8 = vld [vmem:[#allocation30_spill] sm:$0xff]  ;;  %v9978_v3 = vld [vmem:[#allocation24_spill] sm:$0xff]  ;;  %v4966_v58 = vadd.f32 %v7738_v28, %v9980_v45 }
 0x3cc   :  { %v7951_v49 = vpop.f32.mrf.mxu0  ;;  %v7799_v17 = vadd.f32 %v9977_v63, %v9976_v8  ;;  %v4971_v10 = vadd.f32 %v7741_v31, %v9978_v3  ;;  %v9632_v8 = vld [vmem:[#allocation5] ss:$0 sm:$0xff] }
 0x3cd   :  { %v5190_v37 = vpack.c.bf16 %v5178_v6, %v5177_v18  ;;  %v5176_v57 = vmax.f32 %v5128_v32, 0.0  ;;  %v5149_v38 = vadd.f32 %v7951_v49, %v5052_v20  ;;  %v4963_v7 = vadd.f32 %v7735_v43, %v9979_v42 }
 0x3ce   :  { %v5140_v34 = vpop.f32.mrf.mxu0  ;;  %v5068_v36 = vadd.f32 %v7805_v5, %v4971_v10  ;;  %v5063_v49 = vadd.f32 %v7802_v16, %v4966_v58 }
 0x3cf   :  { %v5189_v35 = vpack.c.bf16 %v5176_v57, %v5175_v4  ;;  %v5141_v2 = vadd.f32 %v5140_v34, %v5044_v62  ;;  %v5181_v14 = vmax.f32 %v5149_v38, 0.0  ;;  %v5060_v50 = vadd.f32 %v7799_v17, %v4963_v7 }
 0x3d0   :  { %v7952_v54 = vpop.f32.mrf.mxu0 }
 0x3d1   :  { %v5152_v59 = vadd.f32 %v7952_v54, %v5055_v60  ;;  %7977 = vmatprep.mubr.bf16.mxu1 %v5189_v35  ;;  %8009 = vmatprep.mubr.bf16.mxu0 %v5189_v35  ;;  %v5179_v18 = vmax.f32 %v5141_v2, 0.0  ;;  %v9612_v35 = vld [vmem:[#allocation4] ss:$0 sm:$0xff] }
 0x3d2   :  { %v5143_v51 = vpop.f32.mrf.mxu0  ;;  %7978 = vmatmul.mubr.bf16.gmra.mxu1 %v5190_v37  ;;  %8010 = vmatmul.mubr.bf16.gmra.mxu0 %v5190_v37 }
 0x3d3   :  { %v5182_v56 = vmax.f32 %v5152_v59, 0.0  ;;  %v5144_v19 = vadd.f32 %v5143_v51, %v5047_v46 }
 0x3d4   :  { %v7955_v61 = vpop.f32.mrf.mxu0 }
 0x3d5   :  { %v5192_v6 = vpack.c.bf16 %v5182_v56, %v5181_v14  ;;  %v5180_v32 = vmax.f32 %v5144_v19, 0.0  ;;  %v5165_v21 = vadd.f32 %v7955_v61, %v5068_v36 }
 0x3d6   :  { %v5156_v47 = vpop.f32.mrf.mxu0 }
 0x3d7   :  { %v5191_v29 = vpack.c.bf16 %v5180_v32, %v5179_v18  ;;  %v5157_v52 = vadd.f32 %v5156_v47, %v5060_v50  ;;  %v5185_v53 = vmax.f32 %v5165_v21, 0.0 }
 0x3d8   :  { %v7956_v24 = vpop.f32.mrf.mxu0 }
 0x3d9   :  { %v5168_v11 = vadd.f32 %v7956_v24, %v5071_v1  ;;  %7981 = vmatprep.mubr.bf16.mxu1 %v5191_v29  ;;  %8013 = vmatprep.mubr.bf16.mxu0 %v5191_v29  ;;  %v5183_v57 = vmax.f32 %v5157_v52, 0.0 }
 0x3da   :  { %v5159_v25 = vpop.f32.mrf.mxu0  ;;  %7982 = vmatmul.mubr.bf16.gmra.mxu1 %v5192_v6  ;;  %8014 = vmatmul.mubr.bf16.gmra.mxu0 %v5192_v6 }
 0x3db   :  { %v5186_v4 = vmax.f32 %v5168_v11, 0.0  ;;  %v5160_v37 = vadd.f32 %v5159_v25, %v5063_v49 }
 0x3dd   :  { %v5194_v20 = vpack.c.bf16 %v5186_v4, %v5185_v53  ;;  %v5184_v15 = vmax.f32 %v5160_v37, 0.0 }
 0x3df   :  { %v5193_v39 = vpack.c.bf16 %v5184_v15, %v5183_v57 }
 0x3e1   :  { %7985 = vmatprep.mubr.bf16.mxu1 %v5193_v39  ;;  %8017 = vmatprep.mubr.bf16.mxu0 %v5193_v39 }
 0x3e2   :  { %7986 = vmatmul.mubr.bf16.gmra.mxu1 %v5194_v20  ;;  %8018 = vmatmul.mubr.bf16.gmra.mxu0 %v5194_v20 }
 0x3e3   :  { %6079 = vmatprep.mubr.bf16.mxu0 %v8484_v13 }
 0x48a   :  { %v9600_v33 = vpop.f32.mrf.mxu1  ;;  %v9602_v27 = vpop.f32.mrf.mxu0 }
 0x48c   :  { %v9604_v0 = vpop.f32.mrf.mxu1  ;;  %v9606_v55 = vpop.f32.mrf.mxu0 }
 0x48e   :  { %v9608_v31 = vpop.f32.mrf.mxu1  ;;  %v9610_v34 = vpop.f32.mrf.mxu0 }
 0x490   :  { %v5296_v38 = vpop.f32.mrf.mxu1  ;;  %v9614_v62 = vpop.f32.mrf.mxu0 }
 0x491   :  { %v9617_v60 = vadd.f32 %v9612_v35, %v5296_v38 }
 0x492   :  { %v7979_v23 = vpop.f32.mrf.mxu1  ;;  %v9619_v9 = vpop.f32.mrf.mxu0 }
 0x493   :  { %v5369_v44 = vadd.f32 %v7979_v23, %v9612_v35 }
 0x494   :  { %v9622_v43 = vpop.f32.mrf.mxu1  ;;  %v9624_v40 = vpop.f32.mrf.mxu0 }
 0x495   :  { %v5385_v41 = vmax.f32 %v5369_v44, 0.0 }
 0x496   :  { %v7980_v26 = vpop.f32.mrf.mxu1  ;;  %v8012_v54 = vpop.f32.mrf.mxu0 }
 0x497   :  { %v5370_v46 = vadd.f32 %v7980_v26, %v9612_v35  ;;  %5659 = vperm.xlu0 %8059, %v5385_v41   ;;  %v5570_v25 = vadd.f32 %v8012_v54, %v9632_v8  ;;  %v5569_v41 = vadd.f32 %v9619_v9, %v9632_v8  ;;  %v5567_v9 = vadd.f32 %v9632_v8, %v9624_v40 }
 0x498   :  { %v9627_v5 = vpop.f32.mrf.mxu1  ;;  %v9629_v2 = vpop.f32.mrf.mxu0  ;;  %v5565_v40 = vadd.f32 %v9602_v27, %v9632_v8  ;;  %v5563_v27 = vadd.f32 %v9632_v8, %v9606_v55  ;;  %v8425_v55 = vld [vmem:[%s9863_s15 + $0x60] ss:$16 sps:$4 sm:$0xff]  }
 0x499   :  { %v5386_v59 = vmax.f32 %v5370_v46, 0.0  ;;  %v5586_v15 = vmax.f32 %v5570_v25, 0.0  ;;  %v7269_v25 = vld [vmem:[%s9860_s12 + $0x38] sm:$0xff]  }
 0x49a   :  { %v7983_v48 = vpop.f32.mrf.mxu1  ;;  %v8015_v22 = vpop.f32.mrf.mxu0 }
 0x49b   :  { %v5373_v28 = vadd.f32 %v7983_v48, %v9612_v35  ;;  %5664 = vperm.xlu1 %8060, %v5386_v59   ;;  %v5573_v10 = vadd.f32 %v8015_v22, %v9632_v8  ;;  %v5585_v48 = vmax.f32 %v5569_v41, 0.0  ;;  %v5367_v22 = vadd.f32 %v9612_v35, %v9622_v43  ;;  %v7268_v41 = vld [vmem:[%s9860_s12 + $0x30] sm:$0xff]  }
 0x49c   :  { %v5325_v63 = vpop.f32.mrf.mxu1  ;;  %v5525_v17 = vpop.f32.mrf.mxu0 }
 0x49d   :  { %v5389_v3 = vmax.f32 %v5373_v28, 0.0  ;;  %v5589_v56 = vmax.f32 %v5573_v10, 0.0  ;;  %v5371_v19 = vadd.f32 %v9612_v35, %v5325_v63  ;;  %v5571_v61 = vadd.f32 %v9632_v8, %v5525_v17 }
 0x49e   :  { %v7984_v51 = vpop.f32.mrf.mxu1  ;;  %v8016_v12 = vpop.f32.mrf.mxu0  ;;  %v5383_v17 = vmax.f32 %v5367_v22, 0.0  ;;  %v7261_v22 = vld [vmem:[%s9859_s11 + $0x30] sm:$0xff]  }
 0x49f   :  { %v5374_v14 = vadd.f32 %v7984_v51, %v9612_v35  ;;  %5679 = vperm.xlu0 %8059, %v5389_v3   ;;  %v5574_v7 = vadd.f32 %v8016_v12, %v9632_v8  ;;  %v5387_v30 = vmax.f32 %v5371_v19, 0.0  ;;  %v5587_v45 = vmax.f32 %v5571_v61, 0.0 }
 0x4a0   :  { %v5328_v16 = vpop.f32.mrf.mxu1  ;;  %v5528_v32 = vpop.f32.mrf.mxu0  ;;  %v5368_v3 = vadd.f32 %v9612_v35, %v9627_v5  ;;  %v5365_v51 = vadd.f32 %v9600_v33, %v9612_v35  ;;  %v5583_v12 = vmax.f32 %v5567_v9, 0.0  ;;  %v5366_v5 = vadd.f32 %v9608_v31, %v9612_v35 }
 0x4a1   :  { %v5390_v42 = vmax.f32 %v5374_v14, 0.0  ;;  %v5590_v18 = vmax.f32 %v5574_v7, 0.0  ;;  %v5372_v6 = vadd.f32 %v9612_v35, %v5328_v16  ;;  %v5572_v47 = vadd.f32 %v9632_v8, %v5528_v32  ;;  %v8442_v32 = vld [vmem:[%s9863_s15 + $0x4] ss:$16 sps:$4 sm:$0xff]  }
 0x4a2   :  { %v7987_v36 = vpop.f32.mrf.mxu1  ;;  %v8019_v21 = vpop.f32.mrf.mxu0  ;;  %v5384_v43 = vmax.f32 %v5368_v3, 0.0  ;;  %v5568_v14 = vadd.f32 %v9632_v8, %v9629_v2  ;;  %v5363_v33 = vadd.f32 %v9612_v35, %v9604_v0  ;;  %v5382_v7 = vmax.f32 %v5366_v5, 0.0 }
 0x4a3   :  { %5807 = vperm.xlu0 %8059, %v5589_v56   ;;  %5684 = vperm.xlu1 %8060, %v5390_v42   ;;  %v5388_v58 = vmax.f32 %v5372_v6, 0.0  ;;  %v5377_v29 = vadd.f32 %v7987_v36, %v9612_v35  ;;  %v5588_v1 = vmax.f32 %v5572_v47, 0.0  ;;  %v5577_v52 = vadd.f32 %v8019_v21, %v9632_v8  ;;  %v8431_v6 = vld [vmem:[%s9863_s15 + $0x20] ss:$16 sps:$4 sm:$0xff]  }
 0x4a4   :  { %v5341_v50 = vpop.f32.mrf.mxu1  ;;  %v5541_v49 = vpop.f32.mrf.mxu0  ;;  %v5381_v56 = vmax.f32 %v5365_v51, 0.0  ;;  %v5584_v19 = vmax.f32 %v5568_v14, 0.0  ;;  %v5581_v42 = vmax.f32 %v5565_v40, 0.0  ;;  %v5566_v2 = vadd.f32 %v9610_v34, %v9632_v8  ;;  %v9981_v34 = vld [vmem:[#allocation16_spill] sm:$0xff] }
 0x4a5   :  { %v5393_v24 = vmax.f32 %v5377_v29, 0.0  ;;  %v5375_v11 = vadd.f32 %v9612_v35, %v5341_v50  ;;  %v5593_v53 = vmax.f32 %v5577_v52, 0.0  ;;  %v5575_v37 = vadd.f32 %v9632_v8, %v5541_v49  ;;  %8037 = vmatprep.mubr.msk.bf16.mxu1 %vm8485_vm3, %v9981_v34  ;;  %v8440_v36 = vld [vmem:[%s9863_s15] ss:$16 sps:$4 sm:$0xff]  }
 0x4a6   :  { %v7988_v57 = vpop.f32.mrf.mxu1  ;;  %v8020_v20 = vpop.f32.mrf.mxu0  ;;  %v5379_v16 = vmax.f32 %v5363_v33, 0.0  ;;  %v5579_v31 = vmax.f32 %v5563_v27, 0.0  ;;  %v5380_v61 = vmax.f32 %v9617_v60, 0.0  ;;  %v8428_v60 = vld [vmem:[%s9863_s15 + $0x40] ss:$16 sps:$4 sm:$0xff]   ;;  %v7251_v40 = vunpack.c.h.bf16 %v7268_v41 }
 0x4a7   :  { %5669 = vperm.xlu0 %8059, %v5387_v30   ;;  %5812 = vperm.xlu1 %8060, %v5590_v18   ;;  %v5391_v4 = vmax.f32 %v5375_v11, 0.0  ;;  %v5591_v39 = vmax.f32 %v5575_v37, 0.0  ;;  %v5378_v38 = vadd.f32 %v7988_v57, %v9612_v35  ;;  %v5578_v23 = vadd.f32 %v8020_v20, %v9632_v8  ;;  %v7262_v37 = vld [vmem:[%s9859_s11 + $0x38] sm:$0xff]  }
 0x4a8   :  { %v5344_v44 = vpop.f32.mrf.mxu1  ;;  %v5544_v59 = vpop.f32.mrf.mxu0  ;;  %v5582_v30 = vmax.f32 %v5566_v2, 0.0  ;;  %v5564_v18 = vadd.f32 %v9632_v8, %v9614_v62  ;;  %v8430_v62 = vld [vmem:[%s9863_s15 + $0x44] ss:$16 sps:$4 sm:$0xff]   ;;  %v7254_v57 = vunpack.c.l.bf16 %v7269_v25 }
 0x4a9   :  { %v5394_v26 = vmax.f32 %v5378_v38, 0.0  ;;  %v5594_v54 = vmax.f32 %v5578_v23, 0.0  ;;  %v5376_v46 = vadd.f32 %v9612_v35, %v5344_v44  ;;  %v5576_v63 = vadd.f32 %v9632_v8, %v5544_v59  ;;  %v8427_v35 = vld [vmem:[%s9863_s15 + $0x64] ss:$16 sps:$4 sm:$0xff]  }
 0x4aa   :  { %v5580_v0 = vmax.f32 %v5564_v18, 0.0  ;;  %6055 = vmatprep.subr.bf16.mxu0 %v8427_v35  ;;  %v8433_v8 = vld [vmem:[%s9863_s15 + $0x24] ss:$16 sps:$4 sm:$0xff]   ;;  %v7255_v38 = vunpack.c.h.bf16 %v7269_v25  ;;  %v7223_v23 = vunpack.c.h.bf16 %v7262_v37 }
 0x4ab   :  { %5797 = vperm.xlu0 %8059, %v5587_v45   ;;  %5674 = vperm.xlu1 %8060, %v5388_v58   ;;  %v5392_v28 = vmax.f32 %v5376_v46, 0.0  ;;  %v5592_v10 = vmax.f32 %v5576_v63, 0.0 }
 0x4ac   :  { %6056 = vmatpush1.bf16.msra.mxu0 %v8425_v55 }
 0x4ad   :  { %6057 = vmatprep.subr.bf16.mxu0 %v8430_v62  ;;  %v7258_v62 = vld [vmem:[%s9859_s11 + $0x18] sm:$0xff]  }
 0x4af   :  { %5802 = vperm.xlu1 %8060, %v5588_v1   ;;  %5699 = vperm.xlu0 %8059, %v5393_v24  }
 0x4b0   :  { %6058 = vmatpush1.bf16.msra.mxu0 %v8428_v60 }
 0x4b1   :  { %6059 = vmatprep.subr.bf16.mxu0 %v8433_v8 }
 0x4b3   :  { %5827 = vperm.xlu1 %8060, %v5593_v53   ;;  %5689 = vperm.xlu0 %8059, %v5391_v4  }
 0x4b4   :  { %6060 = vmatpush1.bf16.msra.mxu0 %v8431_v6 }
 0x4b5   :  { %6061 = vmatprep.subr.bf16.mxu0 %v8442_v32 }
 0x4b7   :  { %5792 = vperm.xlu1 %8060, %v5586_v15   ;;  %5817 = vperm.xlu0 %8059, %v5591_v39   ;;  %v7222_v39 = vunpack.c.l.bf16 %v7262_v37 }
 0x4b8   :  { %6062 = vmatpush1.bf16.msra.mxu0 %v8440_v36 }
 0x4b9   :  { %8041 = vmatprep.subr.bf16.mxu0 %v9981_v34 }
 0x4bb   :  { %5832 = vperm.xlu1 %8060, %v5594_v54   ;;  %5704 = vperm.xlu0 %8059, %v5394_v26  }
 0x4bf   :  { %5787 = vperm.xlu0 %8059, %v5585_v48   ;;  %5694 = vperm.xlu1 %8060, %v5392_v28   ;;  %v7267_v28 = vld [vmem:[%s9860_s12 + $0x28] sm:$0xff]  }
 0x4c0   :  { %v7247_v3 = vunpack.c.h.bf16 %v7267_v28  ;;  %v7246_v5 = vunpack.c.l.bf16 %v7267_v28 }
 0x4c3   :  { %5649 = vperm.xlu0 %8059, %v5383_v17   ;;  %5822 = vperm.xlu1 %8060, %v5592_v10   ;;  %v7250_v17 = vunpack.c.l.bf16 %v7268_v41 }
 0x4c7   :  { %5777 = vperm.xlu0 %8059, %v5583_v12   ;;  %5654 = vperm.xlu1 %8060, %v5384_v43   ;;  %v7260_v12 = vld [vmem:[%s9859_s11 + $0x28] sm:$0xff]   ;;  %v7218_v43 = vunpack.c.l.bf16 %v7261_v22 }
 0x4cb   :  { %5639 = vperm.xlu0 %8059, %v5381_v56   ;;  %5782 = vperm.xlu1 %8060, %v5584_v19   ;;  %v7219_v56 = vunpack.c.h.bf16 %v7261_v22  ;;  %v7215_v19 = vunpack.c.h.bf16 %v7260_v12 }
 0x4cf   :  { %5767 = vperm.xlu0 %8059, %v5581_v42   ;;  %5644 = vperm.xlu1 %8060, %v5382_v7   ;;  %v7266_v42 = vld [vmem:[%s9860_s12 + $0x20] sm:$0xff]   ;;  %v7214_v7 = vunpack.c.l.bf16 %v7260_v12 }
 0x4d0   :  { %v7243_v2 = vunpack.c.h.bf16 %v7266_v42  ;;  %v7242_v55 = vunpack.c.l.bf16 %v7266_v42 }
 0x4d3   :  { %5629 = vperm.xlu0 %8059, %v5379_v16   ;;  %5772 = vperm.xlu1 %8060, %v5582_v30   ;;  %v7259_v30 = vld [vmem:[%s9859_s11 + $0x20] sm:$0xff]  }
 0x4d4   :  { %v7211_v35 = vunpack.c.h.bf16 %v7259_v30  ;;  %v7210_v36 = vunpack.c.l.bf16 %v7259_v30 }
 0x4d7   :  { %5757 = vperm.xlu0 %8059, %v5579_v31   ;;  %5634 = vperm.xlu1 %8060, %v5380_v61  }
 0x4db   :  { %5762 = vperm.xlu1 %8060, %v5580_v0  }
 0x512   :  { %v9702_v45 = vpop.permute.xlu0 %5659 }
 0x516   :  { %v9704_v58 = vpop.permute.xlu1 %5664 }
 0x51a   :  { %v9706_v47 = vpop.permute.xlu0 %5679 }
 0x51e   :  { %v5808_v29 = vpop.permute.xlu0 %5807  ;;  %v5685_v21 = vpop.permute.xlu1 %5684 }
 0x51f   :  { %v5845_v60 = vmul.f32 %v7246_v5, %v5808_v29  ;;  %v5718_v8 = vmul.f32 %v7215_v19, %v5685_v21 }
 0x522   :  { %v9708_v50 = vpop.permute.xlu0 %5669  ;;  %v5813_v1 = vpop.permute.xlu1 %5812 }
 0x523   :  { %v5846_v31 = vmul.f32 %v7247_v3, %v5813_v1 }
 0x526   :  { %v9710_v24 = vpop.permute.xlu0 %5797  ;;  %v9712_v52 = vpop.permute.xlu1 %5674 }
 0x527   :  { %v5843_v29 = vmul.f32 %v7242_v55, %v9710_v24  ;;  %v5716_v21 = vmul.f32 %v7211_v35, %v9712_v52  ;;  %v7257_v52 = vld [vmem:[%s9859_s11 + $0x10] sm:$0xff]  }
 0x52a   :  { %v5803_v11 = vpop.permute.xlu1 %5802  ;;  %v5700_v49 = vpop.permute.xlu0 %5699 }
 0x52b   :  { %v5721_v46 = vmul.f32 %v7222_v39, %v5700_v49  ;;  %v5844_v37 = vmul.f32 %v7243_v2, %v5803_v11  ;;  %v5715_v11 = vmul.f32 %v7210_v36, %v9708_v50  ;;  %v7202_v50 = vunpack.c.l.bf16 %v7257_v52 }
 0x52d   :  { %v5860_v24 = vadd.f32 %v5844_v37, %v5716_v21  ;;  %v5859_v28 = vadd.f32 %v5843_v29, %v5715_v11  ;;  %v8436_v21 = vld [vmem:[%s9863_s15 + $0x6c] ss:$16 sps:$4 sm:$0xff]   ;;  %v8443_v11 = vld [vmem:[%s9863_s15 + $0x28] ss:$16 sps:$4 sm:$0xff]  }
 0x52e   :  { %v5828_v53 = vpop.permute.xlu1 %5827  ;;  %v5690_v4 = vpop.permute.xlu0 %5689 }
 0x52f   :  { %v5849_v44 = vmul.f32 %v7254_v57, %v5828_v53  ;;  %v5719_v61 = vmul.f32 %v7218_v43, %v5690_v4  ;;  %v5717_v53 = vmul.f32 %v7214_v7, %v9706_v47  ;;  %v5862_v4 = vadd.f32 %v5846_v31, %v5718_v8  ;;  %v9755_v47 = vld [vmem:[#allocation2 + $0x48] sm:$0xff] }
 0x530   :  { %v5872_v43 = vpack.c.bf16 %v5860_v24, %v5859_v28  ;;  %v6879_v24 = vld [vmem:[%s9862_s14] ss:$0 sm:$0xff] }
 0x531   :  { %v5865_v63 = vadd.f32 %v5849_v44, %v5721_v46  ;;  %v5861_v39 = vadd.f32 %v5845_v60, %v5717_v53  ;;  %v7207_v44 = vunpack.c.h.bf16 %v7258_v62 }
 0x532   :  { %v9720_v20 = vpop.permute.xlu1 %5792  ;;  %v5818_v15 = vpop.permute.xlu0 %5817 }
 0x533   :  { %v5847_v33 = vmul.f32 %v7250_v17, %v5818_v15  ;;  %v7206_v15 = vunpack.c.l.bf16 %v7258_v62  ;;  %v5873_v46 = vpack.c.bf16 %v5862_v4, %v5861_v39  ;;  %v7203_v17 = vunpack.c.h.bf16 %v7257_v52 }
 0x534   :  { %v5714_v12 = vmul.f32 %v7207_v44, %v9704_v58  ;;  %v7225_v58 = vld [vmem:[%s9860_s12] sm:$0xff]   ;;  %v8434_v44 = vld [vmem:[%s9863_s15 + $0x68] ss:$16 sps:$4 sm:$0xff]  }
 0x535   :  { %v5863_v6 = vadd.f32 %v5847_v33, %v5719_v61  ;;  %v5713_v22 = vmul.f32 %v7206_v15, %v9702_v45  ;;  %v7256_v45 = vld [vmem:[%s9859_s11 + $0x8] sm:$0xff]   ;;  %v7193_v61 = vld [vmem:[%s9859_s11] sm:$0xff]   ;;  %v7226_v62 = vunpack.c.l.bf16 %v7225_v58 }
 0x536   :  { %v5833_v26 = vpop.permute.xlu1 %5832  ;;  %v5705_v54 = vpop.permute.xlu0 %5704  ;;  %v7199_v42 = vunpack.c.h.bf16 %v7256_v45  ;;  %v7198_v33 = vunpack.c.l.bf16 %v7256_v45  ;;  %v7194_v60 = vunpack.c.l.bf16 %v7193_v61 }
 0x537   :  { %v5850_v59 = vmul.f32 %v7255_v38, %v5833_v26  ;;  %v5722_v48 = vmul.f32 %v7223_v23, %v5705_v54  ;;  %v7264_v23 = vld [vmem:[%s9860_s12 + $0x10] sm:$0xff]  }
 0x538   :  { %v7235_v26 = vunpack.c.h.bf16 %v7264_v23 }
 0x539   :  { %v5866_v9 = vadd.f32 %v5850_v59, %v5722_v48  ;;  %v7234_v48 = vunpack.c.l.bf16 %v7264_v23  ;;  %v5867_v23 = vld [vmem:[%s9861_s13] sm:$0x1] }
 0x53a   :  { %v5788_v10 = vpop.permute.xlu0 %5787  ;;  %v5695_v51 = vpop.permute.xlu1 %5694 }
 0x53b   :  { %v5875_v14 = vpack.c.bf16 %v5866_v9, %v5865_v63  ;;  %v5720_v18 = vmul.f32 %v7219_v56, %v5695_v51  ;;  %v7263_v9 = vld [vmem:[%s9860_s12 + $0x8] sm:$0xff]  }
 0x53c   :  { %v7230_v56 = vunpack.c.l.bf16 %v7263_v9 }
 0x53d   :  { %8022 = vmatpush3.bf16.msra.mxu1 %v5875_v14 }
 0x53e   :  { %v9737_v16 = vpop.permute.xlu0 %5649  ;;  %v5823_v27 = vpop.permute.xlu1 %5822  ;;  %8023 = vmatprep.subr.bf16.mxu1 %v9981_v34  ;;  %v7265_v34 = vld [vmem:[%s9860_s12 + $0x18] sm:$0xff]  }
 0x53f   :  { %v5848_v0 = vmul.f32 %v7251_v40, %v5823_v27  ;;  %v7238_v49 = vunpack.c.l.bf16 %v7265_v34  ;;  %v7239_v38 = vunpack.c.h.bf16 %v7265_v34  ;;  %v5711_v30 = vmul.f32 %v7202_v50, %v9737_v16  ;;  %v8450_v50 = vld [vmem:[%s9865_s17 + $0x10] sm:$0xff]  }
 0x540   :  { %v7195_v34 = vunpack.c.h.bf16 %v7193_v61 }
 0x541   :  { %v5864_v32 = vadd.f32 %v5848_v0, %v5720_v18  ;;  %v5841_v59 = vmul.f32 %v7238_v49, %v5788_v10  ;;  %v5842_v63 = vmul.f32 %v7239_v38, %v9720_v20  ;;  %v7231_v10 = vunpack.c.h.bf16 %v7263_v9 }
 0x542   :  { %v5778_v1 = vpop.permute.xlu0 %5777  ;;  %v5655_v25 = vpop.permute.xlu1 %5654  ;;  %v7227_v49 = vunpack.c.h.bf16 %v7225_v58 }
 0x543   :  { %v5874_v57 = vpack.c.bf16 %v5864_v32, %v5863_v6  ;;  %v5857_v14 = vadd.f32 %v5841_v59, %v5713_v22  ;;  %v5858_v40 = vadd.f32 %v5842_v63, %v5714_v12  ;;  %v5839_v5 = vmul.f32 %v7234_v48, %v5778_v1  ;;  %v8449_v63 = vld [vmem:[%s9865_s17 + $0x18] sm:$0xff]  }
 0x544   :  { %v5712_v19 = vmul.f32 %v7203_v17, %v5655_v25 }
 0x545   :  { %8024 = vmatpush3.bf16.msra.mxu1 %v5874_v57  ;;  %v5871_v27 = vpack.c.bf16 %v5858_v40, %v5857_v14  ;;  %v5855_v0 = vadd.f32 %v5839_v5, %v5711_v30  ;;  %v5941_v5 = vld [vmem:[%s9864_s16] sm:$0xf] }
 0x546   :  { %v5640_v41 = vpop.permute.xlu0 %5639  ;;  %v5783_v54 = vpop.permute.xlu1 %5782  ;;  %8025 = vmatprep.subr.bf16.mxu1 %v9755_v47 }
 0x547   :  { %v5840_v20 = vmul.f32 %v7235_v26, %v5783_v54  ;;  %v5709_v32 = vmul.f32 %v7198_v33, %v5640_v41  ;;  %v8439_v41 = vld [vmem:[%s9863_s15 + $0x4c] ss:$16 sps:$4 sm:$0xff]   ;;  %v8437_v26 = vld [vmem:[%s9863_s15 + $0x48] ss:$16 sps:$4 sm:$0xff]  }
 0x548   :  { %v8445_v54 = vld [vmem:[%s9863_s15 + $0x2c] ss:$16 sps:$4 sm:$0xff]  }
 0x549   :  { %8026 = vmatpush3.bf16.msra.mxu1 %v5873_v46  ;;  %v5856_v31 = vadd.f32 %v5840_v20, %v5712_v19  ;;  %v8446_v46 = vld [vmem:[%s9863_s15 + $0x8] ss:$16 sps:$4 sm:$0xff]  }
 0x54a   :  { %v5768_v3 = vpop.permute.xlu0 %5767  ;;  %v5645_v51 = vpop.permute.xlu1 %5644  ;;  %8027 = vmatprep.subr.bf16.mxu1 %v9755_v47 }
 0x54b   :  { %v5837_v55 = vmul.f32 %v7230_v56, %v5768_v3  ;;  %v5710_v35 = vmul.f32 %v7199_v42, %v5645_v51  ;;  %v5870_v36 = vpack.c.bf16 %v5856_v31, %v5855_v0  ;;  %v8451_v3 = vld [vmem:[%s9865_s17 + $0x8] sm:$0xff]   ;;  %v8452_v51 = vld [vmem:[%s9865_s17] sm:$0xff]  }
 0x54d   :  { %8028 = vmatpush3.bf16.msra.mxu1 %v5872_v43  ;;  %v5853_v1 = vadd.f32 %v5837_v55, %v5709_v32  ;;  %v8486_v43 = vmov 1983009808  }
 0x54e   :  { %v5630_v7 = vpop.permute.xlu0 %5629  ;;  %v5773_v2 = vpop.permute.xlu1 %5772  ;;  %8029 = vmatprep.subr.bf16.mxu1 %v9755_v47  ;;  %v6136_v14 = vunpack.c.l.s4 %v8486_v43 }
 0x54f   :  { %v5838_v18 = vmul.f32 %v7231_v10, %v5773_v2  ;;  %v5707_v4 = vmul.f32 %v7194_v60, %v5630_v7  ;;  %v5943_v10 = vlaneseq }
 0x550   :  { %v6137_v19 = vunpack.c.0.s8 %v6136_v14 }
 0x551   :  { %8030 = vmatpush3.bf16.msra.mxu1 %v5871_v27  ;;  %v5854_v16 = vadd.f32 %v5838_v18, %v5710_v35  ;;  %v5944_v12 = vshrl.u32 %v5943_v10, 7 }
 0x552   :  { %v5758_v8 = vpop.permute.xlu0 %5757  ;;  %v5635_v6 = vpop.permute.xlu1 %5634  ;;  %8031 = vmatprep.subr.bf16.mxu1 %v9755_v47 }
 0x553   :  { %v5835_v25 = vmul.f32 %v7226_v62, %v5758_v8  ;;  %v5869_v37 = vpack.c.bf16 %v5854_v16, %v5853_v1  ;;  %v5708_v57 = vmul.f32 %v7195_v34, %v5635_v6  ;;  %v5945_v45 = vsub.s32 0, %v5944_v12 }
 0x554   :  { %v5953_v20 = vsub.s32 2, %v5944_v12  ;;  %v5949_v56 = vsub.s32 1, %v5944_v12  ;;  %v5957_v40 = vsub.s32 3, %v5944_v12  ;;  %v6140_v30 = vsub.s32 %v6137_v19, %v5944_v12 }
 0x555   :  { %8032 = vmatpush3.bf16.msra.mxu1 %v5870_v36  ;;  %v5851_v39 = vadd.f32 %v5835_v25, %v5707_v4  ;;  %v5946_v42 = vrot.slane %v5941_v5, %v5945_v45 }
 0x556   :  { %v5763_v53 = vpop.permute.xlu1 %5762  ;;  %8033 = vmatprep.subr.bf16.mxu1 %v9755_v47  ;;  %v5954_v33 = vrot.slane %v5941_v5, %v5953_v20  ;;  %v5950_v7 = vrot.slane %v5941_v5, %v5949_v56 }
 0x557   :  { %v5836_v15 = vmul.f32 %v7227_v49, %v5763_v53  ;;  %v6898_v49 = vld [vmem:[%s9866_s18] ss:$0 sm:$0xff]  ;;  %s8487_s18 = smov [#allocation6]  }
 0x559   :  { %v5852_v29 = vadd.f32 %v5836_v15, %v5708_v57  ;;  %8034 = vmatpush3.bf16.msra.mxu1 %v5869_v37 }
 0x55a   :  { %8035 = vmatprep.subr.bf16.mxu1 %v9755_v47 }
 0x55b   :  { %v5868_v38 = vpack.c.bf16 %v5852_v29, %v5851_v39 }
 0x55d   :  { %8036 = vmatpush3.bf16.msra.mxu1 %v5868_v38 }
 0x55e   :  { %6096 = vmatprep.subr.bf16.mxu1 %v8436_v21 }
 0x560   :  { %8038 = vmatmul.mubr.bf16.vlgmr.msra.gmra.mxu1 %v5867_v23 }
 0x561   :  { %6097 = vmatpush1.bf16.msra.mxu1 %v8434_v44  ;;  %6120 = vmatprep.mubr.bf16.mxu1 %v8484_v13  ;;  %v8448_v13 = vld [vmem:[%s9863_s15 + $0xc] ss:$16 sps:$4 sm:$0xff]  }
 0x562   :  { %6098 = vmatprep.subr.bf16.mxu1 %v8439_v41 }
 0x565   :  { %6099 = vmatpush1.bf16.msra.mxu1 %v8437_v26 }
 0x566   :  { %6100 = vmatprep.subr.bf16.mxu1 %v8445_v54 }
 0x569   :  { %6101 = vmatpush1.bf16.msra.mxu1 %v8443_v11 }
 0x56a   :  { %6102 = vmatprep.subr.bf16.mxu1 %v8448_v13 }
 0x56d   :  { %6103 = vmatpush1.bf16.msra.mxu1 %v8446_v46 }
 0x620   :  { %v5917_v59 = vpop.f32.mrf.mxu1 }
 0x621   :  { %v5918_v52 = vadd.f32 %v6879_v24, %v5917_v59 }
 0x622   :  { %v8039_v48 = vpop.f32.mrf.mxu1 }
 0x623   :  { %v5923_v22 = vmax.f32 %v5918_v52, 0.0 }
 0x624   :  { %v5920_v28 = vpop.f32.mrf.mxu1 }
 0x625   :  { %v5924_v17 = vpack.c.bf16 %v5923_v22, %v5923_v22 }
 0x626   :  { %v8040_v9 = vpop.f32.mrf.mxu1 }
 0x627   :  { %6896 = vmatmul.mubr.msk.bf16.vlgmr.msra.gmra.mxu0 %vm6043_vm4, %v5924_v17  ;;  %6897 = vmatmul.mubr.msk.bf16.vlgmr.msra.gmra.mxu1 %vm6043_vm4, %v5924_v17 }
 0x628   :  { %8042 = vmatpush3.bf16.msra.mxu0 %v8449_v63  ;;  %8049 = vmatprep.mubr.msk.bf16.mxu0 %vm8485_vm3, %v9755_v47 }
 0x629   :  { %8043 = vmatprep.subr.bf16.mxu0 %v9755_v47 }
 0x62c   :  { %8044 = vmatpush3.bf16.msra.mxu0 %v8450_v50 }
 0x62d   :  { %8045 = vmatprep.subr.bf16.mxu0 %v9755_v47 }
 0x630   :  { %8046 = vmatpush3.bf16.msra.mxu0 %v8451_v3 }
 0x631   :  { %8047 = vmatprep.subr.bf16.mxu0 %v9755_v47  ;;  %v5958_v47 = vrot.slane %v5941_v5, %v5957_v40 }
 0x634   :  { %8048 = vmatpush3.bf16.msra.mxu0 %v8452_v51 }
 0x637   :  { %8050 = vmatmul.mubr.msk.bf16.vlgmr.msra.gmra.mxu0 %vm6043_vm4, %v5924_v17 }
 0x6e7   :  { %v6081_v2 = vpop.f32.mrf.mxu0  ;;  %v6122_v58 = vpop.f32.mrf.mxu1 }
 0x6e8   :  { %v6082_v61 = vadd.f32 %v6081_v2, %v5946_v42  ;;  %v6123_v18 = vadd.f32 %v6122_v58, %v5954_v33 }
 0x6e9   :  { %v6083_v27 = vpop.f32.mrf.mxu0  ;;  %v6124_v31 = vpop.f32.mrf.mxu1 }
 0x6ea   :  { %v6084_v0 = vadd.f32 %v6083_v27, %v5950_v7  ;;  %v6125_v55 = vadd.f32 %v6124_v31, %v5958_v47 }
 0x6eb   :  { %v6085_v35 = vpop.f32.mrf.mxu0  ;;  %v6126_v62 = vpop.f32.mrf.mxu1 }
 0x6ec   :  { %v6133_v60 = vcombine.low %v6082_v61, %v6084_v0  ;;  %v6134_v8 = vcombine.low %v6123_v18, %v6125_v55 }
 0x6ed   :  { %v6086_v34 = vpop.f32.mrf.mxu0  ;;  %v6127_v6 = vpop.f32.mrf.mxu1 }
 0x6ee   :  { %v6141_v32 = vrot.slane %v6133_v60, %v6140_v30  ;;  %v6148_v36 = vrot.slane %v6134_v8, %v6140_v30 }
 0x6f0   :  { %v6149_v16 = vcombine.low %v6141_v32, %v6148_v36 }
 0x6f2   :  { %6151 = vst [vmem:[%s9867_s19] sm:$0xff] %v6149_v16  ;;  %s6253_s19 = sshll.u32 %s8487_s18, 4  ;;  %s6254_s19 = int_to_ptr.vmem [resolvable:$true] %s6253_s19 }
 0x6f3   :  { %s8459_s30 = scalar_lea.vmem %s6254_s19, 32  ;;  %p8464_p1 = scmp.lt.s32.totalorder %s6254_s19, %s6254_s19 }
 0x6f4   :  { %p8460_p0 = scmp.ne.s32.totalorder %s6254_s19, %s8459_s30  ;;  %p8465_p2 = scmp.lt.s32.totalorder %s8459_s30, %s8459_s30 }
 0x6f6   :  { %p8466_p3 = por %p8465_p2, %p8464_p1 }
 0x6f7   :  { %v6225_v1 = vpop.f32.mrf.mxu0 }
 0x6f8   :  { %v6226_v25 = vadd.f32 %v6898_v49, %v6225_v1  ;;  %p8467_p4 = pnand %p8466_p3, %p8460_p0 }
 0x6f9   :  { %v8051_v53 = vpop.f32.mrf.mxu0 }
 0x6fa   :  { %v6232_v4 = vsel %vm6231_vm5, %v6226_v25, -inf }
 0x6fb   :  { %6233 = vmax.xlane.f32.xlu0 %v6232_v4  ;;  %v6228_v37 = vpop.f32.mrf.mxu0 }
 0x6fd   :  { %v8052_v57 = vpop.f32.mrf.mxu0 }
 0x784   :  { %v6234_v15 = vpop.xlane.xlu0 %6233 }
 0x785   :  { %v6235_v39 = vsub.f32 %v6226_v25, %v6234_v15 }
 0x787   :  { %v6236_v29 = vmul.f32 1.442695, %v6235_v39 }
 0x789   :  { %8453 = vpow2.f32 %v6236_v29 }
 0x796   :  { %v8454_v21 = vpop.eup %8453 }
 0x797   :  { %v6238_v38 = vsel %vm6231_vm5, %v8454_v21, 0.0 }
 0x798   :  { %6239 = vadd.xlane.f32.xlu1 %v6238_v38 }
 0x821   :  { %v6240_v23 = vpop.xlane.xlu1 %6239 }
 0x822   :  { %8455 = vlog2.f32 %v6240_v23 }
 0x82f   :  { %v8456_v44 = vpop.eup %8455 }
 0x830   :  { %v6242_v41 = vmul.f32 0.6931472, %v8456_v44 }
 0x832   :  { %v6243_v26 = vsub.f32 %v6235_v39, %v6242_v41 }
 0x834   :  { %6244 = vst.msk [vmem:[#allocation6] sm:$0x3] %vm6231_vm5, %v6243_v26 }
 0x835   :  { %8470 = shalt.err (!%p8467_p4)
}
 0x836   :  { %6256 = dma.vmem_to_hbm [thread:$0]  %s6254_s19, 32, %s9868_s20, [#allocation7]  }
 0x837   :  { %8479 = dma.done.wait [#allocation7], 32  }
 0x838   :  { %8480 = vsyncadd [#allocation7], 4294967264 }
 0x839   :  { %6262 = vsyncpa [#allocation7], 1 }

</bundles_post_ra>
